<compile_context>
chip_gen: v5e
topology: v5e:2x2
jax: 0.10.0
libtpu: 0.0.40
codegen_flags: <defaults>
</compile_context>

<pallas_src>
import jax
import jax.numpy as jnp
import numpy as np
from jax.experimental import pallas as pl
from jax.experimental.pallas import tpu as pltpu


def _round_up(x, m):
    return (x + m - 1) // m * m


def _build_kernel(conv_layers, head, mlp_layers, *, wp, sm, hpwp, hw, feat,
                  y_pad, c0p, cdt):
    """Fused EBMConvMLP kernel; one invocation == one batch image.

    conv_layers: list of dicts(c_in, c_out, off, pre_relu, residual, post_relu, store)
    head:        (row_off, c_in) of the 1x1 conv
    mlp_layers:  list of (row_off, k_cols, d_out)
    """
    # 3x3 tap shifts in the flattened zero-padded frame (row-major, width wp).
    taps = [(kh - 1) * wp + (kw - 1) for kh in range(3) for kw in range(3)]
    n_mlp = len(mlp_layers)

    def kernel(mask_ref, x_ref, yt_ref, w_ref, b_ref, out_ref, act_ref):
        mask = mask_ref[...]                                   # (1, HPWP), f32

        # ---- reset the persistent padded-activation scratch (margins stay 0) ----
        act_ref[...] = jnp.zeros_like(act_ref)
        act_ref[0:c0p, :] = x_ref[0]                           # canonical input

        # ---- CNN: [3x3 conv, ResidualBlock] * n_blocks (+ fused final ReLU) ----
        a_int = None
        for cl in conv_layers:
            c_in, c_out, off = cl["c_in"], cl["c_out"], cl["off"]
            a_full = act_ref[0:c_in, :]                        # (c_in, L) f32
            x_act = jnp.maximum(a_full, 0.0) if cl["pre_relu"] else a_full
            # Stack the 9 shifted tap slices along K -> single MXU matmul.
            # (The stacked (9*c_in, HPWP) value may spill to VMEM; that is the
            #  im2col staging buffer and is read once by the matmul.)
            cols = jnp.concatenate(
                [x_act[:, sm + s: sm + s + hpwp] for s in taps], axis=0)
            w = w_ref[off:off + c_out, 0:9 * c_in]             # (c_out, 9*c_in)
            b = b_ref[off:off + c_out, :]                      # (c_out, 1) f32
            out = jnp.dot(w, cols.astype(cdt),
                          preferred_element_type=jnp.float32) + b
            if cl["residual"]:
                out = out + a_full[:, sm:sm + hpwp]            # un-activated input
            if cl["post_relu"]:
                out = jnp.maximum(out, 0.0)
            a_int = out * mask                                 # zero the pad ring
            if cl["store"]:
                act_ref[0:c_out, sm:sm + hpwp] = a_int

        # ---- 1x1 conv head + ReLU + global average pool over the interior ----
        hoff, hcin = head
        wh = w_ref[hoff:hoff + feat, 0:hcin]
        bh = b_ref[hoff:hoff + feat, :]
        z = jnp.dot(wh, a_int.astype(cdt), preferred_element_type=jnp.float32) + bh
        z = jnp.maximum(z, 0.0) * mask                         # (feat, HPWP)
        pooled = jnp.sum(z, axis=1, keepdims=True) * (1.0 / float(hw))   # (feat, 1)

        # ---- MLP on concat([pooled, y]); sample axis is lane-dense (padded) ----
        yt = yt_ref[0]                                         # (y_pad, Npad) f32
        h = None
        for li, (off, _k, d_out) in enumerate(mlp_layers):
            b = b_ref[off:off + d_out, :]
            if li == 0:
                # First layer split: no in-kernel concat/broadcast needed.
                w_f = w_ref[off:off + d_out, 0:feat]
                w_y = w_ref[off:off + d_out, feat:feat + y_pad]
                h = (jnp.dot(w_f, pooled.astype(cdt),
                             preferred_element_type=jnp.float32)
                     + jnp.dot(w_y, yt.astype(cdt),
                               preferred_element_type=jnp.float32) + b)
            else:
                w = w_ref[off:off + d_out, 0:_k]
                h = jnp.dot(w, h.astype(cdt),
                            preferred_element_type=jnp.float32) + b
            if li < n_mlp - 1:
                h = jnp.maximum(h, 0.0)
        out_ref[0] = h                                         # (1, Npad)

    return kernel


def ebm_conv_mlp_forward(x_nchw, y, cnn_params, head_params, mlp_params, *,
                         use_bf16_matmul=True):
    """x: (B, C0, H, W); y: (B, N, y_dim).  Returns (B, N) energies."""
    f32 = jnp.float32
    cdt = jnp.bfloat16 if use_bf16_matmul else f32
    B, C0, H, W = x_nchw.shape
    n_samples, y_dim = y.shape[1], y.shape[2]
    HP, WP = H + 2, W + 2
    HPWP = HP * WP
    SM = WP + 1                           # max |3x3 tap shift| -> fixed margin
    L = HPWP + 2 * SM                     # fixed canonical activation length
    C0P = _round_up(C0, 8)                # sublane-align input channels
    YP = _round_up(y_dim, 8)
    NP = _round_up(max(n_samples, 1), 128)   # lane-dense sample axis

    # ---- canonical input: zero ring + zero margins + zero channel padding ----
    xp = jnp.pad(x_nchw.astype(f32),
                 ((0, 0), (0, C0P - C0), (1, 1), (1, 1))).reshape(B, C0P, HPWP)
    xc = jnp.pad(xp, ((0, 0), (0, 0), (SM, SM)))               # (B, C0P, L)

    # interior mask over the padded frame (1 inside HxW, 0 on the pad ring)
    m2 = np.zeros((HP, WP), np.float32)
    m2[1:H + 1, 1:W + 1] = 1.0
    mask = jnp.asarray(m2.reshape(1, HPWP))

    # ---- y in column form, lane-padded sample axis, sublane-padded y_dim ----
    yT = jnp.transpose(y.astype(f32), (0, 2, 1))               # (B, y_dim, N)
    yT = jnp.pad(yT, ((0, 0), (0, YP - y_dim), (0, NP - n_samples)))

    # ---- pack all weights into ONE 2-D array and all biases into ONE column ----
    wh, bh = head_params
    feat = wh.shape[0]
    assert mlp_params[0][0].shape[1] == feat + y_dim

    def stack_w(w_oihw, c_in_pad):
        # (O, I, 3, 3) -> (O, 9*c_in_pad); col index = (kh*3+kw)*c_in_pad + i,
        # matching the in-kernel tap-stacked im2col ordering.
        o, i, _, _ = w_oihw.shape
        w = jnp.pad(w_oihw.astype(f32), ((0, 0), (0, c_in_pad - i), (0, 0), (0, 0)))
        return jnp.transpose(w, (0, 2, 3, 1)).reshape(o, 9 * c_in_pad)

    items = []           # (weight_2d, bias_1d), in kernel consumption order
    conv_layers = []
    n_blocks = len(cnn_params)
    c_in = C0P
    for bi, p in enumerate(cnn_params):
        c_out = p["conv_w"].shape[0]
        assert c_out % 8 == 0, "block channel counts must be sublane-aligned"
        # plain 3x3 conv
        items.append((stack_w(p["conv_w"], c_in), p["conv_b"]))
        conv_layers.append(dict(c_in=c_in, c_out=c_out, pre_relu=False,
                                residual=False, post_relu=False, store=True))
        # ResidualBlock: conv2(relu(x)) + x.  NOTE: rb1_w / rb1_b (conv1) are
        # dead in the reference forward (output overwritten before use) and are
        # not sent to the kernel.  Final CNN ReLU (activate=True) is fused into
        # the last block; its result is consumed directly by the head.
        items.append((stack_w(p["rb2_w"], c_out), p["rb2_b"]))
        conv_layers.append(dict(c_in=c_out, c_out=c_out, pre_relu=True,
                                residual=True, post_relu=(bi == n_blocks - 1),
                                store=(bi != n_blocks - 1)))
        c_in = c_out
    items.append((wh.astype(f32).reshape(feat, -1), bh))        # 1x1 head
    for li, (w, b) in enumerate(mlp_params):
        if li == 0:
            w0 = jnp.concatenate(
                [w[:, :feat].astype(f32),
                 jnp.pad(w[:, feat:].astype(f32), ((0, 0), (0, YP - y_dim)))],
                axis=1)
            items.append((w0, b))
        else:
            items.append((w.astype(f32), b))

    kmax = max(it[0].shape[1] for it in items)
    offs, rows = [], 0
    for w2, _ in items:
        offs.append(rows)                                       # 8-aligned rows
        rows += _round_up(w2.shape[0], 8)
    R = _round_up(rows, 8)
    wbuf = np.zeros((R, kmax), np.float32)
    bbuf = np.zeros((R, 1), np.float32)
    for (w2, b1), off in zip(items, offs):
        wbuf[off:off + w2.shape[0], :w2.shape[1]] = np.asarray(w2, np.float32)
        bbuf[off:off + b1.shape[0], 0] = np.asarray(b1, np.float32)
    wbuf = jnp.asarray(wbuf, dtype=cdt)                         # MXU operand dtype
    bbuf = jnp.asarray(bbuf)                                    # biases stay f32

    n_conv = len(conv_layers)
    for cl, off in zip(conv_layers, offs[:n_conv]):
        cl["off"] = off
    head = (offs[n_conv], c_in)
    mlp_layers = [(offs[n_conv + 1 + li],
                   (feat + YP) if li == 0 else w.shape[1],
                   w.shape[0])
                  for li, (w, _b) in enumerate(mlp_params)]

    c_max = max([C0P] + [cl["c_out"] for cl in conv_layers])

    kernel = _build_kernel(conv_layers, head, mlp_layers, wp=WP, sm=SM,
                           hpwp=HPWP, hw=H * W, feat=feat, y_pad=YP, c0p=C0P,
                           cdt=cdt)

    out = pl.pallas_call(
        kernel,
        out_shape=jax.ShapeDtypeStruct((B, 1, NP), f32),
        grid_spec=pltpu.PrefetchScalarGridSpec(
            num_scalar_prefetch=0,
            grid=(B,),
            in_specs=[
                pl.BlockSpec((1, HPWP), lambda b: (0, 0)),        # interior mask
                pl.BlockSpec((1, C0P, L), lambda b: (b, 0, 0)),   # canonical x
                pl.BlockSpec((1, YP, NP), lambda b: (b, 0, 0)),   # y (columns)
                pl.BlockSpec((R, kmax), lambda b: (0, 0)),        # packed weights
                pl.BlockSpec((R, 1), lambda b: (0, 0)),           # packed biases
            ],
            out_specs=pl.BlockSpec((1, 1, NP), lambda b: (b, 0, 0)),
            scratch_shapes=[pltpu.VMEM((c_max, L), jnp.float32)],  # activation
        ),
        compiler_params=pltpu.CompilerParams(
            dimension_semantics=("parallel",),     # >=2 steps -> both v7x TCs
            vmem_limit_bytes=32 * 1024 * 1024,
        ),
    )(mask, xc, yT, wbuf, bbuf)

    return out[:, 0, :n_samples]


# ----------------------------- pure-JAX reference -----------------------------

def _conv_nchw(x, w, b, pad):
    out = jax.lax.conv_general_dilated(
        x, w, window_strides=(1, 1), padding=((pad, pad), (pad, pad)),
        dimension_numbers=("NCHW", "OIHW", "NCHW"),
        precision=jax.lax.Precision.HIGHEST)
    return out + b.reshape(1, -1, 1, 1)


def reference_forward(x, y, cnn_params, head_params, mlp_params):
    h = x
    for p in cnn_params:
        h = _conv_nchw(h, p["conv_w"], p["conv_b"], 1)
        # ResidualBlock.forward exactly as written in PyTorch (conv1 output discarded):
        o = jax.nn.relu(h)
        o = _conv_nchw(o, p["rb1_w"], p["rb1_b"], 1)   # dead computation
        o = jax.nn.relu(h)
        o = _conv_nchw(o, p["rb2_w"], p["rb2_b"], 1)
        h = o + h
    h = jax.nn.relu(h)                                  # CNN(activate=True)
    wh, bh = head_params
    z = jax.nn.relu(_conv_nchw(h, wh, bh, 0))
    pooled = z.mean(axis=(2, 3))                        # GlobalAvgPool2d -> (B, feat)
    B, N, _ = y.shape
    fused = jnp.concatenate(
        [jnp.broadcast_to(pooled[:, None, :], (B, N, pooled.shape[-1])), y], axis=-1)
    f = fused.reshape(B * N, -1)
    for li, (w, b) in enumerate(mlp_params):
        f = jnp.dot(f, w.T, precision=jax.lax.Precision.HIGHEST) + b
        if li < len(mlp_params) - 1:
            f = jax.nn.relu(f)
    return f.reshape(B, N)


if __name__ == "__main__":
    key = jax.random.PRNGKey(0)
    keys = iter(jax.random.split(key, 64))

    def rnd(shape, scale):
        return jax.random.normal(next(keys), shape, jnp.float32) * scale

    B, C0, H, W = 2, 4, 16, 16
    N_SAMPLES, Y_DIM = 8, 2
    BLOCKS = (16, 32, 32)           # CNNConfig default
    FEAT = 16                       # EBMConvMLP's 1x1 conv output channels
    HIDDEN, DEPTH = 32, 2           # MLPConfig: input=FEAT+Y_DIM, hidden=32, depth=2, out=1

    x = rnd((B, C0, H, W), 1.0)
    y = rnd((B, N_SAMPLES, Y_DIM), 1.0)

    cnn_params = []
    cin = C0
    for cout in BLOCKS:
        cnn_params.append(dict(
            conv_w=rnd((cout, cin, 3, 3), 1.0 / np.sqrt(9 * cin)),
            conv_b=rnd((cout,), 0.1),
            rb1_w=rnd((cout, cout, 3, 3), 1.0 / np.sqrt(9 * cout)),   # dead (PyTorch bug)
            rb1_b=rnd((cout,), 0.1),
            rb2_w=rnd((cout, cout, 3, 3), 1.0 / np.sqrt(9 * cout)),
            rb2_b=rnd((cout,), 0.1),
        ))
        cin = cout

    head_params = (rnd((FEAT, BLOCKS[-1], 1, 1), 1.0 / np.sqrt(BLOCKS[-1])),
                   rnd((FEAT,), 0.1))

    mlp_dims = [FEAT + Y_DIM] + [HIDDEN] * DEPTH + [1]
    mlp_params = [(rnd((dout, din), 1.0 / np.sqrt(din)), rnd((dout,), 0.1))
                  for din, dout in zip(mlp_dims[:-1], mlp_dims[1:])]

    ref = reference_forward(x, y, cnn_params, head_params, mlp_params)

    # Strict check: f32 MXU operands.
    out_f32 = jax.block_until_ready(
        ebm_conv_mlp_forward(x, y, cnn_params, head_params, mlp_params,
                             use_bf16_matmul=False))
    np.testing.assert_allclose(np.asarray(out_f32), np.asarray(ref),
                               atol=2e-3, rtol=2e-3)

    # Performance path: bf16 MXU operands, f32 accumulation (native single-pass
    # MXU dtype on v5e/v6e/v7x); validated at a bf16-appropriate tolerance.
    out_bf16 = jax.block_until_ready(
        ebm_conv_mlp_forward(x, y, cnn_params, head_params, mlp_params,
                             use_bf16_matmul=True))
    np.testing.assert_allclose(np.asarray(out_bf16), np.asarray(ref),
                               atol=3e-2, rtol=3e-2)

    print("KERNEL_OK")
</pallas_src>

<mosaic_0001>
module attributes {stable_mosaic.version = 11 : i64} {
  func.func @kernel(%arg0: i32, %arg1: memref<1x324xf32, #tpu.memory_space<vmem>>, %arg2: memref<1x8x362xf32, #tpu.memory_space<vmem>>, %arg3: memref<1x8x128xf32, #tpu.memory_space<vmem>>, %arg4: memref<248x288xf32, #tpu.memory_space<vmem>>, %arg5: memref<248x1xf32, #tpu.memory_space<vmem>>, %arg6: memref<1x1x128xf32, #tpu.memory_space<vmem>>, %arg7: memref<32x362xf32, #tpu.memory_space<vmem>>) attributes {dimension_semantics = [#tpu.dimension_semantics<parallel>], iteration_bounds = array<i64: 2>, scalar_prefetch = 0 : i64, scratch_operands = 1 : i64, tpu.core_type = #tpu.core_type<tc>, window_params = [{pipeline_mode = #tpu.pipeline_mode<synchronous>, transform_indices = @transform_0, window_bounds = array<i64: 1, 324>}, {transform_indices = @transform_1, window_bounds = array<i64: 1, 8, 362>}, {transform_indices = @transform_2, window_bounds = array<i64: 1, 8, 128>}, {pipeline_mode = #tpu.pipeline_mode<synchronous>, transform_indices = @transform_3, window_bounds = array<i64: 248, 288>}, {pipeline_mode = #tpu.pipeline_mode<synchronous>, transform_indices = @transform_4, window_bounds = array<i64: 248, 1>}, {transform_indices = @transform_5, window_bounds = array<i64: 1, 1, 128>}]} {
    %c0 = arith.constant 0 : index
    %c0_0 = arith.constant 0 : index
    %0 = vector.load %arg1[%c0, %c0_0] : memref<1x324xf32, #tpu.memory_space<vmem>>, vector<1x324xf32>
    %cst = arith.constant 0.000000e+00 : f32
    %1 = vector.broadcast %cst : f32 to vector<32x362xf32>
    %c0_1 = arith.constant 0 : index
    %c0_2 = arith.constant 0 : index
    %2 = vector.load %arg7[%c0_1, %c0_2] : memref<32x362xf32, #tpu.memory_space<vmem>>, vector<32x362xf32>
    tpu.vector_store %arg7[%c0_1, %c0_2], %1 {strides = array<i32>} : memref<32x362xf32, #tpu.memory_space<vmem>>, vector<32x362xf32>,
    %c0_3 = arith.constant 0 : index
    %c0_4 = arith.constant 0 : index
    %c0_5 = arith.constant 0 : index
    %3 = vector.load %arg2[%c0_3, %c0_4, %c0_5] : memref<1x8x362xf32, #tpu.memory_space<vmem>>, vector<1x8x362xf32>
    %4 = vector.shape_cast %3 : vector<1x8x362xf32> to vector<8x362xf32>
    %c0_6 = arith.constant 0 : index
    %c0_7 = arith.constant 0 : index
    %5 = vector.load %arg7[%c0_6, %c0_7] : memref<32x362xf32, #tpu.memory_space<vmem>>, vector<8x362xf32>
    tpu.vector_store %arg7[%c0_6, %c0_7], %4 {strides = array<i32>} : memref<32x362xf32, #tpu.memory_space<vmem>>, vector<8x362xf32>,
    %c0_8 = arith.constant 0 : index
    %c0_9 = arith.constant 0 : index
    %6 = vector.load %arg7[%c0_8, %c0_9] : memref<32x362xf32, #tpu.memory_space<vmem>>, vector<8x362xf32>
    %7 = vector.extract_strided_slice %6 {offsets = [0, 0], sizes = [8, 324], strides = [1, 1]} : vector<8x362xf32> to vector<8x324xf32>
    %8 = vector.extract_strided_slice %6 {offsets = [0, 1], sizes = [8, 324], strides = [1, 1]} : vector<8x362xf32> to vector<8x324xf32>
    %9 = vector.extract_strided_slice %6 {offsets = [0, 2], sizes = [8, 324], strides = [1, 1]} : vector<8x362xf32> to vector<8x324xf32>
    %10 = vector.extract_strided_slice %6 {offsets = [0, 18], sizes = [8, 324], strides = [1, 1]} : vector<8x362xf32> to vector<8x324xf32>
    %11 = vector.extract_strided_slice %6 {offsets = [0, 19], sizes = [8, 324], strides = [1, 1]} : vector<8x362xf32> to vector<8x324xf32>
    %12 = vector.extract_strided_slice %6 {offsets = [0, 20], sizes = [8, 324], strides = [1, 1]} : vector<8x362xf32> to vector<8x324xf32>
    %13 = vector.extract_strided_slice %6 {offsets = [0, 36], sizes = [8, 324], strides = [1, 1]} : vector<8x362xf32> to vector<8x324xf32>
    %14 = vector.extract_strided_slice %6 {offsets = [0, 37], sizes = [8, 324], strides = [1, 1]} : vector<8x362xf32> to vector<8x324xf32>
    %15 = vector.extract_strided_slice %6 {offsets = [0, 38], sizes = [8, 324], strides = [1, 1]} : vector<8x362xf32> to vector<8x324xf32>
    %16 = tpu.concatenate %7, %8, %9, %10, %11, %12, %13, %14, %15 in 0 : vector<8x324xf32>, vector<8x324xf32>, vector<8x324xf32>, vector<8x324xf32>, vector<8x324xf32>, vector<8x324xf32>, vector<8x324xf32>, vector<8x324xf32>, vector<8x324xf32> -> vector<72x324xf32>
    %c0_10 = arith.constant 0 : index
    %c0_11 = arith.constant 0 : index
    %17 = vector.load %arg4[%c0_10, %c0_11] : memref<248x288xf32, #tpu.memory_space<vmem>>, vector<16x72xf32>
    %c0_12 = arith.constant 0 : index
    %c0_13 = arith.constant 0 : index
    %18 = vector.load %arg5[%c0_12, %c0_13] : memref<248x1xf32, #tpu.memory_space<vmem>>, vector<16x1xf32>
    %cst_14 = arith.constant dense<0.000000e+00> : vector<16x324xf32>
    %19 = tpu.matmul %17, %16, %cst_14 {dimension_numbers = #tpu.dot_dimension_numbers<[1], [0], [0], [1], [0, 0, 1, 1], [], []>} : vector<16x72xf32>, vector<72x324xf32>, vector<16x324xf32> -> vector<16x324xf32>
    %20 = vector.broadcast %18 : vector<16x1xf32> to vector<16x324xf32>
    %21 = arith.addf %19, %20 : vector<16x324xf32>
    %22 = vector.broadcast %0 : vector<1x324xf32> to vector<16x324xf32>
    %23 = arith.mulf %21, %22 : vector<16x324xf32>
    %c0_15 = arith.constant 0 : index
    %c19 = arith.constant 19 : index
    %24 = vector.load %arg7[%c0_15, %c19] : memref<32x362xf32, #tpu.memory_space<vmem>>, vector<16x324xf32>
    tpu.vector_store %arg7[%c0_15, %c19], %23 {strides = array<i32>} : memref<32x362xf32, #tpu.memory_space<vmem>>, vector<16x324xf32>,
    %c0_16 = arith.constant 0 : index
    %c0_17 = arith.constant 0 : index
    %25 = vector.load %arg7[%c0_16, %c0_17] : memref<32x362xf32, #tpu.memory_space<vmem>>, vector<16x362xf32>
    %cst_18 = arith.constant 0.000000e+00 : f32
    %26 = vector.broadcast %cst_18 : f32 to vector<16x362xf32>
    %27 = arith.maximumf %25, %26 : vector<16x362xf32>
    %28 = vector.extract_strided_slice %27 {offsets = [0, 0], sizes = [16, 324], strides = [1, 1]} : vector<16x362xf32> to vector<16x324xf32>
    %29 = vector.extract_strided_slice %27 {offsets = [0, 1], sizes = [16, 324], strides = [1, 1]} : vector<16x362xf32> to vector<16x324xf32>
    %30 = vector.extract_strided_slice %27 {offsets = [0, 2], sizes = [16, 324], strides = [1, 1]} : vector<16x362xf32> to vector<16x324xf32>
    %31 = vector.extract_strided_slice %27 {offsets = [0, 18], sizes = [16, 324], strides = [1, 1]} : vector<16x362xf32> to vector<16x324xf32>
    %32 = vector.extract_strided_slice %27 {offsets = [0, 19], sizes = [16, 324], strides = [1, 1]} : vector<16x362xf32> to vector<16x324xf32>
    %33 = vector.extract_strided_slice %27 {offsets = [0, 20], sizes = [16, 324], strides = [1, 1]} : vector<16x362xf32> to vector<16x324xf32>
    %34 = vector.extract_strided_slice %27 {offsets = [0, 36], sizes = [16, 324], strides = [1, 1]} : vector<16x362xf32> to vector<16x324xf32>
    %35 = vector.extract_strided_slice %27 {offsets = [0, 37], sizes = [16, 324], strides = [1, 1]} : vector<16x362xf32> to vector<16x324xf32>
    %36 = vector.extract_strided_slice %27 {offsets = [0, 38], sizes = [16, 324], strides = [1, 1]} : vector<16x362xf32> to vector<16x324xf32>
    %37 = tpu.concatenate %28, %29, %30, %31, %32, %33, %34, %35, %36 in 0 : vector<16x324xf32>, vector<16x324xf32>, vector<16x324xf32>, vector<16x324xf32>, vector<16x324xf32>, vector<16x324xf32>, vector<16x324xf32>, vector<16x324xf32>, vector<16x324xf32> -> vector<144x324xf32>
    %c16 = arith.constant 16 : index
    %c0_19 = arith.constant 0 : index
    %38 = vector.load %arg4[%c16, %c0_19] : memref<248x288xf32, #tpu.memory_space<vmem>>, vector<16x144xf32>
    %c16_20 = arith.constant 16 : index
    %c0_21 = arith.constant 0 : index
    %39 = vector.load %arg5[%c16_20, %c0_21] : memref<248x1xf32, #tpu.memory_space<vmem>>, vector<16x1xf32>
    %cst_22 = arith.constant dense<0.000000e+00> : vector<16x324xf32>
    %40 = tpu.matmul %38, %37, %cst_22 {dimension_numbers = #tpu.dot_dimension_numbers<[1], [0], [0], [1], [0, 0, 1, 1], [], []>} : vector<16x144xf32>, vector<144x324xf32>, vector<16x324xf32> -> vector<16x324xf32>
    %41 = vector.broadcast %39 : vector<16x1xf32> to vector<16x324xf32>
    %42 = arith.addf %40, %41 : vector<16x324xf32>
    %43 = vector.extract_strided_slice %25 {offsets = [0, 19], sizes = [16, 324], strides = [1, 1]} : vector<16x362xf32> to vector<16x324xf32>
    %44 = arith.addf %42, %43 : vector<16x324xf32>
    %45 = vector.broadcast %0 : vector<1x324xf32> to vector<16x324xf32>
    %46 = arith.mulf %44, %45 : vector<16x324xf32>
    %c0_23 = arith.constant 0 : index
    %c19_24 = arith.constant 19 : index
    %47 = vector.load %arg7[%c0_23, %c19_24] : memref<32x362xf32, #tpu.memory_space<vmem>>, vector<16x324xf32>
    tpu.vector_store %arg7[%c0_23, %c19_24], %46 {strides = array<i32>} : memref<32x362xf32, #tpu.memory_space<vmem>>, vector<16x324xf32>,
    %c0_25 = arith.constant 0 : index
    %c0_26 = arith.constant 0 : index
    %48 = vector.load %arg7[%c0_25, %c0_26] : memref<32x362xf32, #tpu.memory_space<vmem>>, vector<16x362xf32>
    %49 = vector.extract_strided_slice %48 {offsets = [0, 0], sizes = [16, 324], strides = [1, 1]} : vector<16x362xf32> to vector<16x324xf32>
    %50 = vector.extract_strided_slice %48 {offsets = [0, 1], sizes = [16, 324], strides = [1, 1]} : vector<16x362xf32> to vector<16x324xf32>
    %51 = vector.extract_strided_slice %48 {offsets = [0, 2], sizes = [16, 324], strides = [1, 1]} : vector<16x362xf32> to vector<16x324xf32>
    %52 = vector.extract_strided_slice %48 {offsets = [0, 18], sizes = [16, 324], strides = [1, 1]} : vector<16x362xf32> to vector<16x324xf32>
    %53 = vector.extract_strided_slice %48 {offsets = [0, 19], sizes = [16, 324], strides = [1, 1]} : vector<16x362xf32> to vector<16x324xf32>
    %54 = vector.extract_strided_slice %48 {offsets = [0, 20], sizes = [16, 324], strides = [1, 1]} : vector<16x362xf32> to vector<16x324xf32>
    %55 = vector.extract_strided_slice %48 {offsets = [0, 36], sizes = [16, 324], strides = [1, 1]} : vector<16x362xf32> to vector<16x324xf32>
    %56 = vector.extract_strided_slice %48 {offsets = [0, 37], sizes = [16, 324], strides = [1, 1]} : vector<16x362xf32> to vector<16x324xf32>
    %57 = vector.extract_strided_slice %48 {offsets = [0, 38], sizes = [16, 324], strides = [1, 1]} : vector<16x362xf32> to vector<16x324xf32>
    %58 = tpu.concatenate %49, %50, %51, %52, %53, %54, %55, %56, %57 in 0 : vector<16x324xf32>, vector<16x324xf32>, vector<16x324xf32>, vector<16x324xf32>, vector<16x324xf32>, vector<16x324xf32>, vector<16x324xf32>, vector<16x324xf32>, vector<16x324xf32> -> vector<144x324xf32>
    %c32 = arith.constant 32 : index
    %c0_27 = arith.constant 0 : index
    %59 = vector.load %arg4[%c32, %c0_27] : memref<248x288xf32, #tpu.memory_space<vmem>>, vector<32x144xf32>
    %c32_28 = arith.constant 32 : index
    %c0_29 = arith.constant 0 : index
    %60 = vector.load %arg5[%c32_28, %c0_29] : memref<248x1xf32, #tpu.memory_space<vmem>>, vector<32x1xf32>
    %cst_30 = arith.constant dense<0.000000e+00> : vector<32x324xf32>
    %61 = tpu.matmul %59, %58, %cst_30 {dimension_numbers = #tpu.dot_dimension_numbers<[1], [0], [0], [1], [0, 0, 1, 1], [], []>} : vector<32x144xf32>, vector<144x324xf32>, vector<32x324xf32> -> vector<32x324xf32>
    %62 = vector.broadcast %60 : vector<32x1xf32> to vector<32x324xf32>
    %63 = arith.addf %61, %62 : vector<32x324xf32>
    %64 = vector.broadcast %0 : vector<1x324xf32> to vector<32x324xf32>
    %65 = arith.mulf %63, %64 : vector<32x324xf32>
    %c0_31 = arith.constant 0 : index
    %c19_32 = arith.constant 19 : index
    %66 = vector.load %arg7[%c0_31, %c19_32] : memref<32x362xf32, #tpu.memory_space<vmem>>, vector<32x324xf32>
    tpu.vector_store %arg7[%c0_31, %c19_32], %65 {strides = array<i32>} : memref<32x362xf32, #tpu.memory_space<vmem>>, vector<32x324xf32>,
    %c0_33 = arith.constant 0 : index
    %c0_34 = arith.constant 0 : index
    %67 = vector.load %arg7[%c0_33, %c0_34] : memref<32x362xf32, #tpu.memory_space<vmem>>, vector<32x362xf32>
    %cst_35 = arith.constant 0.000000e+00 : f32
    %68 = vector.broadcast %cst_35 : f32 to vector<32x362xf32>
    %69 = arith.maximumf %67, %68 : vector<32x362xf32>
    %70 = vector.extract_strided_slice %69 {offsets = [0, 0], sizes = [32, 324], strides = [1, 1]} : vector<32x362xf32> to vector<32x324xf32>
    %71 = vector.extract_strided_slice %69 {offsets = [0, 1], sizes = [32, 324], strides = [1, 1]} : vector<32x362xf32> to vector<32x324xf32>
    %72 = vector.extract_strided_slice %69 {offsets = [0, 2], sizes = [32, 324], strides = [1, 1]} : vector<32x362xf32> to vector<32x324xf32>
    %73 = vector.extract_strided_slice %69 {offsets = [0, 18], sizes = [32, 324], strides = [1, 1]} : vector<32x362xf32> to vector<32x324xf32>
    %74 = vector.extract_strided_slice %69 {offsets = [0, 19], sizes = [32, 324], strides = [1, 1]} : vector<32x362xf32> to vector<32x324xf32>
    %75 = vector.extract_strided_slice %69 {offsets = [0, 20], sizes = [32, 324], strides = [1, 1]} : vector<32x362xf32> to vector<32x324xf32>
    %76 = vector.extract_strided_slice %69 {offsets = [0, 36], sizes = [32, 324], strides = [1, 1]} : vector<32x362xf32> to vector<32x324xf32>
    %77 = vector.extract_strided_slice %69 {offsets = [0, 37], sizes = [32, 324], strides = [1, 1]} : vector<32x362xf32> to vector<32x324xf32>
    %78 = vector.extract_strided_slice %69 {offsets = [0, 38], sizes = [32, 324], strides = [1, 1]} : vector<32x362xf32> to vector<32x324xf32>
    %79 = tpu.concatenate %70, %71, %72, %73, %74, %75, %76, %77, %78 in 0 : vector<32x324xf32>, vector<32x324xf32>, vector<32x324xf32>, vector<32x324xf32>, vector<32x324xf32>, vector<32x324xf32>, vector<32x324xf32>, vector<32x324xf32>, vector<32x324xf32> -> vector<288x324xf32>
    %c64 = arith.constant 64 : index
    %c0_36 = arith.constant 0 : index
    %80 = vector.load %arg4[%c64, %c0_36] : memref<248x288xf32, #tpu.memory_space<vmem>>, vector<32x288xf32>
    %c64_37 = arith.constant 64 : index
    %c0_38 = arith.constant 0 : index
    %81 = vector.load %arg5[%c64_37, %c0_38] : memref<248x1xf32, #tpu.memory_space<vmem>>, vector<32x1xf32>
    %cst_39 = arith.constant dense<0.000000e+00> : vector<32x324xf32>
    %82 = tpu.matmul %80, %79, %cst_39 {dimension_numbers = #tpu.dot_dimension_numbers<[1], [0], [0], [1], [0, 0, 1, 1], [], []>} : vector<32x288xf32>, vector<288x324xf32>, vector<32x324xf32> -> vector<32x324xf32>
    %83 = vector.broadcast %81 : vector<32x1xf32> to vector<32x324xf32>
    %84 = arith.addf %82, %83 : vector<32x324xf32>
    %85 = vector.extract_strided_slice %67 {offsets = [0, 19], sizes = [32, 324], strides = [1, 1]} : vector<32x362xf32> to vector<32x324xf32>
    %86 = arith.addf %84, %85 : vector<32x324xf32>
    %87 = vector.broadcast %0 : vector<1x324xf32> to vector<32x324xf32>
    %88 = arith.mulf %86, %87 : vector<32x324xf32>
    %c0_40 = arith.constant 0 : index
    %c19_41 = arith.constant 19 : index
    %89 = vector.load %arg7[%c0_40, %c19_41] : memref<32x362xf32, #tpu.memory_space<vmem>>, vector<32x324xf32>
    tpu.vector_store %arg7[%c0_40, %c19_41], %88 {strides = array<i32>} : memref<32x362xf32, #tpu.memory_space<vmem>>, vector<32x324xf32>,
    %c0_42 = arith.constant 0 : index
    %c0_43 = arith.constant 0 : index
    %90 = vector.load %arg7[%c0_42, %c0_43] : memref<32x362xf32, #tpu.memory_space<vmem>>, vector<32x362xf32>
    %91 = vector.extract_strided_slice %90 {offsets = [0, 0], sizes = [32, 324], strides = [1, 1]} : vector<32x362xf32> to vector<32x324xf32>
    %92 = vector.extract_strided_slice %90 {offsets = [0, 1], sizes = [32, 324], strides = [1, 1]} : vector<32x362xf32> to vector<32x324xf32>
    %93 = vector.extract_strided_slice %90 {offsets = [0, 2], sizes = [32, 324], strides = [1, 1]} : vector<32x362xf32> to vector<32x324xf32>
    %94 = vector.extract_strided_slice %90 {offsets = [0, 18], sizes = [32, 324], strides = [1, 1]} : vector<32x362xf32> to vector<32x324xf32>
    %95 = vector.extract_strided_slice %90 {offsets = [0, 19], sizes = [32, 324], strides = [1, 1]} : vector<32x362xf32> to vector<32x324xf32>
    %96 = vector.extract_strided_slice %90 {offsets = [0, 20], sizes = [32, 324], strides = [1, 1]} : vector<32x362xf32> to vector<32x324xf32>
    %97 = vector.extract_strided_slice %90 {offsets = [0, 36], sizes = [32, 324], strides = [1, 1]} : vector<32x362xf32> to vector<32x324xf32>
    %98 = vector.extract_strided_slice %90 {offsets = [0, 37], sizes = [32, 324], strides = [1, 1]} : vector<32x362xf32> to vector<32x324xf32>
    %99 = vector.extract_strided_slice %90 {offsets = [0, 38], sizes = [32, 324], strides = [1, 1]} : vector<32x362xf32> to vector<32x324xf32>
    %100 = tpu.concatenate %91, %92, %93, %94, %95, %96, %97, %98, %99 in 0 : vector<32x324xf32>, vector<32x324xf32>, vector<32x324xf32>, vector<32x324xf32>, vector<32x324xf32>, vector<32x324xf32>, vector<32x324xf32>, vector<32x324xf32>, vector<32x324xf32> -> vector<288x324xf32>
    %c96 = arith.constant 96 : index
    %c0_44 = arith.constant 0 : index
    %101 = vector.load %arg4[%c96, %c0_44] : memref<248x288xf32, #tpu.memory_space<vmem>>, vector<32x288xf32>
    %c96_45 = arith.constant 96 : index
    %c0_46 = arith.constant 0 : index
    %102 = vector.load %arg5[%c96_45, %c0_46] : memref<248x1xf32, #tpu.memory_space<vmem>>, vector<32x1xf32>
    %cst_47 = arith.constant dense<0.000000e+00> : vector<32x324xf32>
    %103 = tpu.matmul %101, %100, %cst_47 {dimension_numbers = #tpu.dot_dimension_numbers<[1], [0], [0], [1], [0, 0, 1, 1], [], []>} : vector<32x288xf32>, vector<288x324xf32>, vector<32x324xf32> -> vector<32x324xf32>
    %104 = vector.broadcast %102 : vector<32x1xf32> to vector<32x324xf32>
    %105 = arith.addf %103, %104 : vector<32x324xf32>
    %106 = vector.broadcast %0 : vector<1x324xf32> to vector<32x324xf32>
    %107 = arith.mulf %105, %106 : vector<32x324xf32>
    %c0_48 = arith.constant 0 : index
    %c19_49 = arith.constant 19 : index
    %108 = vector.load %arg7[%c0_48, %c19_49] : memref<32x362xf32, #tpu.memory_space<vmem>>, vector<32x324xf32>
    tpu.vector_store %arg7[%c0_48, %c19_49], %107 {strides = array<i32>} : memref<32x362xf32, #tpu.memory_space<vmem>>, vector<32x324xf32>,
    %c0_50 = arith.constant 0 : index
    %c0_51 = arith.constant 0 : index
    %109 = vector.load %arg7[%c0_50, %c0_51] : memref<32x362xf32, #tpu.memory_space<vmem>>, vector<32x362xf32>
    %cst_52 = arith.constant 0.000000e+00 : f32
    %110 = vector.broadcast %cst_52 : f32 to vector<32x362xf32>
    %111 = arith.maximumf %109, %110 : vector<32x362xf32>
    %112 = vector.extract_strided_slice %111 {offsets = [0, 0], sizes = [32, 324], strides = [1, 1]} : vector<32x362xf32> to vector<32x324xf32>
    %113 = vector.extract_strided_slice %111 {offsets = [0, 1], sizes = [32, 324], strides = [1, 1]} : vector<32x362xf32> to vector<32x324xf32>
    %114 = vector.extract_strided_slice %111 {offsets = [0, 2], sizes = [32, 324], strides = [1, 1]} : vector<32x362xf32> to vector<32x324xf32>
    %115 = vector.extract_strided_slice %111 {offsets = [0, 18], sizes = [32, 324], strides = [1, 1]} : vector<32x362xf32> to vector<32x324xf32>
    %116 = vector.extract_strided_slice %111 {offsets = [0, 19], sizes = [32, 324], strides = [1, 1]} : vector<32x362xf32> to vector<32x324xf32>
    %117 = vector.extract_strided_slice %111 {offsets = [0, 20], sizes = [32, 324], strides = [1, 1]} : vector<32x362xf32> to vector<32x324xf32>
    %118 = vector.extract_strided_slice %111 {offsets = [0, 36], sizes = [32, 324], strides = [1, 1]} : vector<32x362xf32> to vector<32x324xf32>
    %119 = vector.extract_strided_slice %111 {offsets = [0, 37], sizes = [32, 324], strides = [1, 1]} : vector<32x362xf32> to vector<32x324xf32>
    %120 = vector.extract_strided_slice %111 {offsets = [0, 38], sizes = [32, 324], strides = [1, 1]} : vector<32x362xf32> to vector<32x324xf32>
    %121 = tpu.concatenate %112, %113, %114, %115, %116, %117, %118, %119, %120 in 0 : vector<32x324xf32>, vector<32x324xf32>, vector<32x324xf32>, vector<32x324xf32>, vector<32x324xf32>, vector<32x324xf32>, vector<32x324xf32>, vector<32x324xf32>, vector<32x324xf32> -> vector<288x324xf32>
    %c128 = arith.constant 128 : index
    %c0_53 = arith.constant 0 : index
    %122 = vector.load %arg4[%c128, %c0_53] : memref<248x288xf32, #tpu.memory_space<vmem>>, vector<32x288xf32>
    %c128_54 = arith.constant 128 : index
    %c0_55 = arith.constant 0 : index
    %123 = vector.load %arg5[%c128_54, %c0_55] : memref<248x1xf32, #tpu.memory_space<vmem>>, vector<32x1xf32>
    %cst_56 = arith.constant dense<0.000000e+00> : vector<32x324xf32>
    %124 = tpu.matmul %122, %121, %cst_56 {dimension_numbers = #tpu.dot_dimension_numbers<[1], [0], [0], [1], [0, 0, 1, 1], [], []>} : vector<32x288xf32>, vector<288x324xf32>, vector<32x324xf32> -> vector<32x324xf32>
    %125 = vector.broadcast %123 : vector<32x1xf32> to vector<32x324xf32>
    %126 = arith.addf %124, %125 : vector<32x324xf32>
    %127 = vector.extract_strided_slice %109 {offsets = [0, 19], sizes = [32, 324], strides = [1, 1]} : vector<32x362xf32> to vector<32x324xf32>
    %128 = arith.addf %126, %127 : vector<32x324xf32>
    %cst_57 = arith.constant 0.000000e+00 : f32
    %129 = vector.broadcast %cst_57 : f32 to vector<32x324xf32>
    %130 = arith.maximumf %128, %129 : vector<32x324xf32>
    %131 = vector.broadcast %0 : vector<1x324xf32> to vector<32x324xf32>
    %132 = arith.mulf %130, %131 : vector<32x324xf32>
    %c160 = arith.constant 160 : index
    %c0_58 = arith.constant 0 : index
    %133 = vector.load %arg4[%c160, %c0_58] : memref<248x288xf32, #tpu.memory_space<vmem>>, vector<16x32xf32>
    %c160_59 = arith.constant 160 : index
    %c0_60 = arith.constant 0 : index
    %134 = vector.load %arg5[%c160_59, %c0_60] : memref<248x1xf32, #tpu.memory_space<vmem>>, vector<16x1xf32>
    %cst_61 = arith.constant dense<0.000000e+00> : vector<16x324xf32>
    %135 = tpu.matmul %133, %132, %cst_61 {dimension_numbers = #tpu.dot_dimension_numbers<[1], [0], [0], [1], [0, 0, 1, 1], [], []>} : vector<16x32xf32>, vector<32x324xf32>, vector<16x324xf32> -> vector<16x324xf32>
    %136 = vector.broadcast %134 : vector<16x1xf32> to vector<16x324xf32>
    %137 = arith.addf %135, %136 : vector<16x324xf32>
    %cst_62 = arith.constant 0.000000e+00 : f32
    %138 = vector.broadcast %cst_62 : f32 to vector<16x324xf32>
    %139 = arith.maximumf %137, %138 : vector<16x324xf32>
    %140 = vector.broadcast %0 : vector<1x324xf32> to vector<16x324xf32>
    %141 = arith.mulf %139, %140 : vector<16x324xf32>
    %cst_63 = arith.constant dense<0.000000e+00> : vector<16xf32>
    %142 = vector.multi_reduction <add>, %141, %cst_63 [1] : vector<16x324xf32> to vector<16xf32>
    %143 = vector.shape_cast %142 : vector<16xf32> to vector<16x1xf32>
    %cst_64 = arith.constant 3.906250e-03 : f32
    %144 = vector.broadcast %cst_64 : f32 to vector<16x1xf32>
    %145 = arith.mulf %143, %144 : vector<16x1xf32>
    %c0_65 = arith.constant 0 : index
    %c0_66 = arith.constant 0 : index
    %c0_67 = arith.constant 0 : index
    %146 = vector.load %arg3[%c0_65, %c0_66, %c0_67] : memref<1x8x128xf32, #tpu.memory_space<vmem>>, vector<1x8x128xf32>
    %147 = vector.shape_cast %146 : vector<1x8x128xf32> to vector<8x128xf32>
    %c176 = arith.constant 176 : index
    %c0_68 = arith.constant 0 : index
    %148 = vector.load %arg5[%c176, %c0_68] : memref<248x1xf32, #tpu.memory_space<vmem>>, vector<32x1xf32>
    %c176_69 = arith.constant 176 : index
    %c0_70 = arith.constant 0 : index
    %149 = vector.load %arg4[%c176_69, %c0_70] : memref<248x288xf32, #tpu.memory_space<vmem>>, vector<32x16xf32>
    %c176_71 = arith.constant 176 : index
    %c16_72 = arith.constant 16 : index
    %150 = vector.load %arg4[%c176_71, %c16_72] : memref<248x288xf32, #tpu.memory_space<vmem>>, vector<32x8xf32>
    %cst_73 = arith.constant dense<0.000000e+00> : vector<32x1xf32>
    %151 = tpu.matmul %149, %145, %cst_73 {dimension_numbers = #tpu.dot_dimension_numbers<[1], [0], [0], [1], [0, 0, 1, 1], [], []>} : vector<32x16xf32>, vector<16x1xf32>, vector<32x1xf32> -> vector<32x1xf32>
    %cst_74 = arith.constant dense<0.000000e+00> : vector<32x128xf32>
    %152 = tpu.matmul %150, %147, %cst_74 {dimension_numbers = #tpu.dot_dimension_numbers<[1], [0], [0], [1], [0, 0, 1, 1], [], []>} : vector<32x8xf32>, vector<8x128xf32>, vector<32x128xf32> -> vector<32x128xf32>
    %153 = vector.broadcast %151 : vector<32x1xf32> to vector<32x128xf32>
    %154 = arith.addf %153, %152 : vector<32x128xf32>
    %155 = vector.broadcast %148 : vector<32x1xf32> to vector<32x128xf32>
    %156 = arith.addf %154, %155 : vector<32x128xf32>
    %cst_75 = arith.constant 0.000000e+00 : f32
    %157 = vector.broadcast %cst_75 : f32 to vector<32x128xf32>
    %158 = arith.maximumf %156, %157 : vector<32x128xf32>
    %c208 = arith.constant 208 : index
    %c0_76 = arith.constant 0 : index
    %159 = vector.load %arg5[%c208, %c0_76] : memref<248x1xf32, #tpu.memory_space<vmem>>, vector<32x1xf32>
    %c208_77 = arith.constant 208 : index
    %c0_78 = arith.constant 0 : index
    %160 = vector.load %arg4[%c208_77, %c0_78] : memref<248x288xf32, #tpu.memory_space<vmem>>, vector<32x32xf32>
    %cst_79 = arith.constant dense<0.000000e+00> : vector<32x128xf32>
    %161 = tpu.matmul %160, %158, %cst_79 {dimension_numbers = #tpu.dot_dimension_numbers<[1], [0], [0], [1], [0, 0, 1, 1], [], []>} : vector<32x32xf32>, vector<32x128xf32>, vector<32x128xf32> -> vector<32x128xf32>
    %162 = vector.broadcast %159 : vector<32x1xf32> to vector<32x128xf32>
    %163 = arith.addf %161, %162 : vector<32x128xf32>
    %cst_80 = arith.constant 0.000000e+00 : f32
    %164 = vector.broadcast %cst_80 : f32 to vector<32x128xf32>
    %165 = arith.maximumf %163, %164 : vector<32x128xf32>
    %c240 = arith.constant 240 : index
    %c0_81 = arith.constant 0 : index
    %166 = vector.load %arg5[%c240, %c0_81] : memref<248x1xf32, #tpu.memory_space<vmem>>, vector<1x1xf32>
    %c240_82 = arith.constant 240 : index
    %c0_83 = arith.constant 0 : index
    %167 = vector.load %arg4[%c240_82, %c0_83] : memref<248x288xf32, #tpu.memory_space<vmem>>, vector<1x32xf32>
    %cst_84 = arith.constant dense<0.000000e+00> : vector<1x128xf32>
    %168 = tpu.matmul %167, %165, %cst_84 {dimension_numbers = #tpu.dot_dimension_numbers<[1], [0], [0], [1], [0, 0, 1, 1], [], []>} : vector<1x32xf32>, vector<32x128xf32>, vector<1x128xf32> -> vector<1x128xf32>
    %169 = vector.broadcast %166 : vector<1x1xf32> to vector<1x128xf32>
    %170 = arith.addf %168, %169 : vector<1x128xf32>
    %c0_85 = arith.constant 0 : index
    %c0_86 = arith.constant 0 : index
    %c0_87 = arith.constant 0 : index
    %171 = vector.load %arg6[%c0_85, %c0_86, %c0_87] : memref<1x1x128xf32, #tpu.memory_space<vmem>>, vector<1x1x128xf32>
    %172 = vector.shape_cast %171 : vector<1x1x128xf32> to vector<1x128xf32>
    %173 = vector.shape_cast %170 : vector<1x128xf32> to vector<1x1x128xf32>
    tpu.vector_store %arg6[%c0_85, %c0_86, %c0_87], %173 {strides = array<i32>} : memref<1x1x128xf32, #tpu.memory_space<vmem>>, vector<1x1x128xf32>,
    return
  }
  func.func @transform_0(%arg0: i32) -> (i32, i32) {
    %c0_i32 = arith.constant 0 : i32
    %c0_i32_0 = arith.constant 0 : i32
    %c0_i32_1 = arith.constant 0 : i32
    return %c0_i32, %c0_i32_0 : i32, i32
  }
  func.func @transform_1(%arg0: i32) -> (i32, i32, i32) {
    %c0_i32 = arith.constant 0 : i32
    %c0_i32_0 = arith.constant 0 : i32
    %c0_i32_1 = arith.constant 0 : i32
    return %arg0, %c0_i32, %c0_i32_0 : i32, i32, i32
  }
  func.func @transform_2(%arg0: i32) -> (i32, i32, i32) {
    %c0_i32 = arith.constant 0 : i32
    %c0_i32_0 = arith.constant 0 : i32
    %c0_i32_1 = arith.constant 0 : i32
    return %arg0, %c0_i32, %c0_i32_0 : i32, i32, i32
  }
  func.func @transform_3(%arg0: i32) -> (i32, i32) {
    %c0_i32 = arith.constant 0 : i32
    %c0_i32_0 = arith.constant 0 : i32
    %c0_i32_1 = arith.constant 0 : i32
    return %c0_i32, %c0_i32_0 : i32, i32
  }
  func.func @transform_4(%arg0: i32) -> (i32, i32) {
    %c0_i32 = arith.constant 0 : i32
    %c0_i32_0 = arith.constant 0 : i32
    %c0_i32_1 = arith.constant 0 : i32
    return %c0_i32, %c0_i32_0 : i32, i32
  }
  func.func @transform_5(%arg0: i32) -> (i32, i32, i32) {
    %c0_i32 = arith.constant 0 : i32
    %c0_i32_0 = arith.constant 0 : i32
    %c0_i32_1 = arith.constant 0 : i32
    return %arg0, %c0_i32, %c0_i32_0 : i32, i32, i32
  }
}

</mosaic_0001>

<bundles_post_ra>
// kernel: tpu_custom_call.1
= control target key start
LH: loop header
LB: loop body
LE: loop exit
PB: predicated region body
PF: predicated region fallthrough
CT: control target
= control target key end

     0   :  { %10 = vsyncpa [#allocation4], 0  ;;  %s8770_s0 = inlined_call_operand.vmem [shape: f32[1,324], index: 0, kind: input, shape index: {}]   ;;  %s8771_s1 = inlined_call_operand.vmem [shape: f32[2,8,362], index: 1, kind: input, shape index: {}]   ;;  %s8772_s2 = inlined_call_operand.vmem [shape: f32[2,8,128], index: 2, kind: input, shape index: {}]   ;;  %s8773_s3 = inlined_call_operand.vmem [shape: f32[248,288], index: 3, kind: input, shape index: {}]   ;;  %s8774_s4 = inlined_call_operand.vmem [shape: f32[248,1], index: 4, kind: input, shape index: {}]   ;;  %s8775_s5 = inlined_call_operand.hbm [shape: f32[2,1,128], index: 5, kind: output, shape index: {}]  }
   0x1   :  { %12 = vsyncpa [#allocation4 + $0x1], 0  ;;  %s5527_s18 = smov 0   ;;  %s5529_s19 = smov 0  }
   0x2   :  { %s5531_s20 = smov 0   ;;  %s5533_s21 = smov 0  }
   0x3 LB: > { %s5548_s22 = sadd.s32 4294967295, %s5483_s21   ;;  %s4262_s23 = sadd.s32 4294967294, %s5483_s21   ;;  %s5483_s21 = sphi %s5533_s21, %s9008_s21   ;;  %s5479_s20 = sphi %s5531_s20, %s9007_s20   ;;  %s5475_s19 = sphi %s5529_s19, %s9006_s19   ;;  %s5471_s18 = sphi %s5527_s18, %s9005_s18  }
   0x4   : > { %s5552_s24 = sadd.s32 1, %s5483_s21   ;;  %s140_s25 = sadd.s32 1, %s5479_s20 }
   0x5   : > { %s137_s26 = ssub.s32 %s5483_s21, %s5552_s24  ;;  %p150_p0 = scmp.ne.s32.totalorder %s5479_s20, %s5475_s19 }
   0x6   : > { %p138_p1 = scmp.eq.s32.totalorder %s137_s26, 0  ;;  %p151_p2 = scmp.eq.s32.totalorder %s5548_s22, 1 }
   0x7   : > { %p156_p3 = scmp.ne.s32.totalorder %s5475_s19, %s5471_s18  ;;  %p157_p4 = scmp.eq.s32.totalorder %s4262_s23, 1 }
   0x8   : > { %s5563_s27 = scalar_select %p138_p1, %s5479_s20, %s140_s25  }
   0x9   : > { %p5565_p5 = por %p151_p2, %p150_p0  ;;  %p5569_p6 = por %p157_p4, %p156_p3 }
   0xa   : > { %p4265_p7 = scmp.ge.s32.totalorder %s5483_s21, 1  ;;  %p199_p8 = scmp.lt.s32.totalorder %s5483_s21, 3 }
   0xc   : > { %p200_p9 = pnand %p4265_p7, %p199_p8 }
   0xd   : > { %p230_p10 = scmp.lt.s32.totalorder (!%p200_p9), %s5548_s22, 1  ;;  %s5486_s10 = smov (!%p200_p9), 91  }
   0xe   : > { %203 = sbr.rel (%p200_p9) target bundleno = 3629 (0xe2d), region = 40  ;;  %s8820_s11 = smov (!%p200_p9), 90  }
   0xf   : > { %s5488_s12 = smov (!%p200_p9), 92   ;;  %s5489_s13 = smov (!%p200_p9), 108  }
  0x10   : > { %s5490_s14 = smov (!%p200_p9), 109   ;;  %s5491_s15 = smov (!%p200_p9), 110  }
  0x11   : > { %s5492_s16 = smov (!%p200_p9), 126   ;;  %s5493_s17 = smov (!%p200_p9), 127  }
  0x12   : > { %s228_s26 = sand.u32 (!%p200_p9), 1, %s5475_s19  }
  0x13   : > { %v5485_v0 = vmov 0.0   ;;  %vm242_vm0 = vcmask 867328   ;;  %s5577_s30 = scalar_select %p230_p10, %s5548_s22, 1  ;;  %vm355_vm1 = vcmask 736256   ;;  %vm343_vm2 = vcmask 744448   ;;  %v364_v35 = vld [vmem:[%s8774_s4 + $0x8] sm:$0xff] }
  0x14   : > { %244 = vst [vmem:[#allocation2 + $0x18] sm:$0xff] %v5485_v0  ;;  %vm331_vm3 = vcmask 752640   ;;  %vm319_vm4 = vcmask 883712   ;;  %vm307_vm5 = vcmask 891904   ;;  %v363_v36 = vld [vmem:[%s8774_s4] sm:$0xff]  ;;  %v5494_v37 = vmov 0  }
  0x15   : > { %247 = vst [vmem:[#allocation2 + $0x30] sm:$0xff] %v5485_v0  ;;  %s4365_s6 = smul.u32 24, %s5577_s30  ;;  %4457 = vset.pattern.permute.xlu1 %v5494_v37  ;;  %4458 = vset.pattern.permute.xlu2 %v5494_v37  ;;  %vm295_vm6 = vcmask 900096   ;;  %vm283_vm7 = vcmask 1031168   ;;  %vm271_vm8 = vcmask 1039360   ;;  %v361_v55 = vld [vmem:[%s8773_s3] sm:$0xff] }
  0x16   : > { %250 = vst [vmem:[#allocation2 + $0x48] sm:$0xff] %v5485_v0  ;;  %4579 = vset.pattern.permute.xlu0 %v5494_v37  ;;  %vm375_vm9 = vcmask 588800   ;;  %v362_v58 = vld [vmem:[%s8773_s3 + $0x18] sm:$0xff]  ;;  %v239_v59 = vld [vmem:[%s8770_s0] sm:$0x7]  ;;  %vm493_vm10 = vcmask 1047704  }
  0x17   : > { %243 = vst.msk [vmem:[#allocation2 + $0x10] sm:$0xff] %vm242_vm0, %v5485_v0  ;;  %s234_s9 = scalar_lea.vmem %s8771_s1, %s4365_s6  ;;  %v5650_v61 = vperm.slane %v239_v59, 0  ;;  %s5495_s6 = smov 19   ;;  %vm496_vm11 = vcmask 711680   ;;  %vm482_vm12 = vcmask 154624   ;;  %vm711_vm13 = vcmask 130048  }
  0x18   : > { %246 = vst.msk [vmem:[#allocation2 + $0x28] sm:$0xff] %vm242_vm0, %v5485_v0  ;;  %v5583_v1 = vld [vmem:[%s234_s9] sm:$0xff]  ;;  %v5585_v2 = vld [vmem:[%s234_s9 + $0x8] sm:$0xff]  ;;  %v255_v3 = vld [vmem:[%s234_s9 + $0x10] sm:$0xff]  ;;  %vm1840_vm14 = vcmask 261120   ;;  %vm3918_vm15 = vcmask 556032   ;;  %s4191_s9 = scalar_lea.hbm %s8775_s5, %s5548_s22 }
  0x19   : > { %249 = vst.msk [vmem:[#allocation2 + $0x40] sm:$0xff] %vm242_vm0, %v5485_v0  ;;  %v4422_v4 = vpack.i.bf16 %v5585_v2, %v5583_v1  ;;  %s4183_s25 = scalar_lea.sflag [#allocation4], %s228_s26  ;;  %s5441_s22 = scalar_lea.hbm %s8775_s5, 2 }
  0x1a   : > { %252 = vst.msk [vmem:[#allocation2 + $0x58] sm:$0xff] %vm242_vm0, %v5485_v0 }
  0x1b   : > { %256 = vst [vmem:[#allocation2] sm:$0xff] %v5583_v1  ;;  %4423 = vrot.lane.b32.xlu1 %v4422_v4, %s5486_s10  ;;  %4418 = vrot.lane.b32.xlu0 %v4422_v4, %s8820_s11 }
  0x1c   : > { %258 = vst.msk [vmem:[#allocation2 + $0x10] sm:$0xff] %vm242_vm0, %v255_v3  ;;  %4428 = vrot.lane.b32.xlu2 %v4422_v4, %s5488_s12  ;;  %vm3988_vm0 = vcmask 64512  }
  0x23   : > { %v5593_v5 = vld [vmem:[#allocation2 + $0x10] sm:$0xff] }
  0x24   : > { %341 = vrot.lane.b32.xlu1 %v5593_v5, %s5486_s10  ;;  %353 = vrot.lane.b32.xlu0 %v5593_v5, %s8820_s11 }
  0x25   : > { %329 = vrot.lane.b32.xlu2 %v5593_v5, %s5488_s12 }
  0x2c   : > { %317 = vrot.lane.b32.xlu1 %v5593_v5, %s5489_s13  ;;  %4433 = vrot.lane.b32.xlu0 %v4422_v4, %s5489_s13 }
  0x2d   : > { %4438 = vrot.lane.b32.xlu2 %v4422_v4, %s5490_s14 }
  0x34   : > { %4443 = vrot.lane.b32.xlu1 %v4422_v4, %s5491_s15  ;;  %305 = vrot.lane.b32.xlu0 %v5593_v5, %s5490_s14 }
  0x35   : > { %293 = vrot.lane.b32.xlu2 %v5593_v5, %s5491_s15 }
  0x3c   : > { %4448 = vrot.lane.b32.xlu0 %v4422_v4, %s5492_s16  ;;  %281 = vrot.lane.b32.xlu1 %v5593_v5, %s5492_s16 }
  0x3d   : > { %4453 = vrot.lane.b32.xlu2 %v4422_v4, %s5493_s17  ;;  %v5654_v4 = vperm.slane %v239_v59, 2 }
  0x44   : > { %269 = vrot.lane.b32.xlu0 %v5593_v5, %s5493_s17  ;;  %372 = vperm.xlu1 %4457, %v364_v35  }
  0x45   : > { %367 = vperm.xlu2 %4458, %v363_v36  }
  0x76   : > { %v4429_v6 = vpop.permute.xlu2 %4428 }
  0x77   : > { %v4431_v14 = vunpack.i.h.bf16 %v4429_v6  ;;  %v4430_v15 = vunpack.i.l.bf16 %v4429_v6 }
  0x79   : > { %v332_v18 = vsel %vm331_vm3, %v4430_v15, %v4431_v14 }
  0x7f   : > { %v330_v7 = vpop.permute.xlu2 %329 }
  0x80   : > { %v333_v24 = vsel %vm331_vm3, %v4431_v14, %v330_v7 }
  0x87   : > { %v4439_v19 = vpop.permute.xlu2 %4438 }
  0x88   : > { %v4441_v25 = vunpack.i.h.bf16 %v4439_v19  ;;  %v4440_v26 = vunpack.i.l.bf16 %v4439_v19 }
  0x8a   : > { %v308_v34 = vsel %vm307_vm5, %v4440_v26, %v4441_v25 }
  0x8d   : > { %v4424_v8 = vpop.permute.xlu1 %4423  ;;  %v4419_v9 = vpop.permute.xlu0 %4418 }
  0x8e   : > { %v4426_v10 = vunpack.i.h.bf16 %v4424_v8  ;;  %v4425_v11 = vunpack.i.l.bf16 %v4424_v8  ;;  %v4421_v12 = vunpack.i.h.bf16 %v4419_v9  ;;  %v4420_v13 = vunpack.i.l.bf16 %v4419_v9 }
  0x8f   : > { %v294_v31 = vpop.permute.xlu2 %293  ;;  %v5656_v8 = vperm.slane %v239_v59, 1 }
  0x90   : > { %v356_v16 = vsel %vm355_vm1, %v4420_v13, %v4421_v12  ;;  %v344_v17 = vsel %vm343_vm2, %v4425_v11, %v4426_v10 }
  0x91   : > { %389 = vmatpush.msra.mxu0 %v356_v16 }
  0x93   : > { %390 = vmatpush.msra.mxu0 %v344_v17 }
  0x95   : > { %391 = vmatpush.msra.mxu0 %v332_v18 }
  0x96   : > { %v342_v20 = vpop.permute.xlu1 %341  ;;  %v354_v21 = vpop.permute.xlu0 %353 }
  0x97   : > { %435 = vmatpush.msra.mxu2 %v354_v21  ;;  %v357_v22 = vsel %vm355_vm1, %v4421_v12, %v354_v21  ;;  %v345_v23 = vsel %vm343_vm2, %v4426_v10, %v342_v20  ;;  %v4454_v45 = vpop.permute.xlu2 %4453 }
  0x98   : > { %412 = vmatpush.msra.mxu1 %v357_v22  ;;  %v4456_v46 = vunpack.i.h.bf16 %v4454_v45  ;;  %v4455_v47 = vunpack.i.l.bf16 %v4454_v45 }
  0x99   : > { %436 = vmatpush.msra.mxu2 %v342_v20 }
  0x9a   : > { %413 = vmatpush.msra.mxu1 %v345_v23  ;;  %v272_v54 = vsel %vm271_vm8, %v4455_v47, %v4456_v46 }
  0x9b   : > { %437 = vmatpush.msra.mxu2 %v330_v7 }
  0x9c   : > { %414 = vmatpush.msra.mxu1 %v333_v24 }
  0x9e   : > { %v318_v27 = vpop.permute.xlu1 %317  ;;  %v4434_v28 = vpop.permute.xlu0 %4433 }
  0x9f   : > { %v4436_v29 = vunpack.i.h.bf16 %v4434_v28  ;;  %v4435_v30 = vunpack.i.l.bf16 %v4434_v28  ;;  %438 = vmatpush.msra.mxu2 %v318_v27  ;;  %v368_v60 = vpop.permute.xlu2 %367 }
  0xa1   : > { %v320_v32 = vsel %vm319_vm4, %v4435_v30, %v4436_v29  ;;  %v321_v33 = vsel %vm319_vm4, %v4436_v29, %v318_v27 }
  0xa2   : > { %392 = vmatpush.msra.mxu0 %v320_v32  ;;  %415 = vmatpush.msra.mxu1 %v321_v33 }
  0xa4   : > { %393 = vmatpush.msra.mxu0 %v308_v34 }
  0xa6   : > { %v4444_v38 = vpop.permute.xlu1 %4443  ;;  %v306_v39 = vpop.permute.xlu0 %305 }
  0xa7   : > { %v4446_v40 = vunpack.i.h.bf16 %v4444_v38  ;;  %v4445_v41 = vunpack.i.l.bf16 %v4444_v38  ;;  %439 = vmatpush.msra.mxu2 %v306_v39  ;;  %v309_v42 = vsel %vm307_vm5, %v4441_v25, %v306_v39 }
  0xa8   : > { %416 = vmatpush.msra.mxu1 %v309_v42  ;;  %v700_v42 = vld [vmem:[%s8774_s4 + $0x18] sm:$0xff] }
  0xa9   : > { %440 = vmatpush.msra.mxu2 %v294_v31  ;;  %v297_v43 = vsel %vm295_vm6, %v4446_v40, %v294_v31  ;;  %v296_v44 = vsel %vm295_vm6, %v4445_v41, %v4446_v40 }
  0xaa   : > { %417 = vmatpush.msra.mxu1 %v297_v43  ;;  %394 = vmatpush.msra.mxu0 %v296_v44  ;;  %v699_v43 = vld [vmem:[%s8774_s4 + $0x10] sm:$0xff] }
  0xae   : > { %v4449_v48 = vpop.permute.xlu0 %4448  ;;  %v282_v49 = vpop.permute.xlu1 %281 }
  0xaf   : > { %v4451_v50 = vunpack.i.h.bf16 %v4449_v48  ;;  %v4450_v51 = vunpack.i.l.bf16 %v4449_v48  ;;  %441 = vmatpush.msra.mxu2 %v282_v49 }
  0xb1   : > { %v284_v52 = vsel %vm283_vm7, %v4450_v51, %v4451_v50  ;;  %v285_v53 = vsel %vm283_vm7, %v4451_v50, %v282_v49 }
  0xb2   : > { %395 = vmatpush.msra.mxu0 %v284_v52  ;;  %418 = vmatpush.msra.mxu1 %v285_v53 }
  0xb4   : > { %396 = vmatpush.msra.mxu0 %v272_v54 }
  0xb6   : > { %v270_v56 = vpop.permute.xlu0 %269  ;;  %397 = vmatpush.msra.mxu0 %v5583_v1 }
  0xb7   : > { %4268 = vmatmul.msk.f32.vlgmr.msra.gmra.mxu0 %vm375_vm9, %v361_v55  ;;  %442 = vmatpush.msra.mxu2 %v270_v56  ;;  %v273_v57 = vsel %vm271_vm8, %v4456_v46, %v270_v56 }
  0xb8   : > { %419 = vmatpush.msra.mxu1 %v273_v57 }
  0xb9   : > { %443 = vmatpush.msra.mxu2 %v5593_v5 }
  0xba   : > { %420 = vmatpush.msra.mxu1 %v5585_v2  ;;  %4272 = vmatmul.msk.f32.vlgmr.msra.gmra.mxu2 %vm375_vm9, %v361_v55  ;;  %v373_v2 = vpop.permute.xlu1 %372 }
  0xbb   : > { %4270 = vmatmul.msk.f32.vlgmr.msra.gmra.mxu1 %vm375_vm9, %v361_v55 }
  0xbf   : > { %4269 = vmatmul.msk.f32.gmra.mxu0 %vm375_vm9, %v362_v58 }
  0xc2   : > { %4273 = vmatmul.msk.f32.gmra.mxu2 %vm375_vm9, %v362_v58 }
  0xc3   : > { %4271 = vmatmul.msk.f32.gmra.mxu1 %vm375_vm9, %v362_v58 }
 0x134   : > { %v399_v62 = vpop.f32.mrf.mxu0 }
 0x135   : > { %v400_v63 = vadd.f32 %v399_v62, %v368_v60 }
 0x137   : > { %v458_v0 = vmul.f32 %v5650_v61, %v400_v63 }
 0x138   : > { %v422_v1 = vpop.f32.mrf.mxu1 }
 0x139   : > { %470 = vrot.lane.b32.xlu2 %v458_v0, %s5495_s6  ;;  %v423_v12 = vadd.f32 %v422_v1, %v368_v60 }
 0x13b   : > { %v459_v15 = vmul.f32 %v5656_v8, %v423_v12 }
 0x13c   : > { %v402_v3 = vpop.f32.mrf.mxu0 }
 0x13d   : > { %v403_v5 = vadd.f32 %v402_v3, %v373_v2  ;;  %v445_v6 = vpop.f32.mrf.mxu2 }
 0x13e   : > { %v446_v7 = vadd.f32 %v445_v6, %v368_v60 }
 0x13f   : > { %v461_v9 = vmul.f32 %v5650_v61, %v403_v5 }
 0x140   : > { %v460_v10 = vmul.f32 %v5654_v4, %v446_v7  ;;  %v425_v11 = vpop.f32.mrf.mxu1 }
 0x141   : > { %v426_v13 = vadd.f32 %v425_v11, %v373_v2  ;;  %476 = vrot.lane.b32.xlu0 %v461_v9, %s5495_s6 }
 0x142   : > { %474 = vrot.lane.b32.xlu2 %v460_v10, %s5495_s6 }
 0x143   : > { %v462_v14 = vmul.f32 %v5656_v8, %v426_v13 }
 0x145   : > { %v448_v16 = vpop.f32.mrf.mxu2  ;;  %478 = vrot.lane.b32.xlu1 %v462_v14, %s5495_s6 }
 0x146   : > { %v449_v17 = vadd.f32 %v448_v16, %v373_v2 }
 0x148   : > { %v463_v18 = vmul.f32 %v5654_v4, %v449_v17 }
 0x149   : > { %472 = vrot.lane.b32.xlu0 %v459_v15, %s5495_s6 }
 0x14d   : > { %480 = vrot.lane.b32.xlu1 %v463_v18, %s5495_s6 }
 0x193   : > { %v471_v19 = vpop.permute.xlu2 %470 }
 0x194   : > { %494 = vst.msk [vmem:[#allocation2] sm:$0xff] %vm493_vm10, %v471_v19 }
 0x19b   : > { %v5670_v22 = vld [vmem:[#allocation2] sm:$0xff] }
 0x19c   : > { %v475_v23 = vpop.permute.xlu2 %474  ;;  %v507_v27 = vmax.f32 %v5670_v22, 0.0 }
 0x1b3   : > { %v477_v20 = vpop.permute.xlu0 %476 }
 0x1b4   : > { %498 = vst.msk [vmem:[#allocation2 + $0x18] sm:$0xff] %vm493_vm10, %v477_v20 }
 0x1b7   : > { %v479_v21 = vpop.permute.xlu1 %478 }
 0x1b8   : > { %v5690_v33 = vsel %vm482_vm12, %v477_v20, %v479_v21 }
 0x1b9   : > { %v511_v35 = vmax.f32 %v5690_v33, 0.0 }
 0x1bb   : > { %v473_v24 = vpop.permute.xlu0 %472  ;;  %v5683_v31 = vld [vmem:[#allocation2 + $0x18] sm:$0xff] }
 0x1bc   : > { %v5673_v25 = vsel %vm482_vm12, %v471_v19, %v473_v24  ;;  %v484_v26 = vsel %vm482_vm12, %v473_v24, %v475_v23  ;;  %v510_v34 = vmax.f32 %v5683_v31, 0.0 }
 0x1bd   : > { %497 = vst.msk [vmem:[#allocation2 + $0x10] sm:$0xff] %vm496_vm11, %v484_v26  ;;  %v508_v28 = vmax.f32 %v5673_v25, 0.0 }
 0x1be   : > { %v4489_v36 = vpack.i.bf16 %v511_v35, %v510_v34 }
 0x1bf   : > { %v481_v29 = vpop.permute.xlu1 %480  ;;  %v4469_v30 = vpack.i.bf16 %v508_v28, %v507_v27 }
 0x1c0   : > { %v486_v32 = vsel %vm482_vm12, %v479_v21, %v481_v29 }
 0x1c1   : > { %500 = vst.msk [vmem:[#allocation2 + $0x28] sm:$0xff] %vm496_vm11, %v486_v32  ;;  %4470 = vrot.lane.b32.xlu2 %v4469_v30, %s5489_s13  ;;  %4465 = vrot.lane.b32.xlu0 %v4469_v30, %s5488_s12 }
 0x1c2   : > { %4460 = vrot.lane.b32.xlu1 %v4469_v30, %s5486_s10 }
 0x1c4   : > { %v5706_v38 = vld [vmem:[#allocation2 + $0x10] sm:$0xff] }
 0x1c5   : > { %v509_v40 = vmax.f32 %v5706_v38, 0.0 }
 0x1c8   : > { %v5702_v37 = vld [vmem:[#allocation2 + $0x28] sm:$0xff] }
 0x1c9   : > { %4490 = vrot.lane.b32.xlu2 %v4489_v36, %s5488_s12  ;;  %4485 = vrot.lane.b32.xlu0 %v4489_v36, %s5486_s10  ;;  %v512_v39 = vmax.f32 %v5702_v37, 0.0 }
 0x1ca   : > { %4475 = vrot.lane.b32.xlu1 %v4469_v30, %s5490_s14 }
 0x1cb   : > { %v4529_v41 = vpack.i.bf16 %v509_v40, %v512_v39 }
 0x1d1   : > { %4515 = vrot.lane.b32.xlu2 %v4489_v36, %s5491_s15  ;;  %4510 = vrot.lane.b32.xlu0 %v4489_v36, %s5490_s14 }
 0x1d2   : > { %4480 = vrot.lane.b32.xlu1 %v4469_v30, %s5491_s15 }
 0x1d9   : > { %4520 = vrot.lane.b32.xlu2 %v4489_v36, %s5492_s16  ;;  %4530 = vrot.lane.b32.xlu0 %v4529_v41, %s5486_s10 }
 0x1da   : > { %4495 = vrot.lane.b32.xlu1 %v4489_v36, %s5489_s13 }
 0x1e1   : > { %4525 = vrot.lane.b32.xlu2 %v4489_v36, %s5493_s17  ;;  %4535 = vrot.lane.b32.xlu0 %v4529_v41, %s5488_s12 }
 0x1e2   : > { %4500 = vrot.lane.b32.xlu1 %v4469_v30, %s5492_s16 }
 0x1e9   : > { %4555 = vrot.lane.b32.xlu2 %v4529_v41, %s5490_s14  ;;  %4540 = vrot.lane.b32.xlu0 %v4529_v41, %s5489_s13 }
 0x1ea   : > { %4505 = vrot.lane.b32.xlu1 %v4469_v30, %s5493_s17 }
 0x1f1   : > { %4560 = vrot.lane.b32.xlu2 %v4529_v41, %s5491_s15  ;;  %4545 = vrot.lane.b32.xlu0 %v4489_v36, %s8820_s11 }
 0x1f2   : > { %4550 = vrot.lane.b32.xlu1 %v4469_v30, %s8820_s11 }
 0x1f9   : > { %4575 = vrot.lane.b32.xlu2 %v4529_v41, %s8820_s11  ;;  %4565 = vrot.lane.b32.xlu0 %v4529_v41, %s5492_s16 }
 0x1fa   : > { %4570 = vrot.lane.b32.xlu1 %v4529_v41, %s5493_s17 }
 0x201   : > { %868 = vrot.lane.b32.xlu2 %v5683_v31, %s5490_s14  ;;  %708 = vperm.xlu0 %4579, %v700_v42  }
 0x202   : > { %703 = vperm.xlu1 %4457, %v699_v43  }
 0x209   : > { %872 = vrot.lane.b32.xlu2 %v5702_v37, %s5490_s14  ;;  %862 = vrot.lane.b32.xlu0 %v5670_v22, %s5490_s14 }
 0x20a   : > { %870 = vrot.lane.b32.xlu1 %v5690_v33, %s5490_s14 }
 0x211   : > { %866 = vrot.lane.b32.xlu2 %v5706_v38, %s5490_s14 }
 0x212   : > { %864 = vrot.lane.b32.xlu1 %v5673_v25, %s5490_s14 }
 0x21b   : > { %v5748_v44 = vpop.permute.xlu2 %4470 }
 0x21c   : > { %v4473_v10 = vunpack.i.h.bf16 %v5748_v44  ;;  %v4472_v11 = vunpack.i.l.bf16 %v5748_v44 }
 0x21e   : > { %v619_v19 = vsel %vm319_vm4, %v4472_v11, %v4473_v10 }
 0x223   : > { %v5750_v45 = vpop.permute.xlu2 %4490 }
 0x224   : > { %v4493_v57 = vunpack.i.h.bf16 %v5750_v45  ;;  %v4492_v58 = vunpack.i.l.bf16 %v5750_v45 }
 0x226   : > { %v643_v0 = vsel %vm331_vm3, %v4492_v58, %v4493_v57  ;;  %v696_v58 = vld [vmem:[%s8773_s3 + $0x38] sm:$0xff] }
 0x22b   : > { %v5752_v46 = vpop.permute.xlu2 %4515 }
 0x22c   : > { %v4518_v20 = vunpack.i.h.bf16 %v5752_v46  ;;  %v4517_v21 = vunpack.i.l.bf16 %v5752_v46 }
 0x233   : > { %v5754_v47 = vpop.permute.xlu0 %4465  ;;  %v5756_v48 = vpop.permute.xlu2 %4520 }
 0x234   : > { %v5758_v49 = vpop.permute.xlu1 %4460  ;;  %v4468_v60 = vunpack.i.h.bf16 %v5754_v47  ;;  %v4467_v62 = vunpack.i.l.bf16 %v5754_v47  ;;  %v4523_v43 = vunpack.i.h.bf16 %v5756_v48 }
 0x235   : > { %v4463_v52 = vunpack.i.h.bf16 %v5758_v49  ;;  %v4462_v53 = vunpack.i.l.bf16 %v5758_v49 }
 0x236   : > { %v641_v5 = vsel %vm331_vm3, %v4467_v62, %v4468_v60 }
 0x237   : > { %v663_v63 = vsel %vm343_vm2, %v4462_v53, %v4463_v52  ;;  %v4522_v53 = vunpack.i.l.bf16 %v5756_v48 }
 0x23b   : > { %v5760_v50 = vpop.permute.xlu0 %4485  ;;  %v5762_v51 = vpop.permute.xlu2 %4525 }
 0x23c   : > { %v4488_v54 = vunpack.i.h.bf16 %v5760_v50  ;;  %v4487_v55 = vunpack.i.l.bf16 %v5760_v50  ;;  %v5768_v56 = vpop.permute.xlu1 %4475 }
 0x23d   : > { %v4478_v17 = vunpack.i.h.bf16 %v5768_v56  ;;  %v4477_v18 = vunpack.i.l.bf16 %v5768_v56 }
 0x23e   : > { %v665_v59 = vsel %vm343_vm2, %v4487_v55, %v4488_v54  ;;  %v577_v55 = vsel %vm295_vm6, %v4517_v21, %v4518_v20 }
 0x23f   : > { %718 = vmatpush.msra.mxu3 %v665_v59  ;;  %v597_v41 = vsel %vm307_vm5, %v4477_v18, %v4478_v17 }
 0x241   : > { %719 = vmatpush.msra.mxu3 %v663_v63 }
 0x243   : > { %v5783_v1 = vpop.permute.xlu0 %4510  ;;  %v5785_v2 = vpop.permute.xlu2 %4555  ;;  %720 = vmatpush.msra.mxu3 %v643_v0  ;;  %v4528_v0 = vunpack.i.h.bf16 %v5762_v51 }
 0x244   : > { %v5787_v3 = vpop.permute.xlu1 %4480  ;;  %v4513_v14 = vunpack.i.h.bf16 %v5783_v1  ;;  %v4512_v15 = vunpack.i.l.bf16 %v5783_v1  ;;  %v4557_v45 = vunpack.i.l.bf16 %v5785_v2 }
 0x245   : > { %721 = vmatpush.msra.mxu3 %v641_v5  ;;  %v4483_v32 = vunpack.i.h.bf16 %v5787_v3  ;;  %v4482_v36 = vunpack.i.l.bf16 %v5787_v3  ;;  %v4527_v5 = vunpack.i.l.bf16 %v5762_v51 }
 0x246   : > { %v599_v26 = vsel %vm307_vm5, %v4512_v15, %v4513_v14 }
 0x247   : > { %v575_v63 = vsel %vm295_vm6, %v4482_v36, %v4483_v32  ;;  %v533_v21 = vsel %vm271_vm8, %v4527_v5, %v4528_v0 }
 0x24b   : > { %v5792_v6 = vpop.permute.xlu0 %4530  ;;  %v5794_v7 = vpop.permute.xlu2 %4560 }
 0x24c   : > { %v5796_v9 = vpop.permute.xlu1 %4495  ;;  %v4533_v31 = vunpack.i.h.bf16 %v5792_v6 }
 0x24d   : > { %v4498_v12 = vunpack.i.h.bf16 %v5796_v9  ;;  %v4497_v13 = vunpack.i.l.bf16 %v5796_v9  ;;  %v4562_v9 = vunpack.i.l.bf16 %v5794_v7 }
 0x24f   : > { %v621_v16 = vsel %vm319_vm4, %v4497_v13, %v4498_v12  ;;  %v555_v13 = vsel %vm283_vm7, %v4522_v53, %v4523_v43 }
 0x250   : > { %722 = vmatpush.msra.mxu3 %v621_v16 }
 0x252   : > { %723 = vmatpush.msra.mxu3 %v619_v19 }
 0x253   : > { %v5814_v23 = vpop.permute.xlu0 %4535  ;;  %v4576_v24 = vpop.permute.xlu2 %4575 }
 0x254   : > { %v5819_v29 = vpop.permute.xlu1 %4500  ;;  %724 = vmatpush.msra.mxu3 %v599_v26  ;;  %v4577_v30 = vunpack.i.l.bf16 %v4576_v24  ;;  %v4578_v42 = vunpack.i.h.bf16 %v4576_v24  ;;  %v698_v24 = vld [vmem:[%s8773_s3 + $0x50] sm:$0xff] }
 0x255   : > { %v4503_v59 = vunpack.i.h.bf16 %v5819_v29  ;;  %v4502_v62 = vunpack.i.l.bf16 %v5819_v29 }
 0x256   : > { %725 = vmatpush.msra.mxu3 %v597_v41  ;;  %847 = vmatpush.msrb.mxu0 %v4577_v30 }
 0x257   : > { %v553_v19 = vsel %vm283_vm7, %v4502_v62, %v4503_v59  ;;  %v5869_v62 = vld [vmem:[%s8773_s3 + $0x30] sm:$0xff] }
 0x258   : > { %726 = vmatpush.msra.mxu3 %v577_v55  ;;  %848 = vmatpush.msrb.mxu0 %v4578_v42 }
 0x259   : > { %4278 = vmatmul.msk.f32.vlgmr.msrb.gmra.mxu0 %vm711_vm13, %v696_v58 }
 0x25a   : > { %727 = vmatpush.msra.mxu3 %v575_v63 }
 0x25b   : > { %v5842_v11 = vpop.permute.xlu0 %4540 }
 0x25c   : > { %v5847_v15 = vpop.permute.xlu1 %4505  ;;  %728 = vmatpush.msra.mxu3 %v555_v13  ;;  %v4532_v13 = vunpack.i.l.bf16 %v5792_v6  ;;  %v664_v6 = vsel %vm343_vm2, %v4463_v52, %v4533_v31  ;;  %v4543_v52 = vunpack.i.h.bf16 %v5842_v11 }
 0x25d   : > { %v4508_v16 = vunpack.i.h.bf16 %v5847_v15  ;;  %v4507_v18 = vunpack.i.l.bf16 %v5847_v15  ;;  %v869_v15 = vpop.permute.xlu2 %868 }
 0x25e   : > { %729 = vmatpush.msra.mxu3 %v553_v19  ;;  %v666_v22 = vsel %vm343_vm2, %v4488_v54, %v4532_v13  ;;  %v4542_v54 = vunpack.i.l.bf16 %v5842_v11  ;;  %v620_v47 = vsel %vm319_vm4, %v4473_v10, %v4543_v52  ;;  %v4563_v10 = vunpack.i.h.bf16 %v5794_v7 }
 0x25f   : > { %v531_v26 = vsel %vm271_vm8, %v4507_v18, %v4508_v16 }
 0x260   : > { %730 = vmatpush.msra.mxu3 %v533_v21 }
 0x261   : > { %4279 = vmatmul.msk.f32.gmra.mxu0 %vm711_vm13, %v698_v24 }
 0x262   : > { %731 = vmatpush.msra.mxu3 %v531_v26 }
 0x263   : > { %v4546_v36 = vpop.permute.xlu0 %4545 }
 0x264   : > { %v4551_v41 = vpop.permute.xlu1 %4550  ;;  %v4548_v53 = vunpack.i.h.bf16 %v4546_v36  ;;  %v4547_v55 = vunpack.i.l.bf16 %v4546_v36  ;;  %732 = vmatpush.msra.mxu3 %v510_v34 }
 0x265   : > { %v4553_v63 = vunpack.i.h.bf16 %v4551_v41  ;;  %v4552_v5 = vunpack.i.l.bf16 %v4551_v41  ;;  %v873_v41 = vpop.permute.xlu2 %872 }
 0x266   : > { %733 = vmatpush.msra.mxu3 %v507_v27  ;;  %v687_v18 = vsel %vm355_vm1, %v4547_v55, %v4548_v53  ;;  %v688_v19 = vsel %vm355_vm1, %v4548_v53, %v4577_v30  ;;  %v4537_v27 = vunpack.i.l.bf16 %v5814_v23  ;;  %v4538_v30 = vunpack.i.h.bf16 %v5814_v23 }
 0x267   : > { %734 = vmatmul.f32.vlgmr.msra.gmra.mxu3 %v5869_v62  ;;  %755 = vmatpush.msrb.mxu1 %v687_v18  ;;  %v685_v34 = vsel %vm355_vm1, %v4552_v5, %v4553_v63  ;;  %v686_v21 = vsel %vm355_vm1, %v4553_v63, %v4578_v42  ;;  %v697_v42 = vld [vmem:[%s8773_s3 + $0x48] sm:$0xff]  ;;  %v622_v23 = vsel %vm319_vm4, %v4498_v12, %v4542_v54 }
 0x268   : > { %810 = vmatpush.msrb.mxu3 %v4532_v13  ;;  %801 = vmatpush.msrb.mxu2 %v688_v19  ;;  %v644_v50 = vsel %vm331_vm3, %v4493_v57, %v4537_v27  ;;  %v642_v49 = vsel %vm331_vm3, %v4468_v60, %v4538_v30  ;;  %v4558_v57 = vunpack.i.h.bf16 %v5785_v2  ;;  %v600_v60 = vsel %vm307_vm5, %v4513_v14, %v4557_v45 }
 0x269   : > { %756 = vmatpush.msrb.mxu1 %v685_v34  ;;  %v578_v2 = vsel %vm295_vm6, %v4518_v20, %v4562_v9  ;;  %v576_v14 = vsel %vm295_vm6, %v4483_v32, %v4563_v10 }
 0x26a   : > { %811 = vmatpush.msrb.mxu3 %v4533_v31  ;;  %802 = vmatpush.msrb.mxu2 %v686_v21  ;;  %v598_v44 = vsel %vm307_vm5, %v4478_v17, %v4558_v57 }
 0x26b   : > { %764 = vmatpush.msra.mxu1 %v666_v22  ;;  %4276 = vmatmul.msk.f32.vlgmr.msrb.gmra.mxu2 %vm711_vm13, %v696_v58  ;;  %v4566_v12 = vpop.permute.xlu0 %4565 }
 0x26c   : > { %812 = vmatpush.msrb.mxu3 %v4537_v27  ;;  %4274 = vmatmul.msk.f32.vlgmr.msrb.gmra.mxu1 %vm711_vm13, %v696_v58  ;;  %v4567_v1 = vunpack.i.l.bf16 %v4566_v12  ;;  %v4571_v58 = vpop.permute.xlu1 %4570  ;;  %v4568_v11 = vunpack.i.h.bf16 %v4566_v12 }
 0x26d   : > { %765 = vmatpush.msra.mxu1 %v664_v6  ;;  %v4572_v7 = vunpack.i.l.bf16 %v4571_v58  ;;  %v4573_v17 = vunpack.i.h.bf16 %v4571_v58  ;;  %v867_v5 = vpop.permute.xlu2 %866 }
 0x26e   : > { %813 = vmatpush.msrb.mxu3 %v4538_v30  ;;  %v556_v56 = vsel %vm283_vm7, %v4523_v43, %v4567_v1  ;;  %v554_v46 = vsel %vm283_vm7, %v4503_v59, %v4568_v11 }
 0x26f   : > { %737 = vmatmul.f32.gmra.mxu3 %v697_v42  ;;  %766 = vmatpush.msra.mxu1 %v644_v50  ;;  %v534_v3 = vsel %vm271_vm8, %v4528_v0, %v4572_v7  ;;  %v532_v48 = vsel %vm271_vm8, %v4508_v16, %v4573_v17 }
 0x270   : > { %814 = vmatpush.msrb.mxu3 %v4542_v54 }
 0x271   : > { %767 = vmatpush.msra.mxu1 %v642_v49 }
 0x272   : > { %815 = vmatpush.msrb.mxu3 %v4543_v52 }
 0x273   : > { %768 = vmatpush.msra.mxu1 %v622_v23  ;;  %4277 = vmatmul.msk.f32.gmra.mxu2 %vm711_vm13, %v698_v24  ;;  %v709_v51 = vpop.permute.xlu0 %708 }
 0x274   : > { %816 = vmatpush.msrb.mxu3 %v4557_v45  ;;  %4275 = vmatmul.msk.f32.gmra.mxu1 %vm711_vm13, %v698_v24  ;;  %v704_v37 = vpop.permute.xlu1 %703 }
 0x275   : > { %769 = vmatpush.msra.mxu1 %v620_v47 }
 0x276   : > { %817 = vmatpush.msrb.mxu3 %v4558_v57 }
 0x277   : > { %770 = vmatpush.msra.mxu1 %v600_v60 }
 0x278   : > { %818 = vmatpush.msrb.mxu3 %v4562_v9 }
 0x279   : > { %771 = vmatpush.msra.mxu1 %v598_v44 }
 0x27a   : > { %819 = vmatpush.msrb.mxu3 %v4563_v10 }
 0x27b   : > { %772 = vmatpush.msra.mxu1 %v578_v2 }
 0x27c   : > { %820 = vmatpush.msrb.mxu3 %v4567_v1 }
 0x27d   : > { %773 = vmatpush.msra.mxu1 %v576_v14 }
 0x27e   : > { %821 = vmatpush.msrb.mxu3 %v4568_v11 }
 0x27f   : > { %774 = vmatpush.msra.mxu1 %v556_v56 }
 0x280   : > { %822 = vmatpush.msrb.mxu3 %v4572_v7 }
 0x281   : > { %775 = vmatpush.msra.mxu1 %v554_v46 }
 0x282   : > { %823 = vmatpush.msrb.mxu3 %v4573_v17 }
 0x283   : > { %776 = vmatpush.msra.mxu1 %v534_v3 }
 0x284   : > { %824 = vmatpush.msrb.mxu3 %v512_v39  ;;  %v871_v39 = vpop.permute.xlu1 %870 }
 0x285   : > { %777 = vmatpush.msra.mxu1 %v532_v48  ;;  %v876_v24 = vsel %vm307_vm5, %v869_v15, %v871_v39  ;;  %v877_v52 = vsel %vm307_vm5, %v871_v39, %v873_v41 }
 0x286   : > { %825 = vmatpush.msrb.mxu3 %v509_v40  ;;  %v863_v40 = vpop.permute.xlu0 %862 }
 0x287   : > { %826 = vmatmul.f32.vlgmr.msrb.gmra.mxu3 %v5869_v62  ;;  %778 = vmatpush.msra.mxu1 %v511_v35 }
 0x289   : > { %779 = vmatpush.msra.mxu1 %v508_v28 }
 0x28a   : > { %780 = vmatmul.f32.vlgmr.msra.gmra.mxu1 %v5869_v62 }
 0x28c   : > { %v865_v32 = vpop.permute.xlu1 %864 }
 0x28d   : > { %v874_v59 = vsel %vm307_vm5, %v863_v40, %v865_v32  ;;  %v875_v19 = vsel %vm307_vm5, %v865_v32, %v867_v5  ;;  %v1129_v32 = vld [vmem:[%s8774_s4 + $0x38] sm:$0xff]  ;;  %v1127_v40 = vld [vmem:[%s8774_s4 + $0x28] sm:$0xff] }
 0x28f   : > { %829 = vmatmul.f32.gmra.mxu3 %v697_v42 }
 0x292   : > { %783 = vmatmul.f32.gmra.mxu1 %v697_v42 }
 0x2d6   : > { %v850_v63 = vpop.f32.mrf.mxu0 }
 0x2de   : > { %v853_v45 = vpop.f32.mrf.mxu0 }
 0x2e9   : > { %v758_v20 = vpop.f32.mrf.mxu1 }
 0x2ea   : > { %v735_v29 = vpop.f32.mrf.mxu3 }
 0x2eb   : > { %v736_v38 = vadd.f32 %v735_v29, %v704_v37 }
 0x2ed   : > { %v759_v43 = vadd.f32 %v758_v20, %v736_v38 }
 0x2ee   : > { %v804_v53 = vpop.f32.mrf.mxu2 }
 0x2ef   : > { %v884_v33 = vadd.f32 %v874_v59, %v759_v43  ;;  %v1126_v59 = vld [vmem:[%s8774_s4 + $0x20] sm:$0xff] }
 0x2f1   : > { %v890_v35 = vmul.f32 %v884_v33, %v5650_v61  ;;  %v761_v28 = vpop.f32.mrf.mxu1  ;;  %v1128_v33 = vld [vmem:[%s8774_s4 + $0x30] sm:$0xff] }
 0x2f2   : > { %v738_v25 = vpop.f32.mrf.mxu3 }
 0x2f3   : > { %v739_v0 = vadd.f32 %v738_v25, %v709_v51  ;;  %902 = vrot.lane.b32.xlu2 %v890_v35, %s5495_s6 }
 0x2f5   : > { %v762_v16 = vadd.f32 %v761_v28, %v739_v0 }
 0x2f6   : > { %v807_v30 = vpop.f32.mrf.mxu2 }
 0x2f7   : > { %v887_v26 = vadd.f32 %v876_v24, %v762_v16 }
 0x2f9   : > { %v893_v36 = vmul.f32 %v887_v26, %v5650_v61 }
 0x2fb   : > { %908 = vrot.lane.b32.xlu0 %v893_v36, %s5495_s6 }
 0x307   : > { %v781_v55 = vpop.f32.mrf.mxu1 }
 0x308   : > { %v782_v62 = vadd.f32 %v781_v55, %v704_v37 }
 0x30a   : > { %v805_v13 = vadd.f32 %v804_v53, %v782_v62  ;;  %v827_v18 = vpop.f32.mrf.mxu3 }
 0x30b   : > { %v828_v31 = vadd.f32 %v827_v18, %v704_v37 }
 0x30c   : > { %v885_v34 = vadd.f32 %v875_v19, %v805_v13 }
 0x30d   : > { %v851_v21 = vadd.f32 %v850_v63, %v828_v31 }
 0x30e   : > { %v891_v22 = vmul.f32 %v885_v34, %v5656_v8 }
 0x30f   : > { %v886_v27 = vadd.f32 %v867_v5, %v851_v21  ;;  %v784_v6 = vpop.f32.mrf.mxu1 }
 0x310   : > { %v785_v42 = vadd.f32 %v784_v6, %v709_v51  ;;  %904 = vrot.lane.b32.xlu0 %v891_v22, %s5495_s6 }
 0x311   : > { %v892_v50 = vmul.f32 %v886_v27, %v5654_v4 }
 0x312   : > { %v808_v54 = vadd.f32 %v807_v30, %v785_v42  ;;  %v830_v49 = vpop.f32.mrf.mxu3 }
 0x313   : > { %v831_v23 = vadd.f32 %v830_v49, %v709_v51  ;;  %906 = vrot.lane.b32.xlu2 %v892_v50, %s5495_s6 }
 0x314   : > { %v888_v47 = vadd.f32 %v877_v52, %v808_v54 }
 0x315   : > { %v854_v57 = vadd.f32 %v853_v45, %v831_v23 }
 0x316   : > { %v894_v60 = vmul.f32 %v888_v47, %v5656_v8 }
 0x317   : > { %v889_v9 = vadd.f32 %v873_v41, %v854_v57 }
 0x318   : > { %910 = vrot.lane.b32.xlu1 %v894_v60, %s5495_s6 }
 0x319   : > { %v895_v12 = vmul.f32 %v889_v9, %v5654_v4 }
 0x320   : > { %912 = vrot.lane.b32.xlu1 %v895_v12, %s5495_s6 }
 0x34d   : > { %v903_v44 = vpop.permute.xlu2 %902 }
 0x34e   : > { %924 = vst.msk [vmem:[#allocation2] sm:$0xff] %vm493_vm10, %v903_v44 }
 0x355   : > { %v5969_v11 = vld [vmem:[#allocation2] sm:$0xff] }
 0x36d   : > { %v909_v10 = vpop.permute.xlu0 %908  ;;  %v907_v2 = vpop.permute.xlu2 %906 }
 0x36e   : > { %927 = vst.msk [vmem:[#allocation2 + $0x18] sm:$0xff] %vm493_vm10, %v909_v10 }
 0x375   : > { %v5979_v17 = vld [vmem:[#allocation2 + $0x18] sm:$0xff] }
 0x376   : > { %v4695_v38 = vpack.i.bf16 %v5969_v11, %v5979_v17 }
 0x382   : > { %v905_v1 = vpop.permute.xlu0 %904 }
 0x383   : > { %v5966_v58 = vsel %vm482_vm12, %v903_v44, %v905_v1  ;;  %v915_v14 = vsel %vm482_vm12, %v905_v1, %v907_v2 }
 0x384   : > { %926 = vst.msk [vmem:[#allocation2 + $0x10] sm:$0xff] %vm496_vm11, %v915_v14  ;;  %v4585_v56 = vpack.i.bf16 %v5966_v58, %v5969_v11 }
 0x386   : > { %4586 = vrot.lane.b32.xlu0 %v4585_v56, %s5488_s12  ;;  %4581 = vrot.lane.b32.xlu1 %v4585_v56, %s5486_s10 }
 0x38a   : > { %v911_v7 = vpop.permute.xlu1 %910 }
 0x38b   : > { %v5977_v46 = vsel %vm482_vm12, %v909_v10, %v911_v7  ;;  %v5989_v39 = vld [vmem:[#allocation2 + $0x10] sm:$0xff] }
 0x38c   : > { %v4620_v3 = vpack.i.bf16 %v5977_v46, %v5979_v17  ;;  %v4690_v43 = vpack.i.bf16 %v5989_v39, %v5966_v58 }
 0x38e   : > { %4621 = vrot.lane.b32.xlu2 %v4620_v3, %s5488_s12  ;;  %4591 = vrot.lane.b32.xlu0 %v4585_v56, %s5489_s13 }
 0x392   : > { %v913_v48 = vpop.permute.xlu1 %912 }
 0x393   : > { %v917_v37 = vsel %vm482_vm12, %v911_v7, %v913_v48 }
 0x394   : > { %929 = vst.msk [vmem:[#allocation2 + $0x28] sm:$0xff] %vm496_vm11, %v917_v37 }
 0x396   : > { %4626 = vrot.lane.b32.xlu2 %v4620_v3, %s5489_s13  ;;  %4596 = vrot.lane.b32.xlu0 %v4585_v56, %s5490_s14 }
 0x39b   : > { %v5991_v51 = vld [vmem:[#allocation2 + $0x28] sm:$0xff] }
 0x39c   : > { %v4650_v20 = vpack.i.bf16 %v5989_v39, %v5991_v51  ;;  %v4685_v29 = vpack.i.bf16 %v5991_v51, %v5977_v46 }
 0x39e   : > { %4651 = vrot.lane.b32.xlu1 %v4650_v20, %s5486_s10  ;;  %4631 = vrot.lane.b32.xlu2 %v4620_v3, %s5490_s14 }
 0x39f   : > { %4601 = vrot.lane.b32.xlu0 %v4620_v3, %s5486_s10 }
 0x3a6   : > { %4656 = vrot.lane.b32.xlu1 %v4650_v20, %s5488_s12  ;;  %4636 = vrot.lane.b32.xlu2 %v4620_v3, %s5491_s15 }
 0x3a7   : > { %4606 = vrot.lane.b32.xlu0 %v4585_v56, %s5491_s15 }
 0x3ae   : > { %4661 = vrot.lane.b32.xlu1 %v4650_v20, %s5489_s13  ;;  %4641 = vrot.lane.b32.xlu2 %v4620_v3, %s5492_s16 }
 0x3af   : > { %4611 = vrot.lane.b32.xlu0 %v4585_v56, %s5492_s16 }
 0x3b6   : > { %4666 = vrot.lane.b32.xlu1 %v4650_v20, %s5490_s14  ;;  %4646 = vrot.lane.b32.xlu2 %v4620_v3, %s5493_s17 }
 0x3b7   : > { %4616 = vrot.lane.b32.xlu0 %v4585_v56, %s5493_s17 }
 0x3be   : > { %4671 = vrot.lane.b32.xlu1 %v4650_v20, %s5491_s15  ;;  %4681 = vrot.lane.b32.xlu2 %v4650_v20, %s5493_s17 }
 0x3bf   : > { %4686 = vrot.lane.b32.xlu0 %v4685_v29, %s8820_s11 }
 0x3c6   : > { %4676 = vrot.lane.b32.xlu1 %v4650_v20, %s5492_s16  ;;  %4696 = vrot.lane.b32.xlu2 %v4695_v38, %s8820_s11 }
 0x3c7   : > { %1147 = vperm.xlu0 %4579, %v1129_v32  }
 0x3ce   : > { %4691 = vrot.lane.b32.xlu1 %v4690_v43, %s8820_s11  ;;  %1137 = vperm.xlu2 %4458, %v1127_v40  }
 0x3cf   : > { %1132 = vperm.xlu0 %4579, %v1126_v59  }
 0x3d6   : > { %1142 = vperm.xlu1 %4457, %v1128_v33  }
 0x3e8   : > { %v4622_v35 = vpop.permute.xlu2 %4621 }
 0x3e9   : > { %v4624_v19 = vunpack.i.h.bf16 %v4622_v35  ;;  %v4623_v31 = vunpack.i.l.bf16 %v4622_v35 }
 0x3eb   : > { %v1066_v49 = vsel %vm331_vm3, %v4623_v31, %v4624_v19 }
 0x3f0   : > { %v6031_v25 = vpop.permute.xlu2 %4626 }
 0x3f1   : > { %v4629_v42 = vunpack.i.h.bf16 %v6031_v25  ;;  %v4628_v50 = vunpack.i.l.bf16 %v6031_v25 }
 0x3f3   : > { %v1044_v2 = vsel %vm319_vm4, %v4628_v50, %v4629_v42 }
 0x3f8   : > { %v4587_v28 = vpop.permute.xlu0 %4586  ;;  %v6033_v0 = vpop.permute.xlu2 %4631 }
 0x3f9   : > { %v4582_v24 = vpop.permute.xlu1 %4581  ;;  %v4589_v22 = vunpack.i.h.bf16 %v4587_v28  ;;  %v4588_v27 = vunpack.i.l.bf16 %v4587_v28  ;;  %v4634_v44 = vunpack.i.h.bf16 %v6033_v0  ;;  %v4633_v10 = vunpack.i.l.bf16 %v6033_v0 }
 0x3fa   : > { %v4584_v41 = vunpack.i.h.bf16 %v4582_v24  ;;  %v4583_v63 = vunpack.i.l.bf16 %v4582_v24 }
 0x3fb   : > { %v1064_v60 = vsel %vm331_vm3, %v4588_v27, %v4589_v22  ;;  %v1022_v20 = vsel %vm307_vm5, %v4633_v10, %v4634_v44 }
 0x3fc   : > { %v1086_v6 = vsel %vm343_vm2, %v4583_v63, %v4584_v41 }
 0x400   : > { %v6035_v15 = vpop.permute.xlu0 %4591  ;;  %v6037_v16 = vpop.permute.xlu2 %4636 }
 0x401   : > { %v4594_v47 = vunpack.i.h.bf16 %v6035_v15  ;;  %v4593_v57 = vunpack.i.l.bf16 %v6035_v15  ;;  %v4639_v3 = vunpack.i.h.bf16 %v6037_v16  ;;  %v4638_v48 = vunpack.i.l.bf16 %v6037_v16 }
 0x403   : > { %v1042_v7 = vsel %vm319_vm4, %v4593_v57, %v4594_v47  ;;  %v1000_v28 = vsel %vm295_vm6, %v4638_v48, %v4639_v3  ;;  %v6131_v57 = vld [vmem:[%s8773_s3 + $0x60] sm:$0xff] }
 0x408   : > { %v6039_v26 = vpop.permute.xlu0 %4596  ;;  %v6044_v55 = vpop.permute.xlu2 %4641 }
 0x409   : > { %v4599_v14 = vunpack.i.h.bf16 %v6039_v26  ;;  %v4598_v56 = vunpack.i.l.bf16 %v6039_v26  ;;  %v4644_v35 = vunpack.i.h.bf16 %v6044_v55  ;;  %v4643_v25 = vunpack.i.l.bf16 %v6044_v55 }
 0x40b   : > { %v1020_v59 = vsel %vm307_vm5, %v4598_v56, %v4599_v14  ;;  %v978_v63 = vsel %vm283_vm7, %v4643_v25, %v4644_v35 }
 0x410   : > { %v6041_v36 = vpop.permute.xlu1 %4651  ;;  %v6067_v9 = vpop.permute.xlu2 %4646 }
 0x411   : > { %v4653_v53 = vunpack.i.l.bf16 %v6041_v36  ;;  %v4602_v62 = vpop.permute.xlu0 %4601  ;;  %v4654_v5 = vunpack.i.h.bf16 %v6041_v36  ;;  %v4648_v55 = vunpack.i.l.bf16 %v6067_v9  ;;  %v1123_v36 = vld [vmem:[%s8773_s3 + $0x98] sm:$0xff] }
 0x412   : > { %v4604_v13 = vunpack.i.h.bf16 %v4602_v62  ;;  %v4603_v18 = vunpack.i.l.bf16 %v4602_v62 }
 0x413   : > { %v1087_v30 = vsel %vm343_vm2, %v4584_v41, %v4654_v5  ;;  %v4649_v41 = vunpack.i.h.bf16 %v6067_v9 }
 0x414   : > { %v1088_v34 = vsel %vm343_vm2, %v4603_v18, %v4604_v13  ;;  %v1089_v21 = vsel %vm343_vm2, %v4604_v13, %v4653_v53 }
 0x415   : > { %1162 = vmatpush.msra.mxu2 %v1088_v34  ;;  %1220 = vmatpush.msrb.mxu1 %v1089_v21  ;;  %v956_v27 = vsel %vm271_vm8, %v4648_v55, %v4649_v41 }
 0x417   : > { %1163 = vmatpush.msra.mxu2 %v1086_v6  ;;  %1221 = vmatpush.msrb.mxu1 %v1087_v30 }
 0x418   : > { %v6057_v54 = vpop.permute.xlu1 %4656  ;;  %v6099_v0 = vpop.permute.xlu2 %4681 }
 0x419   : > { %v4659_v52 = vunpack.i.h.bf16 %v6057_v54  ;;  %v4658_v23 = vunpack.i.l.bf16 %v6057_v54  ;;  %v6062_v45 = vpop.permute.xlu0 %4606  ;;  %1164 = vmatpush.msra.mxu2 %v1066_v49 }
 0x41a   : > { %v4609_v40 = vunpack.i.h.bf16 %v6062_v45  ;;  %v4608_v43 = vunpack.i.l.bf16 %v6062_v45 }
 0x41b   : > { %v1067_v12 = vsel %vm331_vm3, %v4624_v19, %v4658_v23  ;;  %1165 = vmatpush.msra.mxu2 %v1064_v60  ;;  %v1065_v1 = vsel %vm331_vm3, %v4589_v22, %v4659_v52 }
 0x41c   : > { %1222 = vmatpush.msrb.mxu1 %v1067_v12  ;;  %v998_v26 = vsel %vm295_vm6, %v4608_v43, %v4609_v40 }
 0x41d   : > { %1166 = vmatpush.msra.mxu2 %v1044_v2 }
 0x41e   : > { %1223 = vmatpush.msrb.mxu1 %v1065_v1 }
 0x41f   : > { %1167 = vmatpush.msra.mxu2 %v1042_v7  ;;  %v4683_v7 = vunpack.i.l.bf16 %v6099_v0 }
 0x420   : > { %v6083_v37 = vpop.permute.xlu1 %4661 }
 0x421   : > { %v4664_v29 = vunpack.i.h.bf16 %v6083_v37  ;;  %v4663_v32 = vunpack.i.l.bf16 %v6083_v37  ;;  %v6088_v38 = vpop.permute.xlu0 %4611  ;;  %1168 = vmatpush.msra.mxu2 %v1022_v20  ;;  %v4684_v20 = vunpack.i.h.bf16 %v6099_v0  ;;  %v1122_v0 = vld [vmem:[%s8773_s3 + $0x90] sm:$0xff] }
 0x422   : > { %v4614_v16 = vunpack.i.h.bf16 %v6088_v38  ;;  %v4613_v24 = vunpack.i.l.bf16 %v6088_v38  ;;  %v957_v38 = vsel %vm271_vm8, %v4649_v41, %v4683_v7 }
 0x423   : > { %v1045_v33 = vsel %vm319_vm4, %v4629_v42, %v4663_v32  ;;  %1169 = vmatpush.msra.mxu2 %v1020_v59  ;;  %v1043_v15 = vsel %vm319_vm4, %v4594_v47, %v4664_v29  ;;  %v4697_v42 = vpop.permute.xlu2 %4696 }
 0x424   : > { %1224 = vmatpush.msrb.mxu1 %v1045_v33  ;;  %v976_v21 = vsel %vm283_vm7, %v4613_v24, %v4614_v16  ;;  %v4698_v60 = vunpack.i.l.bf16 %v4697_v42  ;;  %v4699_v43 = vunpack.i.h.bf16 %v4697_v42 }
 0x425   : > { %1170 = vmatpush.msra.mxu2 %v1000_v28 }
 0x426   : > { %1225 = vmatpush.msrb.mxu1 %v1043_v15 }
 0x427   : > { %1171 = vmatpush.msra.mxu2 %v998_v26 }
 0x428   : > { %v6109_v62 = vpop.permute.xlu1 %4666 }
 0x429   : > { %v4669_v13 = vunpack.i.h.bf16 %v6109_v62  ;;  %v4668_v18 = vunpack.i.l.bf16 %v6109_v62  ;;  %v4617_v19 = vpop.permute.xlu0 %4616  ;;  %1172 = vmatpush.msra.mxu2 %v978_v63 }
 0x42a   : > { %v4619_v31 = vunpack.i.h.bf16 %v4617_v19  ;;  %v4618_v34 = vunpack.i.l.bf16 %v4617_v19 }
 0x42b   : > { %v1023_v22 = vsel %vm307_vm5, %v4634_v44, %v4668_v18  ;;  %1173 = vmatpush.msra.mxu2 %v976_v21  ;;  %v1021_v6 = vsel %vm307_vm5, %v4599_v14, %v4669_v13 }
 0x42c   : > { %1226 = vmatpush.msrb.mxu1 %v1023_v22  ;;  %v954_v30 = vsel %vm271_vm8, %v4618_v34, %v4619_v31  ;;  %v955_v25 = vsel %vm271_vm8, %v4619_v31, %v4684_v20 }
 0x42d   : > { %1174 = vmatpush.msra.mxu2 %v956_v27 }
 0x42e   : > { %1227 = vmatpush.msrb.mxu1 %v1021_v6 }
 0x42f   : > { %1175 = vmatpush.msra.mxu2 %v954_v30 }
 0x430   : > { %v6123_v50 = vpop.permute.xlu1 %4671 }
 0x431   : > { %v4674_v49 = vunpack.i.h.bf16 %v6123_v50  ;;  %v4673_v45 = vunpack.i.l.bf16 %v6123_v50  ;;  %v4687_v47 = vpop.permute.xlu0 %4686  ;;  %1176 = vmatpush.msra.mxu2 %v5979_v17 }
 0x432   : > { %v4689_v9 = vunpack.i.h.bf16 %v4687_v47  ;;  %v4688_v12 = vunpack.i.l.bf16 %v4687_v47 }
 0x433   : > { %v1001_v44 = vsel %vm295_vm6, %v4639_v3, %v4673_v45  ;;  %1177 = vmatpush.msra.mxu2 %v5969_v11  ;;  %v999_v2 = vsel %vm295_vm6, %v4609_v40, %v4674_v49  ;;  %v6146_v11 = vld [vmem:[%s8773_s3 + $0x78] sm:$0xff] }
 0x434   : > { %1228 = vmatpush.msrb.mxu1 %v1001_v44  ;;  %1178 = vmatmul.f32.vlgmr.msra.gmra.mxu2 %v6131_v57  ;;  %v1110_v10 = vsel %vm355_vm1, %v4698_v60, %v4688_v12  ;;  %v1111_v17 = vsel %vm355_vm1, %v4688_v12, %v4689_v9 }
 0x435   : > { %1321 = vmatpush.msrb.mxu2 %v4689_v9  ;;  %1205 = vmatpush.msra.mxu0 %v1110_v10 }
 0x436   : > { %1229 = vmatpush.msrb.mxu1 %v999_v2  ;;  %1263 = vmatpush.msra.mxu3 %v1111_v17 }
 0x438   : > { %v4677_v1 = vpop.permute.xlu1 %4676 }
 0x439   : > { %v4679_v14 = vunpack.i.h.bf16 %v4677_v1  ;;  %v4678_v56 = vunpack.i.l.bf16 %v4677_v1 }
 0x43b   : > { %v979_v3 = vsel %vm283_vm7, %v4644_v35, %v4678_v56  ;;  %v977_v48 = vsel %vm283_vm7, %v4614_v16, %v4679_v14  ;;  %v1119_v35 = vld [vmem:[%s8773_s3 + $0x68] sm:$0xff]  ;;  %v1138_v16 = vpop.permute.xlu2 %1137 }
 0x43c   : > { %1230 = vmatpush.msrb.mxu1 %v979_v3  ;;  %1181 = vmatmul.f32.gmra.mxu2 %v6146_v11 }
 0x43e   : > { %1231 = vmatpush.msrb.mxu1 %v977_v48 }
 0x440   : > { %v4692_v40 = vpop.permute.xlu1 %4691  ;;  %1232 = vmatpush.msrb.mxu1 %v957_v38 }
 0x441   : > { %v4694_v59 = vunpack.i.h.bf16 %v4692_v40  ;;  %v4693_v33 = vunpack.i.l.bf16 %v4692_v40 }
 0x442   : > { %1233 = vmatpush.msrb.mxu1 %v955_v25 }
 0x443   : > { %1322 = vmatpush.msrb.mxu2 %v4694_v59  ;;  %v1108_v28 = vsel %vm355_vm1, %v4699_v43, %v4693_v33  ;;  %v1109_v15 = vsel %vm355_vm1, %v4693_v33, %v4694_v59 }
 0x444   : > { %1206 = vmatpush.msra.mxu0 %v1108_v28  ;;  %1234 = vmatpush.msrb.mxu1 %v5977_v46  ;;  %v1121_v46 = vld [vmem:[%s8773_s3 + $0x80] sm:$0xff] }
 0x445   : > { %1264 = vmatpush.msra.mxu3 %v1109_v15  ;;  %4280 = vmatmul.msk.f32.vlgmr.msra.gmra.mxu0 %vm711_vm13, %v1119_v35 }
 0x446   : > { %4284 = vmatmul.msk.f32.vlgmr.msra.gmra.mxu3 %vm711_vm13, %v1119_v35  ;;  %1278 = vmatpush.msrb.mxu0 %v4653_v53  ;;  %v1125_v53 = vld [vmem:[%s8773_s3 + $0xb0] sm:$0xff] }
 0x447   : > { %1235 = vmatpush.msrb.mxu1 %v5966_v58  ;;  %1184 = vmatmul.f32.gmra.mxu2 %v1122_v0  ;;  %v1124_v58 = vld [vmem:[%s8773_s3 + $0xa8] sm:$0xff] }
 0x448   : > { %1236 = vmatmul.f32.vlgmr.msrb.gmra.mxu1 %v6131_v57  ;;  %1279 = vmatpush.msrb.mxu0 %v4654_v5  ;;  %v6215_v5 = vpop.permute.xlu0 %1147  ;;  %v1143_v19 = vpop.permute.xlu1 %1142 }
 0x44a   : > { %1280 = vmatpush.msrb.mxu0 %v4658_v23 }
 0x44c   : > { %1281 = vmatpush.msrb.mxu0 %v4659_v52 }
 0x44d   : > { %4281 = vmatmul.msk.f32.gmra.mxu0 %vm711_vm13, %v1121_v46 }
 0x44e   : > { %4285 = vmatmul.msk.f32.gmra.mxu3 %vm711_vm13, %v1121_v46  ;;  %1282 = vmatpush.msrb.mxu0 %v4663_v32 }
 0x44f   : > { %1187 = vmatmul.f32.gmra.mxu2 %v1124_v58 }
 0x450   : > { %1239 = vmatmul.f32.gmra.mxu1 %v6146_v11  ;;  %1283 = vmatpush.msrb.mxu0 %v4664_v29  ;;  %v1133_v52 = vpop.permute.xlu0 %1132 }
 0x452   : > { %1284 = vmatpush.msrb.mxu0 %v4668_v18 }
 0x454   : > { %1285 = vmatpush.msrb.mxu0 %v4669_v13 }
 0x455   : > { %4282 = vmatmul.msk.f32.gmra.mxu0 %vm711_vm13, %v1123_v36 }
 0x456   : > { %4286 = vmatmul.msk.f32.gmra.mxu3 %vm711_vm13, %v1123_v36  ;;  %1286 = vmatpush.msrb.mxu0 %v4673_v45 }
 0x457   : > { %4288 = vmatmul.msk.f32.vlgmr.msrb.gmra.mxu2 %vm711_vm13, %v1119_v35 }
 0x458   : > { %1242 = vmatmul.f32.gmra.mxu1 %v1122_v0  ;;  %1287 = vmatpush.msrb.mxu0 %v4674_v49 }
 0x45a   : > { %1288 = vmatpush.msrb.mxu0 %v4678_v56 }
 0x45c   : > { %1289 = vmatpush.msrb.mxu0 %v4679_v14 }
 0x45d   : > { %4283 = vmatmul.msk.f32.gmra.mxu0 %vm711_vm13, %v1125_v53 }
 0x45e   : > { %4287 = vmatmul.msk.f32.gmra.mxu3 %vm711_vm13, %v1125_v53  ;;  %1290 = vmatpush.msrb.mxu0 %v4683_v7 }
 0x45f   : > { %4289 = vmatmul.msk.f32.gmra.mxu2 %vm711_vm13, %v1121_v46 }
 0x460   : > { %1245 = vmatmul.f32.gmra.mxu1 %v1124_v58  ;;  %1291 = vmatpush.msrb.mxu0 %v4684_v20 }
 0x462   : > { %1292 = vmatpush.msrb.mxu0 %v5991_v51 }
 0x464   : > { %1293 = vmatpush.msrb.mxu0 %v5989_v39 }
 0x465   : > { %1294 = vmatmul.f32.vlgmr.msrb.gmra.mxu0 %v6131_v57 }
 0x467   : > { %4290 = vmatmul.msk.f32.gmra.mxu2 %vm711_vm13, %v1123_v36 }
 0x46d   : > { %1297 = vmatmul.f32.gmra.mxu0 %v6146_v11 }
 0x46f   : > { %4291 = vmatmul.msk.f32.gmra.mxu2 %vm711_vm13, %v1125_v53 }
 0x475   : > { %1300 = vmatmul.f32.gmra.mxu0 %v1122_v0 }
 0x47d   : > { %1303 = vmatmul.f32.gmra.mxu0 %v1124_v58 }
 0x4b7   : > { %v1179_v54 = vpop.f32.mrf.mxu2 }
 0x4b8   : > { %v1180_v37 = vadd.f32 %v1179_v54, %v1133_v52 }
 0x4bf   : > { %v1182_v23 = vpop.f32.mrf.mxu2 }
 0x4c0   : > { %v1183_v24 = vadd.f32 %v1182_v23, %v1138_v16 }
 0x4c2   : > { %v1208_v29 = vpop.f32.mrf.mxu0 }
 0x4c3   : > { %v1209_v51 = vadd.f32 %v1208_v29, %v1180_v37 }
 0x4c5   : > { %v1336_v39 = vmul.f32 %v1209_v51, %v5650_v61  ;;  %v1237_v32 = vpop.f32.mrf.mxu1 }
 0x4c6   : > { %v1238_v18 = vadd.f32 %v1237_v32, %v1133_v52 }
 0x4c7   : > { %1360 = vrot.lane.b32.xlu1 %v1336_v39, %s5495_s6 }
 0x4c9   : > { %v1266_v26 = vpop.f32.mrf.mxu3 }
 0x4ca   : > { %v1211_v41 = vpop.f32.mrf.mxu0  ;;  %v1185_v55 = vpop.f32.mrf.mxu2  ;;  %v1267_v31 = vadd.f32 %v1266_v26, %v1238_v18 }
 0x4cb   : > { %v1212_v62 = vadd.f32 %v1211_v41, %v1183_v24  ;;  %v1186_v34 = vadd.f32 %v1185_v55, %v1143_v19 }
 0x4cc   : > { %v1337_v30 = vmul.f32 %v1267_v31, %v5656_v8 }
 0x4cd   : > { %v1339_v63 = vmul.f32 %v1212_v62, %v5650_v61  ;;  %v1240_v13 = vpop.f32.mrf.mxu1 }
 0x4ce   : > { %v1241_v49 = vadd.f32 %v1240_v13, %v1138_v16 }
 0x4cf   : > { %1366 = vrot.lane.b32.xlu2 %v1339_v63, %s5495_s6 }
 0x4d1   : > { %v1269_v21 = vpop.f32.mrf.mxu3 }
 0x4d2   : > { %v1214_v22 = vpop.f32.mrf.mxu0  ;;  %v1188_v6 = vpop.f32.mrf.mxu2  ;;  %v1270_v45 = vadd.f32 %v1269_v21, %v1241_v49 }
 0x4d3   : > { %v1215_v27 = vadd.f32 %v1214_v22, %v1186_v34  ;;  %v1189_v47 = vadd.f32 %v1188_v6, %v6215_v5 }
 0x4d4   : > { %v1340_v44 = vmul.f32 %v1270_v45, %v5656_v8 }
 0x4d5   : > { %v1342_v42 = vmul.f32 %v1215_v27, %v5650_v61  ;;  %v1243_v50 = vpop.f32.mrf.mxu1 }
 0x4d6   : > { %v1244_v2 = vadd.f32 %v1243_v50, %v1143_v19 }
 0x4d7   : > { %1372 = vrot.lane.b32.xlu0 %v1342_v42, %s5495_s6  ;;  %1362 = vrot.lane.b32.xlu2 %v1337_v30, %s5495_s6 }
 0x4d9   : > { %v1272_v57 = vpop.f32.mrf.mxu3 }
 0x4da   : > { %v1217_v60 = vpop.f32.mrf.mxu0  ;;  %v1324_v12 = vpop.f32.mrf.mxu2  ;;  %v1273_v14 = vadd.f32 %v1272_v57, %v1244_v2 }
 0x4db   : > { %v1218_v9 = vadd.f32 %v1217_v60, %v1189_v47 }
 0x4dc   : > { %v1343_v20 = vmul.f32 %v1273_v14, %v5656_v8 }
 0x4dd   : > { %v1345_v10 = vmul.f32 %v1218_v9, %v5650_v61  ;;  %v1246_v17 = vpop.f32.mrf.mxu1 }
 0x4de   : > { %v1247_v1 = vadd.f32 %v1246_v17, %v6215_v5 }
 0x4df   : > { %1368 = vrot.lane.b32.xlu0 %v1340_v44, %s5495_s6  ;;  %1378 = vrot.lane.b32.xlu1 %v1345_v10, %s5495_s6 }
 0x4e1   : > { %v1275_v56 = vpop.f32.mrf.mxu3 }
 0x4e2   : > { %v1276_v11 = vadd.f32 %v1275_v56, %v1247_v1  ;;  %v1295_v7 = vpop.f32.mrf.mxu0  ;;  %v1327_v40 = vpop.f32.mrf.mxu2 }
 0x4e3   : > { %v1296_v3 = vadd.f32 %v1295_v7, %v1133_v52 }
 0x4e4   : > { %v1346_v48 = vmul.f32 %v1276_v11, %v5656_v8 }
 0x4e5   : > { %v1325_v38 = vadd.f32 %v1324_v12, %v1296_v3 }
 0x4e6   : > { %1380 = vrot.lane.b32.xlu2 %v1346_v48, %s5495_s6 }
 0x4e7   : > { %v1338_v43 = vmul.f32 %v1325_v38, %v5654_v4  ;;  %1374 = vrot.lane.b32.xlu1 %v1343_v20, %s5495_s6 }
 0x4e9   : > { %1364 = vrot.lane.b32.xlu0 %v1338_v43, %s5495_s6 }
 0x4ea   : > { %v1298_v59 = vpop.f32.mrf.mxu0  ;;  %v1330_v28 = vpop.f32.mrf.mxu2 }
 0x4eb   : > { %v1299_v33 = vadd.f32 %v1298_v59, %v1138_v16 }
 0x4ed   : > { %v1328_v25 = vadd.f32 %v1327_v40, %v1299_v33 }
 0x4ef   : > { %v1341_v35 = vmul.f32 %v1328_v25, %v5654_v4 }
 0x4f1   : > { %1370 = vrot.lane.b32.xlu2 %v1341_v35, %s5495_s6 }
 0x4f2   : > { %v1301_v15 = vpop.f32.mrf.mxu0  ;;  %v1333_v53 = vpop.f32.mrf.mxu2 }
 0x4f3   : > { %v1302_v0 = vadd.f32 %v1301_v15, %v1143_v19 }
 0x4f5   : > { %v1331_v46 = vadd.f32 %v1330_v28, %v1302_v0 }
 0x4f7   : > { %v1344_v58 = vmul.f32 %v1331_v46, %v5654_v4 }
 0x4f9   : > { %1376 = vrot.lane.b32.xlu1 %v1344_v58, %s5495_s6  ;;  %v1818_v58 = vld [vmem:[%s8774_s4 + $0x50] sm:$0xff] }
 0x4fa   : > { %v1304_v36 = vpop.f32.mrf.mxu0 }
 0x4fb   : > { %v1305_v54 = vadd.f32 %v1304_v36, %v6215_v5  ;;  %v1817_v36 = vld [vmem:[%s8774_s4 + $0x48] sm:$0xff] }
 0x4fd   : > { %v1334_v52 = vadd.f32 %v1333_v53, %v1305_v54  ;;  %v1819_v53 = vld [vmem:[%s8774_s4 + $0x58] sm:$0xff] }
 0x4ff   : > { %v1347_v23 = vmul.f32 %v1334_v52, %v5654_v4 }
 0x501   : > { %1382 = vrot.lane.b32.xlu0 %v1347_v23, %s5495_s6 }
 0x529   : > { %v1367_v37 = vpop.permute.xlu2 %1366 }
 0x52a   : > { %1407 = vst.msk [vmem:[#allocation2 + $0x18] sm:$0xff] %vm493_vm10, %v1367_v37 }
 0x531   : > { %v1363_v51 = vpop.permute.xlu2 %1362  ;;  %v6272_v55 = vld [vmem:[#allocation2 + $0x18] sm:$0xff] }
 0x532   : > { %v8793_v31 = vmax.f32 %v6272_v55, 0.0 }
 0x539   : > { %v1361_v29 = vpop.permute.xlu1 %1360 }
 0x53a   : > { %1404 = vst.msk [vmem:[#allocation2] sm:$0xff] %vm493_vm10, %v1361_v29  ;;  %v6247_v39 = vsel %vm482_vm12, %v1361_v29, %v1363_v51 }
 0x53b   : > { %v8780_v5 = vmax.f32 %v6247_v39, 0.0 }
 0x540   : > { %v1381_v26 = vpop.permute.xlu2 %1380 }
 0x541   : > { %v6249_v32 = vld [vmem:[#allocation2] sm:$0xff] }
 0x542   : > { %v8791_v16 = vmax.f32 %v6249_v32, 0.0 }
 0x544   : > { %v6257_v24 = vpack.i.bf16 %v8780_v5, %v8791_v16 }
 0x546   : > { %4711 = vrot.lane.b32.xlu0 %v6257_v24, %s5486_s10  ;;  %4706 = vrot.lane.b32.xlu2 %v6257_v24, %s5492_s16 }
 0x547   : > { %4701 = vrot.lane.b32.xlu1 %v6257_v24, %s5491_s15 }
 0x549   : > { %v1373_v41 = vpop.permute.xlu0 %1372 }
 0x54a   : > { %1410 = vst.msk [vmem:[#allocation2 + $0x30] sm:$0xff] %vm493_vm10, %v1373_v41 }
 0x54b   : > { %v1371_v62 = vpop.permute.xlu2 %1370 }
 0x54e   : > { %4726 = vrot.lane.b32.xlu0 %v6257_v24, %s5489_s13  ;;  %4721 = vrot.lane.b32.xlu2 %v6257_v24, %s5488_s12 }
 0x54f   : > { %4716 = vrot.lane.b32.xlu1 %v6257_v24, %s5493_s17 }
 0x551   : > { %v1369_v63 = vpop.permute.xlu0 %1368  ;;  %v1379_v13 = vpop.permute.xlu1 %1378  ;;  %v6292_v22 = vld [vmem:[#allocation2 + $0x30] sm:$0xff] }
 0x552   : > { %v6275_v18 = vsel %vm482_vm12, %v1367_v37, %v1369_v63  ;;  %v1387_v19 = vsel %vm482_vm12, %v1369_v63, %v1371_v62  ;;  %1413 = vst.msk [vmem:[#allocation2 + $0x48] sm:$0xff] %vm493_vm10, %v1379_v13  ;;  %v8797_v30 = vmax.f32 %v6292_v22, 0.0  ;;  %v6323_v9 = vsel %vm482_vm12, %v1379_v13, %v1381_v26 }
 0x553   : > { %1409 = vst.msk [vmem:[#allocation2 + $0x28] sm:$0xff] %vm496_vm11, %v1387_v19  ;;  %v8781_v34 = vmax.f32 %v6275_v18, 0.0  ;;  %v8783_v44 = vmax.f32 %v6323_v9, 0.0 }
 0x555   : > { %v6286_v21 = vpack.i.bf16 %v8781_v34, %v8793_v31 }
 0x557   : > { %4731 = vrot.lane.b32.xlu0 %v6286_v21, %s5491_s15  ;;  %4746 = vrot.lane.b32.xlu2 %v6286_v21, %s5493_s17 }
 0x558   : > { %4736 = vrot.lane.b32.xlu1 %v6286_v21, %s5492_s16 }
 0x559   : > { %v1375_v27 = vpop.permute.xlu1 %1374  ;;  %v6318_v60 = vld [vmem:[#allocation2 + $0x48] sm:$0xff] }
 0x55a   : > { %v6297_v6 = vsel %vm482_vm12, %v1373_v41, %v1375_v27  ;;  %v8798_v12 = vmax.f32 %v6318_v60, 0.0  ;;  %v6342_v14 = vld [vmem:[#allocation2 + $0x28] sm:$0xff] }
 0x55b   : > { %v8782_v42 = vmax.f32 %v6297_v6, 0.0  ;;  %v1365_v50 = vpop.permute.xlu0 %1364  ;;  %v8777_v11 = vmax.f32 %v6342_v14, 0.0 }
 0x55c   : > { %v1385_v49 = vsel %vm482_vm12, %v1363_v51, %v1365_v50  ;;  %v4815_v2 = vpack.i.bf16 %v8783_v44, %v8798_v12 }
 0x55d   : > { %1406 = vst.msk [vmem:[#allocation2 + $0x10] sm:$0xff] %vm496_vm11, %v1385_v49  ;;  %v4770_v45 = vpack.i.bf16 %v8782_v42, %v8797_v30 }
 0x55f   : > { %4756 = vrot.lane.b32.xlu2 %v6286_v21, %s5489_s13  ;;  %4771 = vrot.lane.b32.xlu0 %v4770_v45, %s5492_s16 }
 0x560   : > { %4741 = vrot.lane.b32.xlu1 %v6286_v21, %s5486_s10 }
 0x564   : > { %v6338_v1 = vld [vmem:[#allocation2 + $0x10] sm:$0xff] }
 0x565   : > { %v8776_v56 = vmax.f32 %v6338_v1, 0.0 }
 0x567   : > { %4781 = vrot.lane.b32.xlu0 %v4770_v45, %s5493_s17  ;;  %4766 = vrot.lane.b32.xlu2 %v4770_v45, %s5491_s15  ;;  %v4850_v7 = vpack.i.bf16 %v8776_v56, %v8777_v11 }
 0x568   : > { %4751 = vrot.lane.b32.xlu1 %v6286_v21, %s5488_s12 }
 0x56b   : > { %v1377_v47 = vpop.permute.xlu1 %1376 }
 0x56c   : > { %v1389_v57 = vsel %vm482_vm12, %v1375_v27, %v1377_v47 }
 0x56d   : > { %1412 = vst.msk [vmem:[#allocation2 + $0x40] sm:$0xff] %vm496_vm11, %v1389_v57 }
 0x56f   : > { %4786 = vrot.lane.b32.xlu0 %v4770_v45, %s5488_s12  ;;  %4776 = vrot.lane.b32.xlu2 %v4770_v45, %s5486_s10 }
 0x570   : > { %4761 = vrot.lane.b32.xlu1 %v6286_v21, %s5490_s14 }
 0x573   : > { %v1383_v10 = vpop.permute.xlu0 %1382 }
 0x574   : > { %v1391_v17 = vsel %vm482_vm12, %v1381_v26, %v1383_v10  ;;  %v6356_v48 = vld [vmem:[#allocation2 + $0x40] sm:$0xff] }
 0x575   : > { %1415 = vst.msk [vmem:[#allocation2 + $0x58] sm:$0xff] %vm496_vm11, %v1391_v17  ;;  %v8778_v38 = vmax.f32 %v6356_v48, 0.0 }
 0x577   : > { %4816 = vrot.lane.b32.xlu0 %v4815_v2, %s5486_s10  ;;  %4791 = vrot.lane.b32.xlu2 %v4770_v45, %s5489_s13 }
 0x578   : > { %4796 = vrot.lane.b32.xlu1 %v4770_v45, %s5490_s14 }
 0x57c   : > { %v6351_v3 = vld [vmem:[#allocation2 + $0x58] sm:$0xff] }
 0x57d   : > { %v8779_v20 = vmax.f32 %v6351_v3, 0.0 }
 0x57f   : > { %4836 = vrot.lane.b32.xlu0 %v4815_v2, %s5490_s14  ;;  %4806 = vrot.lane.b32.xlu2 %v4815_v2, %s5492_s16  ;;  %v4855_v40 = vpack.i.bf16 %v8778_v38, %v8779_v20 }
 0x580   : > { %4801 = vrot.lane.b32.xlu1 %v4815_v2, %s5491_s15 }
 0x587   : > { %4851 = vrot.lane.b32.xlu0 %v4850_v7, %s5492_s16  ;;  %4811 = vrot.lane.b32.xlu2 %v6257_v24, %s5490_s14 }
 0x588   : > { %4821 = vrot.lane.b32.xlu1 %v4815_v2, %s5493_s17 }
 0x58f   : > { %4826 = vrot.lane.b32.xlu2 %v4815_v2, %s5488_s12  ;;  %4856 = vrot.lane.b32.xlu0 %v4855_v40, %s5491_s15 }
 0x590   : > { %4831 = vrot.lane.b32.xlu1 %v4815_v2, %s5489_s13 }
 0x597   : > { %4876 = vrot.lane.b32.xlu2 %v4855_v40, %s5492_s16  ;;  %4861 = vrot.lane.b32.xlu0 %v4855_v40, %s5486_s10 }
 0x598   : > { %4841 = vrot.lane.b32.xlu1 %v4850_v7, %s5491_s15 }
 0x59f   : > { %4881 = vrot.lane.b32.xlu2 %v4855_v40, %s5488_s12  ;;  %4866 = vrot.lane.b32.xlu0 %v4850_v7, %s5488_s12 }
 0x5a0   : > { %v6373_v43 = vpop.permute.xlu2 %4706  ;;  %4846 = vrot.lane.b32.xlu1 %v4850_v7, %s5486_s10 }
 0x5a1   : > { %v8800_v16 = vunpack.i.h.bf16 %v6373_v43 }
 0x5a7   : > { %4906 = vrot.lane.b32.xlu2 %v4855_v40, %s5489_s13  ;;  %4871 = vrot.lane.b32.xlu0 %v4850_v7, %s5493_s17 }
 0x5a8   : > { %v6378_v59 = vpop.permute.xlu2 %4721  ;;  %4886 = vrot.lane.b32.xlu1 %v4855_v40, %s5493_s17 }
 0x5af   : > { %4911 = vrot.lane.b32.xlu2 %v4855_v40, %s5490_s14  ;;  %4896 = vrot.lane.b32.xlu0 %v4815_v2, %s8820_s11 }
 0x5b0   : > { %4891 = vrot.lane.b32.xlu1 %v4850_v7, %s5489_s13 }
 0x5b1   : > { %v6384_v33 = vpop.permute.xlu2 %4746 }
 0x5b7   : > { %4916 = vrot.lane.b32.xlu2 %v4770_v45, %s8820_s11  ;;  %4921 = vrot.lane.b32.xlu0 %v6286_v21, %s8820_s11 }
 0x5b8   : > { %v6389_v25 = vpop.permute.xlu0 %4711  ;;  %4901 = vrot.lane.b32.xlu1 %v4850_v7, %s5490_s14 }
 0x5b9   : > { %v6392_v35 = vpop.permute.xlu1 %4701  ;;  %v6394_v28 = vpop.permute.xlu2 %4756 }
 0x5bf   : > { %4931 = vrot.lane.b32.xlu2 %v4855_v40, %s8820_s11  ;;  %4936 = vrot.lane.b32.xlu0 %v4850_v7, %s8820_s11  ;;  %v8784_v7 = vunpack.i.h.bf16 %v6389_v25  ;;  %v4713_v40 = vunpack.i.l.bf16 %v6389_v25 }
 0x5c0   : > { %v6398_v15 = vpop.permute.xlu0 %4726  ;;  %4926 = vrot.lane.b32.xlu1 %v6257_v24, %s8820_s11  ;;  %v1816_v24 = vld [vmem:[%s8774_s4 + $0x40] sm:$0xff] }
 0x5c1   : > { %v6402_v0 = vpop.permute.xlu1 %4716  ;;  %v6404_v46 = vpop.permute.xlu2 %4766  ;;  %v1740_v11 = vsel %vm343_vm2, %v4713_v40, %v8784_v7 }
 0x5c2   : > { %v8802_v38 = vunpack.i.h.bf16 %v6404_v46  ;;  %v4768_v20 = vunpack.i.l.bf16 %v6404_v46 }
 0x5c7   : > { %1832 = vperm.xlu2 %4458, %v1818_v58   ;;  %1827 = vperm.xlu0 %4579, %v1817_v36  }
 0x5c8   : > { %1837 = vperm.xlu1 %4457, %v1819_v53  }
 0x5c9   : > { %v6415_v54 = vpop.permute.xlu0 %4731  ;;  %v6417_v52 = vpop.permute.xlu2 %4776 }
 0x5ca   : > { %v6419_v23 = vpop.permute.xlu1 %4736  ;;  %v8786_v50 = vunpack.i.h.bf16 %v6417_v52  ;;  %v4778_v49 = vunpack.i.l.bf16 %v6417_v52  ;;  %v8801_v44 = vunpack.i.h.bf16 %v6415_v54  ;;  %v4733_v40 = vunpack.i.l.bf16 %v6415_v54 }
 0x5cc   : > { %v1744_v58 = vsel %vm343_vm2, %v4778_v49, %v8786_v50  ;;  %v8794_v50 = vunpack.i.h.bf16 %v6392_v35 }
 0x5cf   : > { %2146 = vrot.lane.b32.xlu2 %v6323_v9, %s5490_s14  ;;  %2148 = vrot.lane.b32.xlu0 %v6351_v3, %s5490_s14 }
 0x5d0   : > { %2144 = vrot.lane.b32.xlu1 %v6318_v60, %s5490_s14 }
 0x5d1   : > { %v6427_v37 = vpop.permute.xlu0 %4771  ;;  %v6429_v29 = vpop.permute.xlu2 %4791 }
 0x5d2   : > { %v6431_v51 = vpop.permute.xlu1 %4741 }
 0x5d3   : > { %v8785_v10 = vunpack.i.h.bf16 %v6431_v51  ;;  %v4743_v17 = vunpack.i.l.bf16 %v6431_v51 }
 0x5d7   : > { %2138 = vrot.lane.b32.xlu2 %v6292_v22, %s5490_s14  ;;  %2140 = vrot.lane.b32.xlu0 %v6297_v6, %s5490_s14 }
 0x5d8   : > { %1822 = vperm.xlu1 %4457, %v1816_v24   ;;  %v1742_v24 = vsel %vm343_vm2, %v4743_v17, %v8785_v10  ;;  %v8792_v10 = vunpack.i.h.bf16 %v6378_v59 }
 0x5d9   : > { %v6440_v26 = vpop.permute.xlu0 %4781  ;;  %v6442_v41 = vpop.permute.xlu2 %4806 }
 0x5da   : > { %v6444_v62 = vpop.permute.xlu1 %4751  ;;  %v4783_v12 = vunpack.i.l.bf16 %v6440_v26 }
 0x5db   : > { %v4753_v34 = vunpack.i.l.bf16 %v6444_v62 }
 0x5df   : > { %2132 = vrot.lane.b32.xlu2 %v6272_v55, %s5490_s14  ;;  %2134 = vrot.lane.b32.xlu0 %v6275_v18, %s5490_s14 }
 0x5e0   : > { %2142 = vrot.lane.b32.xlu1 %v6356_v48, %s5490_s14 }
 0x5e1   : > { %v6452_v63 = vpop.permute.xlu0 %4786  ;;  %v6454_v13 = vpop.permute.xlu2 %4811 }
 0x5e2   : > { %v6456_v19 = vpop.permute.xlu1 %4761  ;;  %v8789_v56 = vunpack.i.h.bf16 %v6452_v63  ;;  %v4788_v49 = vunpack.i.l.bf16 %v6452_v63 }
 0x5e7   : > { %2126 = vrot.lane.b32.xlu2 %v6249_v32, %s5490_s14  ;;  %2128 = vrot.lane.b32.xlu0 %v6247_v39, %s5490_s14 }
 0x5e8   : > { %2136 = vrot.lane.b32.xlu1 %v6342_v14, %s5490_s14 }
 0x5e9   : > { %v6464_v21 = vpop.permute.xlu0 %4816  ;;  %v6466_v27 = vpop.permute.xlu2 %4826 }
 0x5ea   : > { %v8788_v45 = vunpack.i.h.bf16 %v6464_v21  ;;  %v4818_v47 = vunpack.i.l.bf16 %v6464_v21  ;;  %v6472_v57 = vpop.permute.xlu1 %4796  ;;  %v8787_v36 = vunpack.i.h.bf16 %v6466_v27  ;;  %v4828_v53 = vunpack.i.l.bf16 %v6466_v27 }
 0x5ec   : > { %v1746_v2 = vsel %vm343_vm2, %v4818_v47, %v8788_v45  ;;  %v1702_v42 = vsel %vm331_vm3, %v4828_v53, %v8787_v36  ;;  %v4703_v53 = vunpack.i.l.bf16 %v6392_v35  ;;  %v1568_v36 = vsel %vm295_vm6, %v4768_v20, %v8802_v38 }
 0x5ed   : > { %1882 = vmatpush.msra.mxu1 %v1746_v2 }
 0x5ef   : > { %1883 = vmatpush.msra.mxu1 %v1744_v58 }
 0x5f0   : > { %2130 = vrot.lane.b32.xlu1 %v6338_v1, %s5490_s14 }
 0x5f1   : > { %v6491_v47 = vpop.permute.xlu0 %4836  ;;  %v6493_v2 = vpop.permute.xlu2 %4876  ;;  %1884 = vmatpush.msra.mxu1 %v1742_v24  ;;  %v8790_v24 = vunpack.i.h.bf16 %v6444_v62 }
 0x5f2   : > { %v6497_v58 = vpop.permute.xlu1 %4801 }
 0x5f3   : > { %v4804_v17 = vunpack.i.h.bf16 %v6497_v58  ;;  %v4803_v5 = vunpack.i.l.bf16 %v6497_v58  ;;  %1885 = vmatpush.msra.mxu1 %v1740_v11  ;;  %v4723_v58 = vunpack.i.l.bf16 %v6378_v59  ;;  %v1700_v11 = vsel %vm331_vm3, %v4788_v49, %v8789_v56 }
 0x5f4   : > { %v1566_v56 = vsel %vm295_vm6, %v4733_v40, %v8801_v44  ;;  %v4708_v40 = vunpack.i.l.bf16 %v6373_v43 }
 0x5f5   : > { %v1570_v7 = vsel %vm295_vm6, %v4803_v5, %v4804_v17  ;;  %1886 = vmatpush.msra.mxu1 %v1702_v42  ;;  %v1698_v5 = vsel %vm331_vm3, %v4753_v34, %v8790_v24  ;;  %v8796_v42 = vunpack.i.h.bf16 %v6442_v41  ;;  %v1696_v34 = vsel %vm331_vm3, %v4723_v58, %v8792_v10 }
 0x5f6   : > { %1853 = vmatpush.msrb.mxu3 %v1570_v7  ;;  %v4808_v7 = vunpack.i.l.bf16 %v6442_v41  ;;  %v1564_v24 = vsel %vm295_vm6, %v4703_v53, %v8794_v50 }
 0x5f7   : > { %1887 = vmatpush.msra.mxu1 %v1700_v11  ;;  %v4773_v11 = vunpack.i.l.bf16 %v6427_v37 }
 0x5f8   : > { %1854 = vmatpush.msrb.mxu3 %v1568_v36  ;;  %v8795_v36 = vunpack.i.h.bf16 %v6427_v37  ;;  %v1526_v58 = vsel %vm283_vm7, %v4808_v7, %v8796_v42  ;;  %v1520_v7 = vsel %vm283_vm7, %v4708_v40, %v8800_v16  ;;  %v4748_v16 = vunpack.i.l.bf16 %v6384_v33 }
 0x5f9   : > { %v6529_v45 = vpop.permute.xlu0 %4851  ;;  %v6531_v49 = vpop.permute.xlu2 %4881  ;;  %1888 = vmatpush.msra.mxu1 %v1698_v5  ;;  %v4738_v5 = vunpack.i.l.bf16 %v6419_v23  ;;  %v8807_v40 = vunpack.i.h.bf16 %v6398_v15 }
 0x5fa   : > { %v6536_v20 = vpop.permute.xlu1 %4821  ;;  %1855 = vmatpush.msrb.mxu3 %v1566_v56  ;;  %v8799_v56 = vunpack.i.h.bf16 %v6419_v23  ;;  %v1524_v10 = vsel %vm283_vm7, %v4773_v11, %v8795_v36 }
 0x5fb   : > { %1889 = vmatpush.msra.mxu1 %v1696_v34  ;;  %v8804_v53 = vunpack.i.h.bf16 %v6536_v20 }
 0x5fc   : > { %1856 = vmatpush.msrb.mxu3 %v1564_v24  ;;  %v4823_v24 = vunpack.i.l.bf16 %v6536_v20  ;;  %v1522_v50 = vsel %vm283_vm7, %v4738_v5, %v8799_v56 }
 0x5fe   : > { %1857 = vmatpush.msrb.mxu3 %v1526_v58  ;;  %v1482_v30 = vsel %vm271_vm8, %v4823_v24, %v8804_v53  ;;  %v4718_v24 = vunpack.i.l.bf16 %v6402_v0  ;;  %v8883_v53 = vunpack.i.h.bf16 %v6440_v26  ;;  %v8886_v58 = vunpack.i.h.bf16 %v6394_v28 }
 0x600   : > { %1858 = vmatpush.msrb.mxu3 %v1524_v10  ;;  %v4793_v10 = vunpack.i.l.bf16 %v6429_v29 }
 0x601   : > { %v6558_v34 = vpop.permute.xlu2 %4906  ;;  %v6560_v31 = vpop.permute.xlu0 %4856 }
 0x602   : > { %v8806_v11 = vunpack.i.h.bf16 %v6560_v31  ;;  %v8803_v36 = vunpack.i.l.bf16 %v6560_v31  ;;  %v6572_v42 = vpop.permute.xlu1 %4831  ;;  %1859 = vmatpush.msrb.mxu3 %v1522_v50  ;;  %v4758_v50 = vunpack.i.l.bf16 %v6394_v28 }
 0x603   : > { %v8805_v5 = vunpack.i.h.bf16 %v6572_v42  ;;  %v4833_v56 = vunpack.i.l.bf16 %v6572_v42 }
 0x604   : > { %1860 = vmatpush.msrb.mxu3 %v1520_v7  ;;  %v1571_v44 = vsel %vm295_vm6, %v4804_v17, %v8803_v36  ;;  %v4728_v7 = vunpack.i.l.bf16 %v6398_v15  ;;  %v8882_v17 = vunpack.i.h.bf16 %v6404_v46 }
 0x605   : > { %v1658_v38 = vsel %vm319_vm4, %v4833_v56, %v8805_v5  ;;  %1940 = vmatpush.msra.mxu2 %v1571_v44  ;;  %v1480_v44 = vsel %vm271_vm8, %v4783_v12, %v8883_v53  ;;  %v8884_v56 = vunpack.i.h.bf16 %v6429_v29  ;;  %v1654_v12 = vsel %vm319_vm4, %v4758_v50, %v8886_v58 }
 0x606   : > { %1861 = vmatpush.msrb.mxu3 %v1482_v30  ;;  %1890 = vmatpush.msra.mxu1 %v1658_v38  ;;  %v1569_v36 = vsel %vm295_vm6, %v8882_v17, %v8806_v11  ;;  %v8808_v30 = vunpack.i.h.bf16 %v6491_v47  ;;  %v4838_v38 = vunpack.i.l.bf16 %v6491_v47  ;;  %v8885_v17 = vunpack.i.h.bf16 %v6384_v33 }
 0x607   : > { %v1656_v5 = vsel %vm319_vm4, %v4793_v10, %v8884_v56  ;;  %1941 = vmatpush.msra.mxu2 %v1569_v36  ;;  %v1652_v36 = vsel %vm319_vm4, %v4728_v7, %v8807_v40  ;;  %v4799_v10 = vunpack.i.h.bf16 %v6472_v57  ;;  %v8887_v56 = vunpack.i.h.bf16 %v6402_v0 }
 0x608   : > { %1862 = vmatpush.msrb.mxu3 %v1480_v44  ;;  %1891 = vmatpush.msra.mxu1 %v1656_v5  ;;  %v1478_v11 = vsel %vm271_vm8, %v4748_v16, %v8885_v17  ;;  %v4798_v5 = vunpack.i.l.bf16 %v6472_v57  ;;  %v4763_v7 = vunpack.i.l.bf16 %v6456_v19  ;;  %v1614_v17 = vsel %vm307_vm5, %v4838_v38, %v8808_v30 }
 0x609   : > { %v6608_v46 = vpop.permute.xlu0 %4861  ;;  %v6623_v44 = vpop.permute.xlu2 %4911  ;;  %v1476_v58 = vsel %vm271_vm8, %v4718_v24, %v8887_v56  ;;  %v8809_v24 = vunpack.i.l.bf16 %v6493_v2  ;;  %v8889_v56 = vmax.f32 %v6318_v60, 0.0  ;;  %v8812_v30 = vunpack.i.h.bf16 %v6493_v2 }
 0x60a   : > { %v6616_v53 = vpop.permute.xlu1 %4841  ;;  %1863 = vmatpush.msrb.mxu3 %v1478_v11  ;;  %1892 = vmatpush.msra.mxu1 %v1654_v12  ;;  %v4764_v11 = vunpack.i.h.bf16 %v6456_v19  ;;  %v8888_v12 = vunpack.i.h.bf16 %v6415_v54  ;;  %v1612_v38 = vsel %vm307_vm5, %v4798_v5, %v4799_v10  ;;  %v8890_v54 = vmax.f32 %v6292_v22, 0.0 }
 0x60b   : > { %v8814_v16 = vunpack.i.l.bf16 %v6616_v53  ;;  %v8813_v50 = vunpack.i.h.bf16 %v6616_v53  ;;  %v8891_v60 = vunpack.i.h.bf16 %v6392_v35  ;;  %v8893_v35 = vunpack.i.h.bf16 %v6442_v41 }
 0x60c   : > { %1864 = vmatpush.msrb.mxu3 %v1476_v58  ;;  %1893 = vmatpush.msra.mxu1 %v1652_v36  ;;  %v4814_v36 = vunpack.i.h.bf16 %v6454_v13  ;;  %v4813_v58 = vunpack.i.l.bf16 %v6454_v13  ;;  %v1610_v5 = vsel %vm307_vm5, %v4763_v7, %v4764_v11  ;;  %v4864_v7 = vunpack.i.h.bf16 %v6608_v46  ;;  %v1806_v13 = vld [vmem:[%s8773_s3 + $0xd0] sm:$0xff] }
 0x60d   : > { %v1567_v40 = vsel %vm295_vm6, %v8888_v12, %v8814_v16  ;;  %v4863_v12 = vunpack.i.l.bf16 %v6608_v46  ;;  %v8810_v41 = vunpack.i.h.bf16 %v6529_v45 }
 0x60e   : > { %1865 = vmatpush.msrb.mxu3 %v8889_v56  ;;  %1894 = vmatpush.msra.mxu1 %v1614_v17  ;;  %v1565_v17 = vsel %vm295_vm6, %v8891_v60, %v8813_v50  ;;  %v8811_v56 = vunpack.i.l.bf16 %v6529_v45  ;;  %v6675_v60 = vld [vmem:[%s8773_s3 + $0xc0] sm:$0xff] }
 0x60f   : > { %1942 = vmatpush.msra.mxu2 %v1567_v40 }
 0x610   : > { %1866 = vmatpush.msrb.mxu3 %v8890_v54  ;;  %1895 = vmatpush.msra.mxu1 %v1612_v38  ;;  %v8892_v38 = vmax.f32 %v6272_v55, 0.0  ;;  %v1527_v54 = vsel %vm283_vm7, %v8893_v35, %v8809_v24  ;;  %v1608_v55 = vsel %vm307_vm5, %v4813_v58, %v4814_v36  ;;  %v8896_v24 = vunpack.i.h.bf16 %v6464_v21 }
 0x611   : > { %1943 = vmatpush.msra.mxu2 %v1565_v17  ;;  %v6657_v40 = vpop.permute.xlu0 %4866  ;;  %v6684_v17 = vld [vmem:[%s8773_s3 + $0xc8] sm:$0xff] }
 0x612   : > { %v6663_v22 = vpop.permute.xlu1 %4846  ;;  %1867 = vmatpush.msrb.mxu3 %v8892_v38  ;;  %1896 = vmatpush.msra.mxu1 %v1610_v5  ;;  %v8894_v5 = vmax.f32 %v6249_v32, 0.0  ;;  %v8895_v38 = vunpack.i.h.bf16 %v6427_v37  ;;  %v1747_v32 = vsel %vm343_vm2, %v8896_v24, %v4863_v12  ;;  %v8897_v37 = vunpack.i.h.bf16 %v6419_v23 }
 0x613   : > { %1944 = vmatpush.msra.mxu2 %v1527_v54  ;;  %v6694_v54 = vpop.permute.xlu2 %4916  ;;  %v4848_v58 = vunpack.i.l.bf16 %v6663_v22  ;;  %v8899_v24 = vunpack.i.h.bf16 %v6373_v43  ;;  %v6733_v43 = vld [vmem:[%s8773_s3 + $0xd8] sm:$0xff] }
 0x614   : > { %1868 = vmatpush.msrb.mxu3 %v8894_v5  ;;  %1897 = vmatpush.msra.mxu1 %v1608_v55  ;;  %v1525_v35 = vsel %vm283_vm7, %v8895_v38, %v8812_v30  ;;  %v1523_v55 = vsel %vm283_vm7, %v8897_v37, %v8811_v56  ;;  %v4849_v5 = vunpack.i.h.bf16 %v6663_v22  ;;  %v8898_v38 = vunpack.i.h.bf16 %v6417_v52 }
 0x615   : > { %1945 = vmatpush.msra.mxu2 %v1525_v35  ;;  %1869 = vmatmul.f32.vlgmr.msrb.gmra.mxu3 %v6675_v60  ;;  %v1521_v23 = vsel %vm283_vm7, %v8899_v24, %v8810_v41  ;;  %v8818_v35 = vunpack.i.l.bf16 %v6531_v49  ;;  %v8902_v56 = vunpack.i.h.bf16 %v6466_v27  ;;  %v4869_v30 = vunpack.i.h.bf16 %v6657_v40 }
 0x616   : > { %1969 = vmatpush.msra.mxu3 %v1747_v32  ;;  %1898 = vmatmul.f32.vlgmr.msra.gmra.mxu1 %v6684_v17  ;;  %v1745_v21 = vsel %vm343_vm2, %v8898_v38, %v4864_v7  ;;  %v8900_v32 = vunpack.i.h.bf16 %v6431_v51  ;;  %v8817_v38 = vunpack.i.h.bf16 %v6531_v49  ;;  %v8901_v51 = vunpack.i.h.bf16 %v6389_v25 }
 0x617   : > { %1946 = vmatpush.msra.mxu2 %v1523_v55  ;;  %v1703_v25 = vsel %vm331_vm3, %v8902_v56, %v8818_v35  ;;  %v8904_v27 = vunpack.i.h.bf16 %v6452_v63  ;;  %v8906_v63 = vunpack.i.h.bf16 %v6444_v62  ;;  %v6795_v62 = vld [vmem:[%s8773_s3 + $0xf0] sm:$0xff]  ;;  %v8920_v22 = vunpack.i.l.bf16 %v6560_v31 }
 0x618   : > { %1970 = vmatpush.msra.mxu3 %v1745_v21  ;;  %v1743_v37 = vsel %vm343_vm2, %v8900_v32, %v4848_v58  ;;  %v6746_v32 = vld [vmem:[%s8773_s3 + $0xe0] sm:$0xff] }
 0x619   : > { %1947 = vmatpush.msra.mxu2 %v1521_v23  ;;  %v6726_v55 = vpop.permute.xlu0 %4871  ;;  %v1741_v23 = vsel %vm343_vm2, %v8901_v51, %v4849_v5  ;;  %v8903_v51 = vunpack.i.h.bf16 %v6536_v20  ;;  %v1701_v56 = vsel %vm331_vm3, %v8904_v27, %v8817_v38  ;;  %v8905_v20 = vunpack.i.h.bf16 %v6440_v26 }
 0x61a   : > { %1971 = vmatpush.msra.mxu3 %v1743_v37  ;;  %v6728_v52 = vpop.permute.xlu1 %4886  ;;  %v4868_v37 = vunpack.i.l.bf16 %v6657_v40  ;;  %v8819_v41 = vunpack.i.l.bf16 %v6726_v55  ;;  %v4874_v16 = vunpack.i.h.bf16 %v6726_v55  ;;  %v8907_v26 = vunpack.i.h.bf16 %v6384_v33  ;;  %v1812_v40 = vld [vmem:[%s8773_s3 + $0x100] sm:$0xff] }
 0x61b   : > { %v8816_v21 = vunpack.i.h.bf16 %v6728_v52  ;;  %v8815_v24 = vunpack.i.l.bf16 %v6728_v52  ;;  %v6762_v50 = vpop.permute.xlu2 %4931  ;;  %v8908_v33 = vunpack.i.h.bf16 %v6378_v59 }
 0x61c   : > { %1972 = vmatpush.msra.mxu3 %v1741_v23  ;;  %v1699_v27 = vsel %vm331_vm3, %v8906_v63, %v4868_v37  ;;  %v4909_v63 = vunpack.i.h.bf16 %v6558_v34 }
 0x61d   : > { %1872 = vmatmul.f32.gmra.mxu3 %v6733_v43  ;;  %v1483_v23 = vsel %vm271_vm8, %v8903_v51, %v8815_v24  ;;  %v1481_v51 = vsel %vm271_vm8, %v8905_v20, %v8816_v21  ;;  %v1479_v20 = vsel %vm271_vm8, %v8907_v26, %v8819_v41  ;;  %v4934_v26 = vunpack.i.h.bf16 %v6762_v50 }
 0x61e   : > { %1973 = vmatpush.msra.mxu3 %v1703_v25  ;;  %1948 = vmatpush.msra.mxu2 %v1483_v23  ;;  %v4908_v25 = vunpack.i.l.bf16 %v6558_v34  ;;  %v4919_v23 = vunpack.i.h.bf16 %v6694_v54  ;;  %v8929_v34 = vunpack.i.l.bf16 %v6728_v52 }
 0x61f   : > { %1901 = vmatmul.f32.gmra.mxu1 %v6746_v32 }
 0x620   : > { %1974 = vmatpush.msra.mxu3 %v1701_v56  ;;  %1949 = vmatpush.msra.mxu2 %v1481_v51  ;;  %v4918_v56 = vunpack.i.l.bf16 %v6694_v54  ;;  %v4933_v51 = vunpack.i.l.bf16 %v6762_v50  ;;  %v1697_v54 = vsel %vm331_vm3, %v8908_v33, %v4869_v30  ;;  %v8923_v50 = vunpack.i.l.bf16 %v6616_v53 }
 0x621   : > { %v4897_v24 = vpop.permute.xlu0 %4896 }
 0x622   : > { %1975 = vmatpush.msra.mxu3 %v1699_v27  ;;  %v4899_v21 = vunpack.i.h.bf16 %v4897_v24  ;;  %v4898_v38 = vunpack.i.l.bf16 %v4897_v24  ;;  %v6790_v35 = vpop.permute.xlu1 %4891  ;;  %1950 = vmatpush.msra.mxu2 %v1479_v20  ;;  %v8909_v24 = vunpack.i.h.bf16 %v6402_v0  ;;  %v8910_v0 = vunpack.i.h.bf16 %v6572_v42 }
 0x623   : > { %v4893_v59 = vunpack.i.l.bf16 %v6790_v35  ;;  %v8913_v42 = vmax.f32 %v6297_v6, 0.0 }
 0x624   : > { %v1477_v27 = vsel %vm271_vm8, %v8909_v24, %v4874_v16  ;;  %1976 = vmatpush.msra.mxu3 %v1697_v54  ;;  %v1790_v20 = vsel %vm355_vm1, %v4898_v38, %v4899_v21  ;;  %v1791_v41 = vsel %vm355_vm1, %v4899_v21, %v4933_v51  ;;  %v1659_v33 = vsel %vm319_vm4, %v8910_v0, %v4908_v25 }
 0x625   : > { %1951 = vmatpush.msra.mxu2 %v1477_v27  ;;  %1875 = vmatmul.f32.gmra.mxu3 %v6795_v62  ;;  %v8911_v54 = vmax.f32 %v6323_v9, 0.0  ;;  %v1788_v38 = vsel %vm355_vm1, %v4918_v56, %v4919_v23  ;;  %v4894_v24 = vunpack.i.h.bf16 %v6790_v35  ;;  %v8912_v21 = vunpack.i.h.bf16 %v6429_v29  ;;  %v6837_v56 = vld [vmem:[%s8773_s3 + $0xf8] sm:$0xff] }
 0x626   : > { %1923 = vmatpush.msra.mxu0 %v1790_v20  ;;  %1977 = vmatpush.msra.mxu3 %v1659_v33  ;;  %v1789_v9 = vsel %vm355_vm1, %v4919_v23, %v4934_v26  ;;  %v8914_v29 = vunpack.i.h.bf16 %v6394_v28  ;;  %v8915_v23 = vmax.f32 %v6275_v18, 0.0  ;;  %v8916_v28 = vunpack.i.h.bf16 %v6398_v15 }
 0x627   : > { %1952 = vmatpush.msra.mxu2 %v8911_v54  ;;  %2010 = vmatpush.msrb.mxu1 %v1791_v41  ;;  %v1657_v27 = vsel %vm319_vm4, %v8912_v21, %v4909_v63  ;;  %v4913_v41 = vunpack.i.l.bf16 %v6623_v44  ;;  %v4914_v21 = vunpack.i.h.bf16 %v6623_v44  ;;  %v8918_v15 = vunpack.i.h.bf16 %v6491_v47  ;;  %v6885_v47 = vld [vmem:[%s8773_s3 + $0x110] sm:$0xff] }
 0x628   : > { %1924 = vmatpush.msra.mxu0 %v1788_v38  ;;  %1978 = vmatpush.msra.mxu3 %v1657_v27  ;;  %v1655_v20 = vsel %vm319_vm4, %v8914_v29, %v4893_v59  ;;  %v6852_v38 = vld [vmem:[%s8773_s3 + $0x108] sm:$0xff]  ;;  %v1653_v27 = vsel %vm319_vm4, %v8916_v28, %v4894_v24  ;;  %v8930_v35 = vunpack.i.h.bf16 %v6728_v52  ;;  %v8932_v44 = vmax.f32 %v6351_v3, 0.0 }
 0x629   : > { %1953 = vmatpush.msra.mxu2 %v8913_v42  ;;  %2011 = vmatpush.msrb.mxu1 %v1789_v9  ;;  %v4922_v6 = vpop.permute.xlu0 %4921  ;;  %v8917_v42 = vmax.f32 %v6247_v39, 0.0  ;;  %v1615_v29 = vsel %vm307_vm5, %v8918_v15, %v4913_v41  ;;  %v8933_v52 = vmax.f32 %v6356_v48, 0.0 }
 0x62a   : > { %1979 = vmatpush.msra.mxu3 %v1655_v20  ;;  %v4924_v0 = vunpack.i.h.bf16 %v4922_v6  ;;  %v4923_v33 = vunpack.i.l.bf16 %v4922_v6  ;;  %v6845_v54 = vpop.permute.xlu1 %4901  ;;  %1904 = vmatmul.f32.gmra.mxu1 %v6837_v56  ;;  %v1613_v20 = vsel %vm307_vm5, %v4799_v10, %v4914_v21 }
 0x62b   : > { %1954 = vmatpush.msra.mxu2 %v8915_v23  ;;  %v4903_v9 = vunpack.i.l.bf16 %v6845_v54  ;;  %v4904_v39 = vunpack.i.h.bf16 %v6845_v54 }
 0x62c   : > { %1980 = vmatpush.msra.mxu3 %v1653_v27  ;;  %v1786_v18 = vsel %vm355_vm1, %v4923_v33, %v4924_v0 }
 0x62d   : > { %1955 = vmatpush.msra.mxu2 %v8917_v42  ;;  %1878 = vmatmul.f32.gmra.mxu3 %v6852_v38  ;;  %v1609_v33 = vsel %vm307_vm5, %v4814_v36, %v4904_v39  ;;  %v8919_v36 = vunpack.i.l.bf16 %v6531_v49 }
 0x62e   : > { %1956 = vmatmul.f32.vlgmr.msra.gmra.mxu2 %v6675_v60  ;;  %1981 = vmatpush.msra.mxu3 %v1615_v29 }
 0x62f   : > { %2056 = vmatpush.msrb.mxu2 %v4863_v12  ;;  %1925 = vmatpush.msra.mxu0 %v1786_v18  ;;  %v1611_v12 = vsel %vm307_vm5, %v4764_v11, %v4903_v9 }
 0x630   : > { %1982 = vmatpush.msra.mxu3 %v1613_v20 }
 0x631   : > { %2057 = vmatpush.msrb.mxu2 %v4864_v7  ;;  %v4937_v6 = vpop.permute.xlu0 %4936 }
 0x632   : > { %1983 = vmatpush.msra.mxu3 %v1611_v12  ;;  %v4938_v57 = vunpack.i.l.bf16 %v4937_v6  ;;  %v4927_v10 = vpop.permute.xlu1 %4926  ;;  %1907 = vmatmul.f32.gmra.mxu1 %v6885_v47  ;;  %v4939_v11 = vunpack.i.h.bf16 %v4937_v6 }
 0x633   : > { %2058 = vmatpush.msrb.mxu2 %v4848_v58  ;;  %v4929_v46 = vunpack.i.h.bf16 %v4927_v10  ;;  %v4928_v7 = vunpack.i.l.bf16 %v4927_v10 }
 0x634   : > { %1984 = vmatpush.msra.mxu3 %v1609_v33  ;;  %v1787_v19 = vsel %vm355_vm1, %v4924_v0, %v4938_v57  ;;  %v8922_v0 = vunpack.i.h.bf16 %v6560_v31  ;;  %v8924_v31 = vunpack.i.h.bf16 %v6616_v53  ;;  %v8927_v53 = vunpack.i.l.bf16 %v6529_v45 }
 0x635   : > { %2059 = vmatpush.msrb.mxu2 %v4849_v5  ;;  %v1784_v58 = vsel %vm355_vm1, %v4928_v7, %v4929_v46  ;;  %1985 = vmatmul.f32.vlgmr.msra.gmra.mxu3 %v6684_v17  ;;  %v8921_v5 = vunpack.i.h.bf16 %v6531_v49  ;;  %v1809_v49 = vld [vmem:[%s8773_s3 + $0xe8] sm:$0xff] }
 0x636   : > { %2097 = vmatpush.msrb.mxu3 %v4933_v51  ;;  %1959 = vmatmul.f32.gmra.mxu2 %v6733_v43  ;;  %v1785_v51 = vsel %vm355_vm1, %v4929_v46, %v4939_v11 }
 0x637   : > { %2060 = vmatpush.msrb.mxu2 %v8919_v36  ;;  %1926 = vmatpush.msra.mxu0 %v1784_v58 }
 0x638   : > { %2012 = vmatpush.msrb.mxu1 %v1787_v19  ;;  %2098 = vmatpush.msrb.mxu3 %v4934_v26 }
 0x639   : > { %4292 = vmatmul.msk.f32.vlgmr.msra.gmra.mxu0 %vm1840_vm14, %v1806_v13  ;;  %2061 = vmatpush.msrb.mxu2 %v8921_v5 }
 0x63a   : > { %2027 = vmatpush.msrb.mxu0 %v8920_v22  ;;  %2013 = vmatpush.msrb.mxu1 %v1785_v51  ;;  %v7008_v3 = vpop.permute.xlu1 %1837 }
 0x63b   : > { %2099 = vmatpush.msrb.mxu3 %v4938_v57  ;;  %2062 = vmatpush.msrb.mxu2 %v4868_v37  ;;  %v8925_v37 = vunpack.i.l.bf16 %v6493_v2 }
 0x63c   : > { %2028 = vmatpush.msrb.mxu0 %v8922_v0  ;;  %4296 = vmatmul.msk.f32.vlgmr.msrb.gmra.mxu1 %vm1840_vm14, %v1806_v13 }
 0x63d   : > { %2100 = vmatpush.msrb.mxu3 %v4939_v11  ;;  %2063 = vmatpush.msrb.mxu2 %v4869_v30  ;;  %v8926_v30 = vunpack.i.h.bf16 %v6493_v2  ;;  %v8928_v2 = vunpack.i.h.bf16 %v6529_v45  ;;  %v8931_v45 = vunpack.i.l.bf16 %v6726_v55 }
 0x63e   : > { %2029 = vmatpush.msrb.mxu0 %v8923_v50  ;;  %1962 = vmatmul.f32.gmra.mxu2 %v6795_v62 }
 0x63f   : > { %1988 = vmatmul.f32.gmra.mxu3 %v6746_v32  ;;  %2064 = vmatpush.msrb.mxu2 %v4908_v25  ;;  %v1815_v25 = vld [vmem:[%s8773_s3 + $0x118] sm:$0xff] }
 0x640   : > { %2030 = vmatpush.msrb.mxu0 %v8924_v31 }
 0x641   : > { %4293 = vmatmul.msk.f32.gmra.mxu0 %vm1840_vm14, %v1809_v49  ;;  %2065 = vmatpush.msrb.mxu2 %v4909_v63  ;;  %v8934_v63 = vmax.f32 %v6342_v14, 0.0  ;;  %v7006_v14 = vpop.permute.xlu2 %1832 }
 0x642   : > { %2031 = vmatpush.msrb.mxu0 %v8925_v37 }
 0x643   : > { %2066 = vmatpush.msrb.mxu2 %v4893_v59 }
 0x644   : > { %2032 = vmatpush.msrb.mxu0 %v8926_v30  ;;  %4297 = vmatmul.msk.f32.gmra.mxu1 %vm1840_vm14, %v1809_v49 }
 0x645   : > { %2067 = vmatpush.msrb.mxu2 %v4894_v24 }
 0x646   : > { %2033 = vmatpush.msrb.mxu0 %v8927_v53  ;;  %1965 = vmatmul.f32.gmra.mxu2 %v6852_v38 }
 0x647   : > { %1991 = vmatmul.f32.gmra.mxu3 %v6837_v56  ;;  %2068 = vmatpush.msrb.mxu2 %v4913_v41 }
 0x648   : > { %2034 = vmatpush.msrb.mxu0 %v8928_v2 }
 0x649   : > { %4294 = vmatmul.msk.f32.gmra.mxu0 %vm1840_vm14, %v1812_v40  ;;  %2069 = vmatpush.msrb.mxu2 %v4914_v21 }
 0x64a   : > { %2035 = vmatpush.msrb.mxu0 %v8929_v34 }
 0x64b   : > { %2070 = vmatpush.msrb.mxu2 %v4903_v9 }
 0x64c   : > { %2036 = vmatpush.msrb.mxu0 %v8930_v35  ;;  %4298 = vmatmul.msk.f32.gmra.mxu1 %vm1840_vm14, %v1812_v40 }
 0x64d   : > { %2071 = vmatpush.msrb.mxu2 %v4904_v39 }
 0x64e   : > { %2037 = vmatpush.msrb.mxu0 %v8931_v45  ;;  %2072 = vmatmul.f32.vlgmr.msrb.gmra.mxu2 %v6684_v17  ;;  %v8935_v17 = vmax.f32 %v6338_v1, 0.0  ;;  %v7004_v1 = vpop.permute.xlu0 %1827 }
 0x64f   : > { %1994 = vmatmul.f32.gmra.mxu3 %v6885_v47 }
 0x650   : > { %2038 = vmatpush.msrb.mxu0 %v4874_v16 }
 0x651   : > { %4295 = vmatmul.msk.f32.gmra.mxu0 %vm1840_vm14, %v1815_v25 }
 0x652   : > { %2039 = vmatpush.msrb.mxu0 %v8932_v44 }
 0x654   : > { %2040 = vmatpush.msrb.mxu0 %v8933_v52  ;;  %4299 = vmatmul.msk.f32.gmra.mxu1 %vm1840_vm14, %v1815_v25 }
 0x656   : > { %2041 = vmatpush.msrb.mxu0 %v8934_v63  ;;  %2075 = vmatmul.f32.gmra.mxu2 %v6746_v32  ;;  %v7010_v16 = vpop.permute.xlu0 %2148 }
 0x657   : > { %4300 = vmatmul.msk.f32.vlgmr.msrb.gmra.mxu3 %vm1840_vm14, %v1806_v13 }
 0x658   : > { %2042 = vmatpush.msrb.mxu0 %v8935_v17 }
 0x659   : > { %2043 = vmatmul.f32.vlgmr.msrb.gmra.mxu0 %v6675_v60  ;;  %v7012_v60 = vpop.permute.xlu2 %2146 }
 0x65e   : > { %2078 = vmatmul.f32.gmra.mxu2 %v6837_v56 }
 0x65f   : > { %4301 = vmatmul.msk.f32.gmra.mxu3 %vm1840_vm14, %v1809_v49 }
 0x661   : > { %2046 = vmatmul.f32.gmra.mxu0 %v6733_v43  ;;  %v7014_v43 = vpop.permute.xlu1 %2144  ;;  %v2139_v59 = vpop.permute.xlu2 %2138 }
 0x666   : > { %2081 = vmatmul.f32.gmra.mxu2 %v6885_v47 }
 0x667   : > { %4302 = vmatmul.msk.f32.gmra.mxu3 %vm1840_vm14, %v1812_v40 }
 0x669   : > { %2049 = vmatmul.f32.gmra.mxu0 %v6795_v62  ;;  %v7016_v62 = vpop.permute.xlu0 %2140  ;;  %v7018_v24 = vpop.permute.xlu1 %1822 }
 0x66a   : > { %v2133_v23 = vpop.permute.xlu2 %2132 }
 0x66f   : > { %4303 = vmatmul.msk.f32.gmra.mxu3 %vm1840_vm14, %v1815_v25  ;;  %v2154_v25 = vsel %vm307_vm5, %v2139_v59, %v7016_v62 }
 0x671   : > { %2052 = vmatmul.f32.gmra.mxu0 %v6852_v38  ;;  %v2135_v54 = vpop.permute.xlu0 %2134  ;;  %v7020_v38 = vpop.permute.xlu1 %2142 }
 0x672   : > { %v2127_v29 = vpop.permute.xlu2 %2126  ;;  %v2152_v36 = vsel %vm307_vm5, %v2133_v23, %v2135_v54 }
 0x679   : > { %v2129_v18 = vpop.permute.xlu0 %2128  ;;  %v7024_v47 = vpop.permute.xlu1 %2136 }
 0x67a   : > { %v2150_v20 = vsel %vm307_vm5, %v2127_v29, %v2129_v18  ;;  %v2153_v59 = vsel %vm307_vm5, %v2135_v54, %v7024_v47 }
 0x681   : > { %v2131_v50 = vpop.permute.xlu1 %2130 }
 0x682   : > { %v2151_v40 = vsel %vm307_vm5, %v2129_v18, %v2131_v50  ;;  %v2156_v18 = vsel %vm307_vm5, %v7014_v43, %v7012_v60  ;;  %v2155_v43 = vsel %vm307_vm5, %v7016_v62, %v7020_v38 }
 0x693   : > { %v1899_v48 = vpop.f32.mrf.mxu1 }
 0x698   : > { %v1870_v55 = vpop.f32.mrf.mxu3 }
 0x699   : > { %v1871_v21 = vadd.f32 %v1870_v55, %v7018_v24 }
 0x69b   : > { %v1900_v9 = vadd.f32 %v1899_v48, %v1871_v21 }
 0x69c   : > { %v1902_v32 = vpop.f32.mrf.mxu1 }
 0x6a0   : > { %v1873_v26 = vpop.f32.mrf.mxu3 }
 0x6a1   : > { %v1874_v12 = vadd.f32 %v1873_v26, %v7004_v1 }
 0x6a3   : > { %v1903_v33 = vadd.f32 %v1902_v32, %v1874_v12 }
 0x6a7   : > { %v1905_v41 = vpop.f32.mrf.mxu1 }
 0x6a8   : > { %v1876_v56 = vpop.f32.mrf.mxu3 }
 0x6a9   : > { %v1877_v22 = vadd.f32 %v1876_v56, %v7006_v14 }
 0x6ab   : > { %v1906_v30 = vadd.f32 %v1905_v41, %v1877_v22 }
 0x6af   : > { %v1908_v42 = vpop.f32.mrf.mxu1 }
 0x6b0   : > { %v1879_v28 = vpop.f32.mrf.mxu3 }
 0x6b1   : > { %v1957_v27 = vpop.f32.mrf.mxu2  ;;  %v1880_v44 = vadd.f32 %v1879_v28, %v7008_v3 }
 0x6b2   : > { %v1958_v19 = vadd.f32 %v1957_v27, %v7018_v24 }
 0x6b3   : > { %v1909_v56 = vadd.f32 %v1908_v42, %v1880_v44 }
 0x6b6   : > { %v1928_v15 = vpop.f32.mrf.mxu0 }
 0x6b7   : > { %v1929_v39 = vadd.f32 %v1928_v15, %v1900_v9 }
 0x6b8   : > { %v1986_v10 = vpop.f32.mrf.mxu3 }
 0x6b9   : > { %v2170_v6 = vadd.f32 %v2150_v20, %v1929_v39  ;;  %v1960_v57 = vpop.f32.mrf.mxu2  ;;  %v2015_v46 = vpop.f32.mrf.mxu1  ;;  %v1987_v58 = vadd.f32 %v1986_v10, %v1958_v19  ;;  %v2157_v10 = vsel %vm307_vm5, %v7012_v60, %v7010_v16 }
 0x6ba   : > { %v1961_v53 = vadd.f32 %v1960_v57, %v7004_v1 }
 0x6bb   : > { %v2182_v7 = vmul.f32 %v2170_v6, %v5650_v61  ;;  %v2016_v49 = vadd.f32 %v2015_v46, %v1987_v58 }
 0x6bd   : > { %2206 = vrot.lane.b32.xlu2 %v2182_v7, %s5495_s6  ;;  %v2171_v34 = vadd.f32 %v2151_v40, %v2016_v49 }
 0x6be   : > { %v1931_v11 = vpop.f32.mrf.mxu0 }
 0x6bf   : > { %v1932_v13 = vadd.f32 %v1931_v11, %v1903_v33  ;;  %v2183_v48 = vmul.f32 %v2171_v34, %v5656_v8 }
 0x6c1   : > { %v2173_v5 = vadd.f32 %v2152_v36, %v1932_v13  ;;  %v1963_v51 = vpop.f32.mrf.mxu2  ;;  %v2018_v37 = vpop.f32.mrf.mxu1 }
 0x6c2   : > { %v1989_v0 = vpop.f32.mrf.mxu3  ;;  %v1964_v41 = vadd.f32 %v1963_v51, %v7006_v14 }
 0x6c3   : > { %v2185_v31 = vmul.f32 %v2173_v5, %v5650_v61  ;;  %v1990_v35 = vadd.f32 %v1989_v0, %v1961_v53 }
 0x6c5   : > { %2212 = vrot.lane.b32.xlu0 %v2185_v31, %s5495_s6  ;;  %v2019_v55 = vadd.f32 %v2018_v37, %v1990_v35 }
 0x6c6   : > { %v1934_v2 = vpop.f32.mrf.mxu0 }
 0x6c7   : > { %v1935_v45 = vadd.f32 %v1934_v2, %v1906_v30  ;;  %v2174_v21 = vadd.f32 %v2153_v59, %v2019_v55 }
 0x6c9   : > { %v2176_v52 = vadd.f32 %v2154_v25, %v1935_v45  ;;  %v1966_v63 = vpop.f32.mrf.mxu2  ;;  %v2021_v26 = vpop.f32.mrf.mxu1  ;;  %v2186_v39 = vmul.f32 %v2174_v21, %v5656_v8 }
 0x6ca   : > { %v1992_v17 = vpop.f32.mrf.mxu3  ;;  %v1967_v9 = vadd.f32 %v1966_v63, %v7008_v3 }
 0x6cb   : > { %v2188_v32 = vmul.f32 %v2176_v52, %v5650_v61  ;;  %v1993_v28 = vadd.f32 %v1992_v17, %v1964_v41 }
 0x6cd   : > { %2218 = vrot.lane.b32.xlu1 %v2188_v32, %s5495_s6  ;;  %2208 = vrot.lane.b32.xlu0 %v2183_v48, %s5495_s6  ;;  %v2022_v20 = vadd.f32 %v2021_v26, %v1993_v28 }
 0x6ce   : > { %v1937_v23 = vpop.f32.mrf.mxu0 }
 0x6cf   : > { %v1938_v27 = vadd.f32 %v1937_v23, %v1909_v56  ;;  %v2177_v7 = vadd.f32 %v2155_v43, %v2022_v20 }
 0x6d1   : > { %v2179_v42 = vadd.f32 %v2156_v18, %v1938_v27  ;;  %v2073_v29 = vpop.f32.mrf.mxu2  ;;  %v2024_v54 = vpop.f32.mrf.mxu1  ;;  %v2189_v22 = vmul.f32 %v2177_v7, %v5656_v8 }
 0x6d2   : > { %v1995_v15 = vpop.f32.mrf.mxu3 }
 0x6d3   : > { %v2191_v12 = vmul.f32 %v2179_v42, %v5650_v61  ;;  %v1996_v6 = vadd.f32 %v1995_v15, %v1967_v9 }
 0x6d5   : > { %v2025_v57 = vadd.f32 %v2024_v54, %v1996_v6  ;;  %2214 = vrot.lane.b32.xlu1 %v2186_v39, %s5495_s6  ;;  %2224 = vrot.lane.b32.xlu2 %v2191_v12, %s5495_s6 }
 0x6d6   : > { %v2044_v46 = vpop.f32.mrf.mxu0 }
 0x6d7   : > { %v2180_v33 = vadd.f32 %v2157_v10, %v2025_v57  ;;  %v2045_v19 = vadd.f32 %v2044_v46, %v7018_v24 }
 0x6d9   : > { %v2192_v11 = vmul.f32 %v2180_v33, %v5656_v8  ;;  %v2074_v58 = vadd.f32 %v2073_v29, %v2045_v19  ;;  %v2076_v36 = vpop.f32.mrf.mxu2 }
 0x6da   : > { %v2102_v13 = vpop.f32.mrf.mxu3 }
 0x6db   : > { %v2103_v5 = vadd.f32 %v2102_v13, %v2074_v58  ;;  %2226 = vrot.lane.b32.xlu0 %v2192_v11, %s5495_s6 }
 0x6dd   : > { %v2172_v62 = vadd.f32 %v2131_v50, %v2103_v5  ;;  %2220 = vrot.lane.b32.xlu2 %v2189_v22, %s5495_s6 }
 0x6de   : > { %v2047_v51 = vpop.f32.mrf.mxu0 }
 0x6df   : > { %v2184_v60 = vmul.f32 %v2172_v62, %v5654_v4  ;;  %v2048_v0 = vadd.f32 %v2047_v51, %v7004_v1 }
 0x6e1   : > { %v2077_v49 = vadd.f32 %v2076_v36, %v2048_v0  ;;  %2210 = vrot.lane.b32.xlu1 %v2184_v60, %s5495_s6  ;;  %v2079_v37 = vpop.f32.mrf.mxu2 }
 0x6e2   : > { %v2105_v24 = vpop.f32.mrf.mxu3 }
 0x6e3   : > { %v2106_v31 = vadd.f32 %v2105_v24, %v2077_v49 }
 0x6e5   : > { %v2175_v30 = vadd.f32 %v7024_v47, %v2106_v31 }
 0x6e6   : > { %v2050_v53 = vpop.f32.mrf.mxu0 }
 0x6e7   : > { %v2187_v40 = vmul.f32 %v2175_v30, %v5654_v4  ;;  %v2051_v50 = vadd.f32 %v2050_v53, %v7006_v14  ;;  %v2652_v30 = vld [vmem:[%s8774_s4 + $0x70] sm:$0xff]  ;;  %v2651_v53 = vld [vmem:[%s8774_s4 + $0x68] sm:$0xff] }
 0x6e9   : > { %v2080_v2 = vadd.f32 %v2079_v37, %v2051_v50  ;;  %2216 = vrot.lane.b32.xlu0 %v2187_v40, %s5495_s6  ;;  %v2082_v25 = vpop.f32.mrf.mxu2  ;;  %v2653_v37 = vld [vmem:[%s8774_s4 + $0x78] sm:$0xff] }
 0x6ea   : > { %v2108_v34 = vpop.f32.mrf.mxu3 }
 0x6eb   : > { %v2109_v35 = vadd.f32 %v2108_v34, %v2080_v2  ;;  %v2650_v34 = vld [vmem:[%s8774_s4 + $0x60] sm:$0xff] }
 0x6ed   : > { %v2178_v1 = vadd.f32 %v7020_v38, %v2109_v35 }
 0x6ee   : > { %v2053_v45 = vpop.f32.mrf.mxu0 }
 0x6ef   : > { %v2190_v44 = vmul.f32 %v2178_v1, %v5654_v4  ;;  %v2054_v52 = vadd.f32 %v2053_v45, %v7008_v3 }
 0x6f1   : > { %v2083_v63 = vadd.f32 %v2082_v25, %v2054_v52  ;;  %2222 = vrot.lane.b32.xlu2 %v2190_v44, %s5495_s6 }
 0x6f2   : > { %v2111_v47 = vpop.f32.mrf.mxu3 }
 0x6f3   : > { %v2112_v17 = vadd.f32 %v2111_v47, %v2083_v63 }
 0x6f5   : > { %v2181_v14 = vadd.f32 %v7010_v16, %v2112_v17 }
 0x6f7   : > { %v2193_v48 = vmul.f32 %v2181_v14, %v5654_v4 }
 0x6f9   : > { %2228 = vrot.lane.b32.xlu1 %v2193_v48, %s5495_s6 }
 0x717   : > { %v2207_v55 = vpop.permute.xlu2 %2206 }
 0x718   : > { %2250 = vst.msk [vmem:[#allocation2] sm:$0xff] %vm493_vm10, %v2207_v55 }
 0x71f   : > { %v7086_v16 = vld [vmem:[#allocation2] sm:$0xff] }
 0x72f   : > { %v2225_v38 = vpop.permute.xlu2 %2224 }
 0x730   : > { %2259 = vst.msk [vmem:[#allocation2 + $0x48] sm:$0xff] %vm493_vm10, %v2225_v38 }
 0x737   : > { %v2213_v32 = vpop.permute.xlu0 %2212  ;;  %v2221_v59 = vpop.permute.xlu2 %2220  ;;  %v7141_v46 = vld [vmem:[#allocation2 + $0x48] sm:$0xff] }
 0x738   : > { %2253 = vst.msk [vmem:[#allocation2 + $0x18] sm:$0xff] %vm493_vm10, %v2213_v32 }
 0x73f   : > { %v2219_v3 = vpop.permute.xlu1 %2218  ;;  %v2209_v26 = vpop.permute.xlu0 %2208  ;;  %v7109_v18 = vld [vmem:[#allocation2 + $0x18] sm:$0xff] }
 0x740   : > { %2256 = vst.msk [vmem:[#allocation2 + $0x30] sm:$0xff] %vm493_vm10, %v2219_v3  ;;  %v7084_v56 = vsel %vm482_vm12, %v2207_v55, %v2209_v26  ;;  %v7126_v6 = vsel %vm482_vm12, %v2219_v3, %v2221_v59 }
 0x741   : > { %v7090_v41 = vpack.i.bf16 %v7084_v56, %v7086_v16 }
 0x743   : > { %4961 = vrot.lane.b32.xlu2 %v7090_v41, %s5493_s17  ;;  %4951 = vrot.lane.b32.xlu0 %v7090_v41, %s5492_s16 }
 0x744   : > { %4941 = vrot.lane.b32.xlu1 %v7090_v41, %s5491_s15 }
 0x747   : > { %v2215_v23 = vpop.permute.xlu1 %2214  ;;  %v7123_v12 = vld [vmem:[#allocation2 + $0x30] sm:$0xff] }
 0x748   : > { %v7107_v27 = vsel %vm482_vm12, %v2213_v32, %v2215_v23  ;;  %v5025_v54 = vpack.i.bf16 %v7126_v6, %v7123_v12 }
 0x749   : > { %v4970_v9 = vpack.i.bf16 %v7107_v27, %v7109_v18 }
 0x74b   : > { %v2223_v21 = vpop.permute.xlu2 %2222  ;;  %4966 = vrot.lane.b32.xlu2 %v7090_v41, %s5489_s13  ;;  %4956 = vrot.lane.b32.xlu0 %v7090_v41, %s5488_s12 }
 0x74c   : > { %v2235_v28 = vsel %vm482_vm12, %v2221_v59, %v2223_v21  ;;  %4946 = vrot.lane.b32.xlu1 %v7090_v41, %s5486_s10 }
 0x74d   : > { %2258 = vst.msk [vmem:[#allocation2 + $0x40] sm:$0xff] %vm496_vm11, %v2235_v28  ;;  %v2227_v42 = vpop.permute.xlu0 %2226 }
 0x74e   : > { %v7139_v10 = vsel %vm482_vm12, %v2225_v38, %v2227_v42 }
 0x74f   : > { %v5050_v7 = vpack.i.bf16 %v7139_v10, %v7141_v46 }
 0x753   : > { %v2211_v15 = vpop.permute.xlu1 %2210  ;;  %4971 = vrot.lane.b32.xlu2 %v4970_v9, %s5491_s15  ;;  %4991 = vrot.lane.b32.xlu0 %v4970_v9, %s5493_s17 }
 0x754   : > { %v2231_v29 = vsel %vm482_vm12, %v2209_v26, %v2211_v15  ;;  %4981 = vrot.lane.b32.xlu1 %v4970_v9, %s5492_s16  ;;  %v7163_v13 = vld [vmem:[#allocation2 + $0x40] sm:$0xff] }
 0x755   : > { %2252 = vst.msk [vmem:[#allocation2 + $0x10] sm:$0xff] %vm496_vm11, %v2231_v29 }
 0x75b   : > { %v2217_v39 = vpop.permute.xlu0 %2216  ;;  %4976 = vrot.lane.b32.xlu2 %v4970_v9, %s5486_s10  ;;  %4996 = vrot.lane.b32.xlu0 %v4970_v9, %s5489_s13 }
 0x75c   : > { %v2233_v20 = vsel %vm482_vm12, %v2215_v23, %v2217_v39  ;;  %4986 = vrot.lane.b32.xlu1 %v4970_v9, %s5488_s12  ;;  %v7150_v19 = vld [vmem:[#allocation2 + $0x10] sm:$0xff] }
 0x75d   : > { %2255 = vst.msk [vmem:[#allocation2 + $0x28] sm:$0xff] %vm496_vm11, %v2233_v20 }
 0x763   : > { %5001 = vrot.lane.b32.xlu0 %v4970_v9, %s5490_s14  ;;  %5016 = vrot.lane.b32.xlu2 %v5025_v54, %s5492_s16 }
 0x764   : > { %5026 = vrot.lane.b32.xlu1 %v5025_v54, %s5493_s17  ;;  %v7148_v33 = vld [vmem:[#allocation2 + $0x28] sm:$0xff] }
 0x765   : > { %v5085_v11 = vpack.i.bf16 %v7150_v19, %v7148_v33 }
 0x76b   : > { %v2229_v57 = vpop.permute.xlu1 %2228  ;;  %5021 = vrot.lane.b32.xlu2 %v5025_v54, %s5488_s12  ;;  %5006 = vrot.lane.b32.xlu0 %v5025_v54, %s5491_s15 }
 0x76c   : > { %v2237_v43 = vsel %vm482_vm12, %v2227_v42, %v2229_v57  ;;  %5031 = vrot.lane.b32.xlu1 %v5025_v54, %s5489_s13 }
 0x76d   : > { %2261 = vst.msk [vmem:[#allocation2 + $0x58] sm:$0xff] %vm496_vm11, %v2237_v43 }
 0x773   : > { %5036 = vrot.lane.b32.xlu2 %v5025_v54, %s5490_s14  ;;  %5011 = vrot.lane.b32.xlu0 %v5025_v54, %s5486_s10 }
 0x774   : > { %5051 = vrot.lane.b32.xlu1 %v5050_v7, %s5486_s10  ;;  %v7161_v58 = vld [vmem:[#allocation2 + $0x58] sm:$0xff] }
 0x775   : > { %v5110_v36 = vpack.i.bf16 %v7163_v13, %v7161_v58 }
 0x77b   : > { %5041 = vrot.lane.b32.xlu2 %v5050_v7, %s5491_s15  ;;  %5056 = vrot.lane.b32.xlu0 %v5050_v7, %s5492_s16 }
 0x77c   : > { %5086 = vrot.lane.b32.xlu1 %v5085_v11, %s5491_s15 }
 0x783   : > { %5046 = vrot.lane.b32.xlu2 %v7090_v41, %s5490_s14  ;;  %5061 = vrot.lane.b32.xlu0 %v5050_v7, %s5488_s12 }
 0x784   : > { %5091 = vrot.lane.b32.xlu1 %v5085_v11, %s5492_s16 }
 0x78b   : > { %5066 = vrot.lane.b32.xlu2 %v5050_v7, %s5493_s17  ;;  %5076 = vrot.lane.b32.xlu0 %v5050_v7, %s5490_s14 }
 0x78c   : > { %5111 = vrot.lane.b32.xlu1 %v5110_v36, %s5491_s15 }
 0x793   : > { %5071 = vrot.lane.b32.xlu2 %v5050_v7, %s5489_s13  ;;  %5106 = vrot.lane.b32.xlu0 %v5085_v11, %s5488_s12 }
 0x794   : > { %5116 = vrot.lane.b32.xlu1 %v5110_v36, %s5492_s16 }
 0x79b   : > { %5081 = vrot.lane.b32.xlu2 %v5050_v7, %s8820_s11  ;;  %5121 = vrot.lane.b32.xlu0 %v5110_v36, %s5486_s10 }
 0x79c   : > { %5136 = vrot.lane.b32.xlu1 %v5085_v11, %s5489_s13 }
 0x79d   : > { %v7176_v22 = vpop.permute.xlu2 %4961 }
 0x7a3   : > { %5096 = vrot.lane.b32.xlu2 %v5085_v11, %s5486_s10  ;;  %5126 = vrot.lane.b32.xlu0 %v5110_v36, %s5493_s17 }
 0x7a4   : > { %5151 = vrot.lane.b32.xlu1 %v5110_v36, %s5488_s12 }
 0x7a5   : > { %v7181_v5 = vpop.permute.xlu2 %4966 }
 0x7ab   : > { %5101 = vrot.lane.b32.xlu2 %v5085_v11, %s5493_s17  ;;  %5131 = vrot.lane.b32.xlu0 %v5025_v54, %s8820_s11 }
 0x7ac   : > { %5156 = vrot.lane.b32.xlu1 %v5110_v36, %s5489_s13 }
 0x7ad   : > { %v7186_v62 = vpop.permute.xlu2 %4971 }
 0x7ae   : > { %v8831_v55 = vunpack.i.h.bf16 %v7186_v62  ;;  %v4973_v38 = vunpack.i.l.bf16 %v7186_v62 }
 0x7b0   : > { %v2400_v21 = vsel %vm295_vm6, %v4973_v38, %v8831_v55 }
 0x7b3   : > { %5141 = vrot.lane.b32.xlu2 %v4970_v9, %s8820_s11  ;;  %5146 = vrot.lane.b32.xlu0 %v7090_v41, %s8820_s11 }
 0x7b4   : > { %5161 = vrot.lane.b32.xlu1 %v5110_v36, %s5490_s14 }
 0x7b5   : > { %v7192_v51 = vpop.permute.xlu0 %4951  ;;  %v7194_v60 = vpop.permute.xlu2 %4976 }
 0x7b6   : > { %v7196_v0 = vpop.permute.xlu1 %4941  ;;  %v8823_v57 = vunpack.i.h.bf16 %v7194_v60  ;;  %v4978_v43 = vunpack.i.l.bf16 %v7194_v60 }
 0x7b7   : > { %v8830_v41 = vunpack.i.h.bf16 %v7196_v0  ;;  %v4943_v59 = vunpack.i.l.bf16 %v7196_v0 }
 0x7b9   : > { %v2398_v28 = vsel %vm295_vm6, %v4943_v59, %v8830_v41 }
 0x7bb   : > { %5166 = vrot.lane.b32.xlu2 %v5110_v36, %s8820_s11  ;;  %5171 = vrot.lane.b32.xlu0 %v5085_v11, %s5490_s14 }
 0x7bc   : > { %5176 = vrot.lane.b32.xlu1 %v5085_v11, %s8820_s11  ;;  %s229_s11 = scalar_lea.vmem [#allocation3], %s228_s26 }
 0x7bd   : > { %v7201_v49 = vpop.permute.xlu0 %4956  ;;  %v7203_v24 = vpop.permute.xlu2 %5016  ;;  %s4193_s23 = sshll.u32 %s229_s11, 4  ;;  %s4194_s23 = int_to_ptr.vmem [resolvable:$true] %s4193_s23 }
 0x7be   : > { %v7205_v31 = vpop.permute.xlu1 %4946 }
 0x7bf   : > { %v8822_v11 = vunpack.i.h.bf16 %v7205_v31  ;;  %v4948_v36 = vunpack.i.l.bf16 %v7205_v31 }
 0x7c3   : > { %2671 = vperm.xlu2 %4458, %v2653_v37   ;;  %2666 = vperm.xlu0 %4579, %v2652_v30  }
 0x7c4   : > { %2661 = vperm.xlu1 %4457, %v2651_v53  }
 0x7c5   : > { %v7216_v40 = vpop.permute.xlu0 %4991  ;;  %v7218_v50 = vpop.permute.xlu2 %5021 }
 0x7c6   : > { %v7220_v2 = vpop.permute.xlu1 %4981 }
 0x7cb   : > { %2656 = vperm.xlu2 %4458, %v2650_v34   ;;  %v2576_v34 = vsel %vm343_vm2, %v4978_v43, %v8823_v57 }
 0x7cd   : > { %v7225_v35 = vpop.permute.xlu0 %4996  ;;  %v7227_v1 = vpop.permute.xlu2 %5036 }
 0x7ce   : > { %v7229_v45 = vpop.permute.xlu1 %4986 }
 0x7cf   : > { %v4988_v41 = vunpack.i.l.bf16 %v7229_v45 }
 0x7d5   : > { %v7231_v25 = vpop.permute.xlu0 %5001  ;;  %v7233_v44 = vpop.permute.xlu2 %5041 }
 0x7d6   : > { %v7235_v52 = vpop.permute.xlu1 %5026  ;;  %v8833_v63 = vunpack.i.h.bf16 %v7233_v44  ;;  %v5043_v47 = vunpack.i.l.bf16 %v7233_v44 }
 0x7d8   : > { %v2404_v17 = vsel %vm295_vm6, %v5043_v47, %v8833_v63  ;;  %v8828_v47 = vunpack.i.h.bf16 %v7203_v24  ;;  %v4964_v63 = vunpack.i.h.bf16 %v7176_v22 }
 0x7d9   : > { %2686 = vmatpush.msra.mxu1 %v2404_v17  ;;  %v5018_v17 = vunpack.i.l.bf16 %v7203_v24 }
 0x7dd   : > { %v7242_v14 = vpop.permute.xlu0 %5006  ;;  %v7244_v48 = vpop.permute.xlu2 %5046 }
 0x7de   : > { %v7248_v32 = vpop.permute.xlu1 %5031  ;;  %v8832_v3 = vunpack.i.h.bf16 %v7242_v14  ;;  %v5008_v26 = vunpack.i.l.bf16 %v7242_v14 }
 0x7e0   : > { %v2402_v23 = vsel %vm295_vm6, %v5008_v26, %v8832_v3 }
 0x7e1   : > { %2687 = vmatpush.msra.mxu1 %v2402_v23  ;;  %v8826_v23 = vunpack.i.h.bf16 %v7192_v51 }
 0x7e3   : > { %2688 = vmatpush.msra.mxu1 %v2400_v21  ;;  %v2574_v21 = vsel %vm343_vm2, %v4948_v36, %v8822_v11  ;;  %v5029_v11 = vunpack.i.h.bf16 %v7235_v52 }
 0x7e5   : > { %v7263_v9 = vpop.permute.xlu0 %5011  ;;  %v7265_v42 = vpop.permute.xlu2 %5066  ;;  %2689 = vmatpush.msra.mxu1 %v2398_v28  ;;  %v4953_v28 = vunpack.i.l.bf16 %v7192_v51 }
 0x7e6   : > { %v7267_v15 = vpop.permute.xlu1 %5051  ;;  %v8824_v20 = vunpack.i.h.bf16 %v7263_v9  ;;  %v5013_v54 = vunpack.i.l.bf16 %v7263_v9  ;;  %v5068_v36 = vunpack.i.l.bf16 %v7265_v42 }
 0x7e7   : > { %v8825_v29 = vunpack.i.h.bf16 %v7267_v15  ;;  %v5053_v39 = vunpack.i.l.bf16 %v7267_v15 }
 0x7e8   : > { %v2578_v37 = vsel %vm343_vm2, %v5013_v54, %v8824_v20  ;;  %v4983_v54 = vunpack.i.l.bf16 %v7220_v2 }
 0x7e9   : > { %v2580_v7 = vsel %vm343_vm2, %v5053_v39, %v8825_v29  ;;  %v8827_v39 = vunpack.i.h.bf16 %v7220_v2 }
 0x7ea   : > { %2715 = vmatpush.msra.mxu0 %v2580_v7  ;;  %v2358_v7 = vsel %vm283_vm7, %v5018_v17, %v8828_v47  ;;  %v5028_v17 = vunpack.i.l.bf16 %v7235_v52  ;;  %v4993_v47 = vunpack.i.l.bf16 %v7216_v40  ;;  %v8955_v52 = vunpack.i.h.bf16 %v7229_v45 }
 0x7ec   : > { %2716 = vmatpush.msra.mxu0 %v2578_v37  ;;  %v8836_v37 = vunpack.i.h.bf16 %v7265_v42 }
 0x7ed   : > { %v7283_v30 = vpop.permute.xlu0 %5056  ;;  %v7285_v53 = vpop.permute.xlu2 %5071 }
 0x7ee   : > { %v7292_v38 = vpop.permute.xlu1 %5086  ;;  %v8829_v26 = vunpack.i.h.bf16 %v7283_v30  ;;  %v5058_v59 = vunpack.i.l.bf16 %v7283_v30  ;;  %2717 = vmatpush.msra.mxu0 %v2576_v34  ;;  %v2356_v34 = vsel %vm283_vm7, %v4983_v54, %v8827_v39  ;;  %v4963_v39 = vunpack.i.l.bf16 %v7176_v22 }
 0x7ef   : > { %v8956_v22 = vunpack.i.h.bf16 %v7201_v49 }
 0x7f0   : > { %2718 = vmatpush.msra.mxu0 %v2574_v21  ;;  %v2360_v43 = vsel %vm283_vm7, %v5058_v59, %v8829_v26  ;;  %v2354_v21 = vsel %vm283_vm7, %v4953_v28, %v8826_v23  ;;  %v8837_v59 = vunpack.i.h.bf16 %v7218_v50  ;;  %v4958_v26 = vunpack.i.l.bf16 %v7201_v49 }
 0x7f1   : > { %2690 = vmatpush.msra.mxu1 %v2360_v43  ;;  %v5023_v43 = vunpack.i.l.bf16 %v7218_v50 }
 0x7f3   : > { %2691 = vmatpush.msra.mxu1 %v2358_v7 }
 0x7f5   : > { %v7321_v7 = vpop.permute.xlu0 %5061  ;;  %v7323_v57 = vpop.permute.xlu2 %5081  ;;  %2692 = vmatpush.msra.mxu1 %v2356_v34  ;;  %v2316_v34 = vsel %vm271_vm8, %v5068_v36, %v8836_v37  ;;  %v2314_v36 = vsel %vm271_vm8, %v5028_v17, %v5029_v11 }
 0x7f6   : > { %v7325_v20 = vpop.permute.xlu1 %5091  ;;  %v8834_v54 = vunpack.i.h.bf16 %v7321_v7  ;;  %v5063_v29 = vunpack.i.l.bf16 %v7321_v7  ;;  %v8835_v28 = vunpack.i.h.bf16 %v7323_v57  ;;  %v5083_v23 = vunpack.i.l.bf16 %v7323_v57 }
 0x7f7   : > { %2693 = vmatpush.msra.mxu1 %v2354_v21  ;;  %v8838_v21 = vunpack.i.h.bf16 %v7201_v49 }
 0x7f8   : > { %v2536_v55 = vsel %vm331_vm3, %v5063_v29, %v8834_v54  ;;  %v2624_v3 = vsel %vm355_vm1, %v5083_v23, %v8835_v28  ;;  %v2534_v29 = vsel %vm331_vm3, %v5023_v43, %v8837_v59  ;;  %v8839_v23 = vunpack.i.h.bf16 %v7285_v53 }
 0x7f9   : > { %2694 = vmatpush.msra.mxu1 %v2316_v34  ;;  %2719 = vmatpush.msra.mxu0 %v2536_v55  ;;  %v5073_v34 = vunpack.i.l.bf16 %v7285_v53  ;;  %v8936_v55 = vunpack.i.h.bf16 %v7216_v40  ;;  %v5034_v43 = vunpack.i.h.bf16 %v7248_v32 }
 0x7fa   : > { %2756 = vmatpush.msra.mxu2 %v2624_v3  ;;  %v8937_v3 = vunpack.i.h.bf16 %v7229_v45  ;;  %v7596_v45 = vld [vmem:[%s8773_s3 + $0x158] sm:$0xff] }
 0x7fb   : > { %2695 = vmatpush.msra.mxu1 %v2314_v36  ;;  %2720 = vmatpush.msra.mxu0 %v2534_v29  ;;  %v2312_v54 = vsel %vm271_vm8, %v4993_v47, %v8936_v55  ;;  %v5033_v36 = vunpack.i.l.bf16 %v7248_v32  ;;  %v2310_v47 = vsel %vm271_vm8, %v4963_v39, %v4964_v63  ;;  %v2492_v59 = vsel %vm319_vm4, %v5073_v34, %v8839_v23  ;;  %v7639_v32 = vld [vmem:[%s8773_s3 + $0x170] sm:$0xff] }
 0x7fc   : > { %v2532_v28 = vsel %vm331_vm3, %v4988_v41, %v8937_v3  ;;  %v2530_v41 = vsel %vm331_vm3, %v4958_v26, %v8838_v21  ;;  %v8841_v39 = vunpack.i.l.bf16 %v7292_v38  ;;  %v8938_v26 = vunpack.i.h.bf16 %v7233_v44 }
 0x7fd   : > { %v7362_v37 = vpop.permute.xlu0 %5076  ;;  %v7364_v17 = vpop.permute.xlu2 %5096  ;;  %2696 = vmatpush.msra.mxu1 %v2312_v54  ;;  %2721 = vmatpush.msra.mxu0 %v2532_v28  ;;  %v4999_v54 = vunpack.i.h.bf16 %v7225_v35  ;;  %v4998_v28 = vunpack.i.l.bf16 %v7225_v35  ;;  %v4968_v21 = vunpack.i.l.bf16 %v7181_v5  ;;  %v2490_v34 = vsel %vm319_vm4, %v5033_v36, %v5034_v43 }
 0x7fe   : > { %v7368_v29 = vpop.permute.xlu1 %5111  ;;  %v8843_v23 = vunpack.i.h.bf16 %v7292_v38 }
 0x7ff   : > { %v8842_v55 = vunpack.i.h.bf16 %v7368_v29  ;;  %v8840_v3 = vunpack.i.l.bf16 %v7368_v29  ;;  %2697 = vmatpush.msra.mxu1 %v2310_v47  ;;  %2722 = vmatpush.msra.mxu0 %v2530_v41  ;;  %v4969_v41 = vunpack.i.h.bf16 %v7181_v5  ;;  %v2488_v36 = vsel %vm319_vm4, %v4998_v28, %v4999_v54 }
 0x800   : > { %v8851_v28 = vunpack.i.h.bf16 %v7227_v1 }
 0x801   : > { %2698 = vmatpush.msra.mxu1 %v7141_v46  ;;  %2723 = vmatpush.msra.mxu0 %v2492_v59  ;;  %v2405_v47 = vsel %vm295_vm6, %v8938_v26, %v8840_v3  ;;  %v8939_v46 = vunpack.i.h.bf16 %v7242_v14  ;;  %v8855_v59 = vunpack.i.h.bf16 %v7362_v37  ;;  %v5078_v26 = vunpack.i.l.bf16 %v7362_v37 }
 0x802   : > { %2773 = vmatpush.msra.mxu3 %v2405_v47 }
 0x803   : > { %2699 = vmatpush.msra.mxu1 %v7123_v12  ;;  %2724 = vmatpush.msra.mxu0 %v2490_v34  ;;  %v2403_v44 = vsel %vm295_vm6, %v8939_v46, %v8842_v55  ;;  %v8940_v12 = vunpack.i.h.bf16 %v7186_v62  ;;  %v7420_v34 = vld [vmem:[%s8773_s3 + $0x120] sm:$0xff]  ;;  %v5038_v46 = vunpack.i.l.bf16 %v7227_v1  ;;  %v8849_v55 = vunpack.i.h.bf16 %v7231_v25 }
 0x804   : > { %2774 = vmatpush.msra.mxu3 %v2403_v44 }
 0x805   : > { %v7407_v47 = vpop.permute.xlu0 %5106  ;;  %v7409_v3 = vpop.permute.xlu2 %5101  ;;  %2700 = vmatpush.msra.mxu1 %v7109_v18  ;;  %2725 = vmatpush.msra.mxu0 %v2488_v36  ;;  %v2401_v14 = vsel %vm295_vm6, %v8940_v12, %v8841_v39  ;;  %v2486_v18 = vsel %vm319_vm4, %v4968_v21, %v4969_v41  ;;  %v8941_v12 = vunpack.i.h.bf16 %v7196_v0  ;;  %v2448_v21 = vsel %vm307_vm5, %v5078_v26, %v8855_v59 }
 0x806   : > { %v7424_v44 = vpop.permute.xlu1 %5116  ;;  %2775 = vmatpush.msra.mxu3 %v2401_v14  ;;  %v5003_v14 = vunpack.i.l.bf16 %v7231_v25  ;;  %v8942_v0 = vunpack.i.h.bf16 %v7283_v30  ;;  %v8847_v26 = vunpack.i.h.bf16 %v7325_v20 }
 0x807   : > { %v8846_v62 = vunpack.i.h.bf16 %v7424_v44  ;;  %v8844_v36 = vunpack.i.l.bf16 %v7424_v44  ;;  %2701 = vmatpush.msra.mxu1 %v7086_v16  ;;  %2726 = vmatpush.msra.mxu0 %v2486_v18  ;;  %v2399_v39 = vsel %vm295_vm6, %v8941_v12, %v8843_v23  ;;  %v8845_v16 = vunpack.i.l.bf16 %v7325_v20 }
 0x808   : > { %2776 = vmatpush.msra.mxu3 %v2399_v39  ;;  %2702 = vmatmul.f32.vlgmr.msra.gmra.mxu1 %v7420_v34  ;;  %v8848_v12 = vunpack.i.h.bf16 %v7244_v48  ;;  %v5048_v23 = vunpack.i.l.bf16 %v7244_v48  ;;  %v2446_v39 = vsel %vm307_vm5, %v5038_v46, %v8851_v28  ;;  %v8944_v46 = vunpack.i.h.bf16 %v7220_v2  ;;  %v7487_v2 = vld [vmem:[%s8773_s3 + $0x128] sm:$0xff] }
 0x809   : > { %2727 = vmatpush.msra.mxu0 %v2448_v21  ;;  %v2361_v18 = vsel %vm283_vm7, %v8942_v0, %v8844_v36  ;;  %v8943_v21 = vunpack.i.h.bf16 %v7203_v24  ;;  %v2444_v0 = vsel %vm307_vm5, %v5003_v14, %v8849_v55  ;;  %v7475_v24 = vld [vmem:[%s8773_s3 + $0x138] sm:$0xff]  ;;  %v5103_v28 = vunpack.i.l.bf16 %v7409_v3 }
 0x80a   : > { %2777 = vmatpush.msra.mxu3 %v2361_v18 }
 0x80b   : > { %2728 = vmatpush.msra.mxu0 %v2446_v39  ;;  %v2359_v30 = vsel %vm283_vm7, %v8943_v21, %v8846_v62  ;;  %v2357_v39 = vsel %vm283_vm7, %v8944_v46, %v8845_v16  ;;  %v8945_v46 = vunpack.i.h.bf16 %v7192_v51  ;;  %v8850_v62 = vunpack.i.l.bf16 %v7364_v17 }
 0x80c   : > { %2778 = vmatpush.msra.mxu3 %v2359_v30  ;;  %v8947_v51 = vunpack.i.h.bf16 %v7263_v9 }
 0x80d   : > { %v7463_v36 = vpop.permute.xlu0 %5121  ;;  %v7465_v18 = vpop.permute.xlu2 %5141  ;;  %2729 = vmatpush.msra.mxu0 %v2444_v0  ;;  %v2442_v0 = vsel %vm307_vm5, %v5048_v23, %v8848_v12  ;;  %v2355_v16 = vsel %vm283_vm7, %v8945_v46, %v8847_v26  ;;  %v8946_v23 = vunpack.i.h.bf16 %v7267_v15 }
 0x80e   : > { %v8853_v21 = vunpack.i.h.bf16 %v7463_v36  ;;  %v8854_v14 = vunpack.i.l.bf16 %v7463_v36  ;;  %v7479_v30 = vpop.permute.xlu1 %5136  ;;  %2779 = vmatpush.msra.mxu3 %v2357_v39  ;;  %v8959_v5 = vunpack.i.l.bf16 %v7463_v36 }
 0x80f   : > { %2730 = vmatpush.msra.mxu0 %v2442_v0  ;;  %v8852_v0 = vunpack.i.h.bf16 %v7364_v17 }
 0x810   : > { %2780 = vmatpush.msra.mxu3 %v2355_v16  ;;  %2705 = vmatmul.f32.gmra.mxu1 %v7475_v24  ;;  %v2581_v39 = vsel %vm343_vm2, %v8946_v23, %v8854_v14  ;;  %v2579_v46 = vsel %vm343_vm2, %v8947_v51, %v8853_v21  ;;  %v8948_v16 = vunpack.i.h.bf16 %v7194_v60  ;;  %v5108_v14 = vunpack.i.l.bf16 %v7407_v47 }
 0x811   : > { %2731 = vmatmul.f32.vlgmr.msra.gmra.mxu0 %v7487_v2  ;;  %2802 = vmatpush.msrb.mxu1 %v2581_v39  ;;  %v7520_v39 = vld [vmem:[%s8773_s3 + $0x150] sm:$0xff] }
 0x812   : > { %v2577_v15 = vsel %vm343_vm2, %v8948_v16, %v8850_v62  ;;  %v8949_v16 = vunpack.i.h.bf16 %v7205_v31  ;;  %v8950_v31 = vunpack.i.h.bf16 %v7265_v42  ;;  %v8856_v42 = vunpack.i.h.bf16 %v7409_v3 }
 0x813   : > { %2803 = vmatpush.msrb.mxu1 %v2579_v46 }
 0x814   : > { %v2575_v12 = vsel %vm343_vm2, %v8949_v16, %v8852_v0  ;;  %v8951_v0 = vunpack.i.h.bf16 %v7323_v57 }
 0x815   : > { %v7513_v26 = vpop.permute.xlu0 %5126  ;;  %v7515_v23 = vpop.permute.xlu2 %5166  ;;  %2804 = vmatpush.msrb.mxu1 %v2577_v15  ;;  %v7535_v15 = vld [vmem:[%s8773_s3 + $0x140] sm:$0xff] }
 0x816   : > { %v5129_v9 = vunpack.i.h.bf16 %v7513_v26  ;;  %v5128_v51 = vunpack.i.l.bf16 %v7513_v26  ;;  %v7524_v46 = vpop.permute.xlu1 %5151  ;;  %v5168_v60 = vunpack.i.l.bf16 %v7515_v23 }
 0x817   : > { %v5154_v55 = vunpack.i.h.bf16 %v7524_v46  ;;  %v5153_v62 = vunpack.i.l.bf16 %v7524_v46  ;;  %2805 = vmatpush.msrb.mxu1 %v2575_v12  ;;  %v8952_v12 = vunpack.i.h.bf16 %v7321_v7 }
 0x818   : > { %2708 = vmatmul.f32.gmra.mxu1 %v7520_v39  ;;  %v2317_v16 = vsel %vm271_vm8, %v8950_v31, %v5128_v51  ;;  %v2625_v21 = vsel %vm355_vm1, %v8951_v0, %v5168_v60  ;;  %v2315_v57 = vsel %vm271_vm8, %v5029_v11, %v5129_v9  ;;  %v5109_v0 = vunpack.i.h.bf16 %v7407_v47 }
 0x819   : > { %2734 = vmatmul.f32.gmra.mxu0 %v7535_v15  ;;  %2781 = vmatpush.msra.mxu3 %v2317_v16  ;;  %v2537_v59 = vsel %vm331_vm3, %v8952_v12, %v5153_v62  ;;  %v8953_v31 = vunpack.i.h.bf16 %v7218_v50  ;;  %v2533_v11 = vsel %vm331_vm3, %v8955_v52, %v5108_v14  ;;  %v5169_v12 = vunpack.i.h.bf16 %v7515_v23 }
 0x81a   : > { %2806 = vmatpush.msrb.mxu1 %v2537_v59  ;;  %2843 = vmatpush.msrb.mxu0 %v2625_v21  ;;  %v8954_v59 = vunpack.i.h.bf16 %v7216_v40  ;;  %v2311_v40 = vsel %vm271_vm8, %v4964_v63, %v8856_v42  ;;  %v2531_v63 = vsel %vm331_vm3, %v8956_v22, %v5109_v0  ;;  %v8974_v47 = vunpack.i.h.bf16 %v7409_v3 }
 0x81b   : > { %2782 = vmatpush.msra.mxu3 %v2315_v57  ;;  %v2535_v7 = vsel %vm331_vm3, %v8953_v31, %v5154_v55 }
 0x81c   : > { %2807 = vmatpush.msrb.mxu1 %v2535_v7  ;;  %v2313_v21 = vsel %vm271_vm8, %v8954_v59, %v5103_v28  ;;  %v7591_v7 = vld [vmem:[%s8773_s3 + $0x168] sm:$0xff]  ;;  %v5144_v59 = vunpack.i.h.bf16 %v7465_v18 }
 0x81d   : > { %v5132_v16 = vpop.permute.xlu0 %5131  ;;  %2783 = vmatpush.msra.mxu3 %v2313_v21  ;;  %v5143_v21 = vunpack.i.l.bf16 %v7465_v18  ;;  %v8957_v18 = vunpack.i.h.bf16 %v7285_v53  ;;  %v7774_v3 = vpop.permute.xlu2 %2671 }
 0x81e   : > { %v5134_v50 = vunpack.i.h.bf16 %v5132_v16  ;;  %v5133_v57 = vunpack.i.l.bf16 %v5132_v16  ;;  %v7581_v31 = vpop.permute.xlu1 %5156  ;;  %2808 = vmatpush.msrb.mxu1 %v2533_v11 }
 0x81f   : > { %v5158_v16 = vunpack.i.l.bf16 %v7581_v31  ;;  %2784 = vmatpush.msra.mxu3 %v2311_v40  ;;  %v5159_v52 = vunpack.i.h.bf16 %v7581_v31  ;;  %v5138_v40 = vunpack.i.l.bf16 %v7479_v30 }
 0x820   : > { %2809 = vmatpush.msrb.mxu1 %v2531_v63  ;;  %v2622_v11 = vsel %vm355_vm1, %v5133_v57, %v5134_v50  ;;  %v2623_v42 = vsel %vm355_vm1, %v5134_v50, %v5169_v12  ;;  %v2620_v57 = vsel %vm355_vm1, %v5143_v21, %v5144_v59  ;;  %v5139_v50 = vunpack.i.h.bf16 %v7479_v30 }
 0x821   : > { %2711 = vmatmul.f32.gmra.mxu1 %v7591_v7  ;;  %2737 = vmatmul.f32.gmra.mxu0 %v7596_v45  ;;  %v2493_v49 = vsel %vm319_vm4, %v8957_v18, %v5158_v16  ;;  %v2491_v53 = vsel %vm319_vm4, %v5034_v43, %v5159_v52  ;;  %v8962_v18 = vunpack.i.h.bf16 %v7227_v1  ;;  %v8966_v1 = vunpack.i.l.bf16 %v7292_v38 }
 0x822   : > { %2757 = vmatpush.msra.mxu2 %v2622_v11  ;;  %2785 = vmatpush.msra.mxu3 %v7139_v10 }
 0x823   : > { %2810 = vmatpush.msrb.mxu1 %v2493_v49  ;;  %2844 = vmatpush.msrb.mxu0 %v2623_v42  ;;  %v8958_v42 = vunpack.i.h.bf16 %v7362_v37  ;;  %v8961_v37 = vunpack.i.h.bf16 %v7463_v36  ;;  %v8965_v36 = vunpack.i.h.bf16 %v7231_v25  ;;  %v8968_v25 = vunpack.i.h.bf16 %v7292_v38 }
 0x824   : > { %2758 = vmatpush.msra.mxu2 %v2620_v57  ;;  %2786 = vmatpush.msra.mxu3 %v7126_v6  ;;  %v2489_v6 = vsel %vm319_vm4, %v4999_v54, %v5138_v40  ;;  %v8971_v38 = vunpack.i.h.bf16 %v7424_v44 }
 0x825   : > { %2811 = vmatpush.msrb.mxu1 %v2491_v53  ;;  %v5147_v22 = vpop.permute.xlu0 %5146 }
 0x826   : > { %v5149_v63 = vunpack.i.h.bf16 %v5147_v22  ;;  %v5148_v11 = vunpack.i.l.bf16 %v5147_v22  ;;  %v7628_v10 = vpop.permute.xlu1 %5161  ;;  %2787 = vmatpush.msra.mxu3 %v7107_v27  ;;  %v2487_v27 = vsel %vm319_vm4, %v4969_v41, %v5139_v50  ;;  %v8960_v41 = vunpack.i.l.bf16 %v7368_v29 }
 0x827   : > { %v5163_v43 = vunpack.i.l.bf16 %v7628_v10  ;;  %2812 = vmatpush.msrb.mxu1 %v2489_v6  ;;  %v5164_v54 = vunpack.i.h.bf16 %v7628_v10  ;;  %v8964_v6 = vunpack.i.l.bf16 %v7364_v17 }
 0x828   : > { %2788 = vmatpush.msra.mxu3 %v7084_v56  ;;  %v2618_v35 = vsel %vm355_vm1, %v5148_v11, %v5149_v63  ;;  %v7659_v56 = vld [vmem:[%s8773_s3 + $0x130] sm:$0xff]  ;;  %v8963_v11 = vunpack.i.h.bf16 %v7368_v29  ;;  %v2643_v29 = vld [vmem:[%s8773_s3 + $0x148] sm:$0xff] }
 0x829   : > { %2813 = vmatpush.msrb.mxu1 %v2487_v27  ;;  %2740 = vmatmul.f32.gmra.mxu0 %v7639_v32  ;;  %v2449_v21 = vsel %vm307_vm5, %v8958_v42, %v5163_v43  ;;  %v2447_v49 = vsel %vm307_vm5, %v8962_v18, %v5164_v54 }
 0x82a   : > { %2789 = vmatmul.f32.vlgmr.msra.gmra.mxu3 %v7420_v34  ;;  %2759 = vmatpush.msra.mxu2 %v2618_v35 }
 0x82b   : > { %2889 = vmatpush.msrb.mxu3 %v8959_v5  ;;  %2814 = vmatpush.msrb.mxu1 %v2449_v21  ;;  %v8967_v5 = vunpack.i.h.bf16 %v7364_v17  ;;  %v8969_v17 = vunpack.i.l.bf16 %v7424_v44  ;;  %v8973_v44 = vunpack.i.h.bf16 %v7325_v20 }
 0x82c   : > { %4304 = vmatmul.msk.f32.vlgmr.msra.gmra.mxu2 %vm1840_vm14, %v7659_v56 }
 0x82d   : > { %2860 = vmatpush.msrb.mxu2 %v8960_v41  ;;  %2890 = vmatpush.msrb.mxu3 %v8961_v37  ;;  %v5172_v57 = vpop.permute.xlu0 %5171 }
 0x82e   : > { %2815 = vmatpush.msrb.mxu1 %v2447_v49  ;;  %v5173_v53 = vunpack.i.l.bf16 %v5172_v57  ;;  %v5177_v22 = vpop.permute.xlu1 %5176  ;;  %v5174_v42 = vunpack.i.h.bf16 %v5172_v57 }
 0x82f   : > { %2861 = vmatpush.msrb.mxu2 %v8963_v11  ;;  %2891 = vmatpush.msrb.mxu3 %v8964_v6  ;;  %v5178_v27 = vunpack.i.l.bf16 %v5177_v22  ;;  %v5179_v21 = vunpack.i.h.bf16 %v5177_v22 }
 0x830   : > { %v2445_v35 = vsel %vm307_vm5, %v8965_v36, %v5173_v53 }
 0x831   : > { %2862 = vmatpush.msrb.mxu2 %v8966_v1  ;;  %2892 = vmatpush.msrb.mxu3 %v8967_v5  ;;  %v2621_v41 = vsel %vm355_vm1, %v5144_v59, %v5178_v27  ;;  %v8970_v59 = vunpack.i.h.bf16 %v7244_v48  ;;  %v2619_v18 = vsel %vm355_vm1, %v5149_v63, %v5179_v21  ;;  %v8972_v48 = vunpack.i.l.bf16 %v7325_v20  ;;  %v2649_v20 = vld [vmem:[%s8773_s3 + $0x178] sm:$0xff] }
 0x832   : > { %2792 = vmatmul.f32.gmra.mxu3 %v7475_v24  ;;  %2816 = vmatpush.msrb.mxu1 %v2445_v35 }
 0x833   : > { %2863 = vmatpush.msrb.mxu2 %v8968_v25  ;;  %2893 = vmatpush.msrb.mxu3 %v5153_v62  ;;  %v2443_v37 = vsel %vm307_vm5, %v8970_v59, %v5174_v42  ;;  %v2657_v62 = vpop.permute.xlu2 %2656 }
 0x834   : > { %2845 = vmatpush.msrb.mxu0 %v2621_v41  ;;  %4305 = vmatmul.msk.f32.gmra.mxu2 %vm1840_vm14, %v2643_v29 }
 0x835   : > { %2864 = vmatpush.msrb.mxu2 %v8969_v17  ;;  %2894 = vmatpush.msrb.mxu3 %v5154_v55  ;;  %v2646_v55 = vld [vmem:[%s8773_s3 + $0x160] sm:$0xff] }
 0x836   : > { %2817 = vmatpush.msrb.mxu1 %v2443_v37  ;;  %2846 = vmatpush.msrb.mxu0 %v2619_v18 }
 0x837   : > { %2818 = vmatmul.f32.vlgmr.msrb.gmra.mxu1 %v7487_v2  ;;  %2865 = vmatpush.msrb.mxu2 %v8971_v38 }
 0x838   : > { %2895 = vmatpush.msrb.mxu3 %v5108_v14  ;;  %2930 = vmatpush.msra.mxu1 %v5168_v60 }
 0x839   : > { %4308 = vmatmul.msk.f32.vlgmr.msrb.gmra.mxu0 %vm1840_vm14, %v7659_v56  ;;  %2866 = vmatpush.msrb.mxu2 %v8972_v48 }
 0x83a   : > { %2896 = vmatpush.msrb.mxu3 %v5109_v0  ;;  %2931 = vmatpush.msra.mxu1 %v5169_v12 }
 0x83b   : > { %2795 = vmatmul.f32.gmra.mxu3 %v7520_v39  ;;  %2867 = vmatpush.msrb.mxu2 %v8973_v44 }
 0x83c   : > { %2897 = vmatpush.msrb.mxu3 %v5158_v16  ;;  %2932 = vmatpush.msra.mxu1 %v5178_v27 }
 0x83d   : > { %4306 = vmatmul.msk.f32.gmra.mxu2 %vm1840_vm14, %v2646_v55 }
 0x83e   : > { %2868 = vmatpush.msrb.mxu2 %v5128_v51  ;;  %2898 = vmatpush.msrb.mxu3 %v5159_v52  ;;  %v2662_v51 = vpop.permute.xlu1 %2661 }
 0x83f   : > { %2933 = vmatpush.msra.mxu1 %v5179_v21 }
 0x840   : > { %2821 = vmatmul.f32.gmra.mxu1 %v7535_v15  ;;  %2869 = vmatpush.msrb.mxu2 %v5129_v9 }
 0x841   : > { %2899 = vmatpush.msrb.mxu3 %v5138_v40  ;;  %4309 = vmatmul.msk.f32.gmra.mxu0 %vm1840_vm14, %v2643_v29  ;;  %v2667_v40 = vpop.permute.xlu0 %2666 }
 0x842   : > { %2870 = vmatpush.msrb.mxu2 %v5103_v28 }
 0x843   : > { %2900 = vmatpush.msrb.mxu3 %v5139_v50 }
 0x844   : > { %2798 = vmatmul.f32.gmra.mxu3 %v7591_v7  ;;  %2871 = vmatpush.msrb.mxu2 %v8974_v47 }
 0x845   : > { %2901 = vmatpush.msrb.mxu3 %v5163_v43  ;;  %4307 = vmatmul.msk.f32.gmra.mxu2 %vm1840_vm14, %v2649_v20 }
 0x846   : > { %2872 = vmatpush.msrb.mxu2 %v7161_v58 }
 0x847   : > { %2902 = vmatpush.msrb.mxu3 %v5164_v54 }
 0x848   : > { %2824 = vmatmul.f32.gmra.mxu1 %v7596_v45  ;;  %2873 = vmatpush.msrb.mxu2 %v7163_v13 }
 0x849   : > { %2903 = vmatpush.msrb.mxu3 %v5173_v53  ;;  %4310 = vmatmul.msk.f32.gmra.mxu0 %vm1840_vm14, %v2646_v55 }
 0x84a   : > { %2874 = vmatpush.msrb.mxu2 %v7148_v33 }
 0x84b   : > { %2904 = vmatpush.msrb.mxu3 %v5174_v42 }
 0x84c   : > { %2875 = vmatpush.msrb.mxu2 %v7150_v19  ;;  %2905 = vmatmul.f32.vlgmr.msrb.gmra.mxu3 %v7487_v2 }
 0x84d   : > { %2876 = vmatmul.f32.vlgmr.msrb.gmra.mxu2 %v7420_v34 }
 0x850   : > { %2827 = vmatmul.f32.gmra.mxu1 %v7639_v32 }
 0x851   : > { %4311 = vmatmul.msk.f32.gmra.mxu0 %vm1840_vm14, %v2649_v20 }
 0x854   : > { %2908 = vmatmul.f32.gmra.mxu3 %v7535_v15 }
 0x855   : > { %2879 = vmatmul.f32.gmra.mxu2 %v7475_v24 }
 0x858   : > { %4312 = vmatmul.msk.f32.vlgmr.msra.gmra.mxu1 %vm1840_vm14, %v7659_v56 }
 0x85c   : > { %2911 = vmatmul.f32.gmra.mxu3 %v7596_v45 }
 0x85d   : > { %2882 = vmatmul.f32.gmra.mxu2 %v7520_v39 }
 0x860   : > { %4313 = vmatmul.msk.f32.gmra.mxu1 %vm1840_vm14, %v2643_v29 }
 0x864   : > { %2914 = vmatmul.f32.gmra.mxu3 %v7639_v32 }
 0x865   : > { %2885 = vmatmul.f32.gmra.mxu2 %v7591_v7 }
 0x868   : > { %4314 = vmatmul.msk.f32.gmra.mxu1 %vm1840_vm14, %v2646_v55 }
 0x870   : > { %4315 = vmatmul.msk.f32.gmra.mxu1 %vm1840_vm14, %v2649_v20 }
 0x885   : > { %v2703_v33 = vpop.f32.mrf.mxu1 }
 0x886   : > { %v2704_v26 = vadd.f32 %v2703_v33, %v2657_v62 }
 0x88d   : > { %v2706_v58 = vpop.f32.mrf.mxu1 }
 0x88e   : > { %v2732_v19 = vpop.f32.mrf.mxu0  ;;  %v2707_v46 = vadd.f32 %v2706_v58, %v2662_v51 }
 0x88f   : > { %v2733_v30 = vadd.f32 %v2732_v19, %v2704_v26 }
 0x895   : > { %v2709_v34 = vpop.f32.mrf.mxu1 }
 0x896   : > { %v2735_v13 = vpop.f32.mrf.mxu0  ;;  %v2710_v50 = vadd.f32 %v2709_v34, %v2667_v40 }
 0x897   : > { %v2736_v0 = vadd.f32 %v2735_v13, %v2707_v46 }
 0x89e   : > { %v2738_v28 = vpop.f32.mrf.mxu0  ;;  %v2712_v24 = vpop.f32.mrf.mxu1 }
 0x89f   : > { %v2739_v54 = vadd.f32 %v2738_v28, %v2710_v50  ;;  %v2713_v6 = vadd.f32 %v2712_v24, %v7774_v3 }
 0x8a6   : > { %v2741_v2 = vpop.f32.mrf.mxu0 }
 0x8a7   : > { %v2742_v35 = vadd.f32 %v2741_v2, %v2713_v6 }
 0x8ad   : > { %v2790_v14 = vpop.f32.mrf.mxu3 }
 0x8ae   : > { %v2791_v7 = vadd.f32 %v2790_v14, %v2657_v62 }
 0x8af   : > { %v2761_v23 = vpop.f32.mrf.mxu2 }
 0x8b0   : > { %v2762_v39 = vadd.f32 %v2761_v23, %v2733_v30 }
 0x8b2   : > { %v2947_v9 = vmul.f32 %v2762_v39, %v5650_v61 }
 0x8b4   : > { %v2819_v60 = vpop.f32.mrf.mxu1  ;;  %2971 = vrot.lane.b32.xlu0 %v2947_v9, %s5495_s6 }
 0x8b5   : > { %v2793_v15 = vpop.f32.mrf.mxu3  ;;  %v2820_v16 = vadd.f32 %v2819_v60, %v2791_v7 }
 0x8b6   : > { %v2848_v12 = vpop.f32.mrf.mxu0  ;;  %v2794_v49 = vadd.f32 %v2793_v15, %v2662_v51 }
 0x8b7   : > { %v2764_v31 = vpop.f32.mrf.mxu2  ;;  %v2849_v10 = vadd.f32 %v2848_v12, %v2820_v16 }
 0x8b8   : > { %v2765_v45 = vadd.f32 %v2764_v31, %v2736_v0 }
 0x8b9   : > { %v2948_v53 = vmul.f32 %v2849_v10, %v5656_v8 }
 0x8ba   : > { %v2950_v52 = vmul.f32 %v2765_v45, %v5650_v61 }
 0x8bc   : > { %2977 = vrot.lane.b32.xlu1 %v2950_v52, %s5495_s6 }
 0x8bd   : > { %v2822_v63 = vpop.f32.mrf.mxu1 }
 0x8be   : > { %v2796_v32 = vpop.f32.mrf.mxu3  ;;  %v2851_v43 = vpop.f32.mrf.mxu0  ;;  %v2823_v22 = vadd.f32 %v2822_v63, %v2794_v49 }
 0x8bf   : > { %v2797_v5 = vadd.f32 %v2796_v32, %v2667_v40 }
 0x8c0   : > { %v2767_v56 = vpop.f32.mrf.mxu2  ;;  %v2852_v42 = vadd.f32 %v2851_v43, %v2823_v22 }
 0x8c1   : > { %v2768_v57 = vadd.f32 %v2767_v56, %v2739_v54 }
 0x8c2   : > { %v2951_v29 = vmul.f32 %v2852_v42, %v5656_v8 }
 0x8c3   : > { %v2953_v11 = vmul.f32 %v2768_v57, %v5650_v61 }
 0x8c4   : > { %2973 = vrot.lane.b32.xlu1 %v2948_v53, %s5495_s6 }
 0x8c5   : > { %v2825_v27 = vpop.f32.mrf.mxu1  ;;  %2983 = vrot.lane.b32.xlu2 %v2953_v11, %s5495_s6 }
 0x8c6   : > { %v2854_v36 = vpop.f32.mrf.mxu0  ;;  %v2826_v25 = vadd.f32 %v2825_v27, %v2797_v5 }
 0x8c7   : > { %v2799_v21 = vpop.f32.mrf.mxu3 }
 0x8c8   : > { %v2770_v1 = vpop.f32.mrf.mxu2  ;;  %v2800_v59 = vadd.f32 %v2799_v21, %v7774_v3  ;;  %v2855_v48 = vadd.f32 %v2854_v36, %v2826_v25 }
 0x8c9   : > { %v2771_v41 = vadd.f32 %v2770_v1, %v2742_v35 }
 0x8ca   : > { %v2954_v19 = vmul.f32 %v2855_v48, %v5656_v8 }
 0x8cb   : > { %v2956_v17 = vmul.f32 %v2771_v41, %v5650_v61 }
 0x8cd   : > { %v2828_v37 = vpop.f32.mrf.mxu1  ;;  %2979 = vrot.lane.b32.xlu2 %v2951_v29, %s5495_s6  ;;  %2989 = vrot.lane.b32.xlu0 %v2956_v17, %s5495_s6 }
 0x8ce   : > { %v2829_v18 = vadd.f32 %v2828_v37, %v2800_v59  ;;  %v2857_v38 = vpop.f32.mrf.mxu0 }
 0x8cf   : > { %v2906_v55 = vpop.f32.mrf.mxu3 }
 0x8d0   : > { %v2858_v44 = vadd.f32 %v2857_v38, %v2829_v18  ;;  %v2877_v20 = vpop.f32.mrf.mxu2 }
 0x8d1   : > { %v2878_v47 = vadd.f32 %v2877_v20, %v2657_v62 }
 0x8d2   : > { %v2957_v33 = vmul.f32 %v2858_v44, %v5656_v8 }
 0x8d3   : > { %v2907_v58 = vadd.f32 %v2906_v55, %v2878_v47 }
 0x8d4   : > { %2991 = vrot.lane.b32.xlu1 %v2957_v33, %s5495_s6 }
 0x8d5   : > { %v2935_v13 = vpop.f32.mrf.mxu1  ;;  %2985 = vrot.lane.b32.xlu0 %v2954_v19, %s5495_s6 }
 0x8d6   : > { %v2936_v34 = vadd.f32 %v2935_v13, %v2907_v58 }
 0x8d7   : > { %v2909_v28 = vpop.f32.mrf.mxu3 }
 0x8d8   : > { %v2949_v26 = vmul.f32 %v2936_v34, %v5654_v4  ;;  %v2880_v24 = vpop.f32.mrf.mxu2 }
 0x8d9   : > { %v2881_v14 = vadd.f32 %v2880_v24, %v2662_v51 }
 0x8da   : > { %2975 = vrot.lane.b32.xlu2 %v2949_v26, %s5495_s6 }
 0x8db   : > { %v2910_v30 = vadd.f32 %v2909_v28, %v2881_v14 }
 0x8dd   : > { %v2938_v62 = vpop.f32.mrf.mxu1 }
 0x8de   : > { %v2939_v2 = vadd.f32 %v2938_v62, %v2910_v30 }
 0x8df   : > { %v2912_v23 = vpop.f32.mrf.mxu3 }
 0x8e0   : > { %v2952_v39 = vmul.f32 %v2939_v2, %v5654_v4  ;;  %v2883_v9 = vpop.f32.mrf.mxu2 }
 0x8e1   : > { %v2884_v46 = vadd.f32 %v2883_v9, %v2667_v40 }
 0x8e2   : > { %2981 = vrot.lane.b32.xlu1 %v2952_v39, %s5495_s6 }
 0x8e3   : > { %v2913_v60 = vadd.f32 %v2912_v23, %v2884_v46 }
 0x8e5   : > { %v2941_v15 = vpop.f32.mrf.mxu1 }
 0x8e6   : > { %v2942_v0 = vadd.f32 %v2941_v15, %v2913_v60 }
 0x8e7   : > { %v2915_v7 = vpop.f32.mrf.mxu3 }
 0x8e8   : > { %v2955_v12 = vmul.f32 %v2942_v0, %v5654_v4  ;;  %v2886_v31 = vpop.f32.mrf.mxu2 }
 0x8e9   : > { %v2887_v51 = vadd.f32 %v2886_v31, %v7774_v3 }
 0x8ea   : > { %2987 = vrot.lane.b32.xlu0 %v2955_v12, %s5495_s6 }
 0x8eb   : > { %v2916_v45 = vadd.f32 %v2915_v7, %v2887_v51 }
 0x8ed   : > { %v2944_v16 = vpop.f32.mrf.mxu1 }
 0x8ee   : > { %v2945_v52 = vadd.f32 %v2944_v16, %v2916_v45  ;;  %v3428_v45 = vld [vmem:[%s8774_s4 + $0x88] sm:$0xff]  ;;  %v3430_v16 = vld [vmem:[%s8774_s4 + $0x98] sm:$0xff] }
 0x8f0   : > { %v2958_v50 = vmul.f32 %v2945_v52, %v5654_v4  ;;  %v3429_v52 = vld [vmem:[%s8774_s4 + $0x90] sm:$0xff] }
 0x8f2   : > { %2993 = vrot.lane.b32.xlu2 %v2958_v50, %s5495_s6 }
 0x91f   : > { %v2984_v40 = vpop.permute.xlu2 %2983 }
 0x920   : > { %3021 = vst.msk [vmem:[#allocation2 + $0x30] sm:$0xff] %vm493_vm10, %v2984_v40 }
 0x926   : > { %v2972_v63 = vpop.permute.xlu0 %2971 }
 0x927   : > { %3015 = vst.msk [vmem:[#allocation2] sm:$0xff] %vm493_vm10, %v2972_v63  ;;  %v2980_v10 = vpop.permute.xlu2 %2979  ;;  %v7849_v21 = vld [vmem:[#allocation2 + $0x30] sm:$0xff] }
 0x928   : > { %v3045_v25 = vmax.f32 %v7849_v21, 0.0 }
 0x92e   : > { %v2978_v32 = vpop.permute.xlu1 %2977  ;;  %v7809_v3 = vld [vmem:[#allocation2] sm:$0xff] }
 0x92f   : > { %v7806_v43 = vsel %vm482_vm12, %v2978_v32, %v2980_v10  ;;  %3018 = vst.msk [vmem:[#allocation2 + $0x18] sm:$0xff] %vm493_vm10, %v2978_v32  ;;  %v7816_v53 = vmax.f32 %v7809_v3, 0.0 }
 0x930   : > { %v8857_v35 = vmax.f32 %v7806_v43, 0.0 }
 0x934   : > { %v2976_v54 = vpop.permute.xlu2 %2975 }
 0x936   : > { %v2974_v56 = vpop.permute.xlu1 %2973  ;;  %v7826_v6 = vld [vmem:[#allocation2 + $0x18] sm:$0xff] }
 0x937   : > { %v7812_v49 = vsel %vm482_vm12, %v2972_v63, %v2974_v56  ;;  %v2996_v57 = vsel %vm482_vm12, %v2974_v56, %v2976_v54  ;;  %v3042_v27 = vmax.f32 %v7826_v6, 0.0  ;;  %v3427_v56 = vld [vmem:[%s8774_s4 + $0x80] sm:$0xff] }
 0x938   : > { %v7819_v22 = vmax.f32 %v7812_v49, 0.0  ;;  %3017 = vst.msk [vmem:[#allocation2 + $0x10] sm:$0xff] %vm496_vm11, %v2996_v57 }
 0x939   : > { %v7841_v42 = vpack.i.bf16 %v8857_v35, %v3042_v27 }
 0x93a   : > { %v7824_v11 = vpack.i.bf16 %v7819_v22, %v7816_v53 }
 0x93c   : > { %5191 = vrot.lane.b32.xlu2 %v7824_v11, %s5493_s17  ;;  %5186 = vrot.lane.b32.xlu1 %v7824_v11, %s5492_s16 }
 0x93d   : > { %5181 = vrot.lane.b32.xlu0 %v7824_v11, %s5491_s15 }
 0x93f   : > { %v2990_v36 = vpop.permute.xlu0 %2989  ;;  %v7903_v13 = vld [vmem:[#allocation2 + $0x10] sm:$0xff] }
 0x940   : > { %3024 = vst.msk [vmem:[#allocation2 + $0x48] sm:$0xff] %vm493_vm10, %v2990_v36  ;;  %v7911_v28 = vmax.f32 %v7903_v13, 0.0 }
 0x944   : > { %5196 = vrot.lane.b32.xlu2 %v7841_v42, %s5491_s15  ;;  %5206 = vrot.lane.b32.xlu1 %v7841_v42, %s5493_s17 }
 0x945   : > { %5201 = vrot.lane.b32.xlu0 %v7841_v42, %s5492_s16 }
 0x946   : > { %v2992_v1 = vpop.permute.xlu1 %2991 }
 0x947   : > { %v7852_v5 = vsel %vm482_vm12, %v2990_v36, %v2992_v1  ;;  %v2986_v41 = vpop.permute.xlu0 %2985  ;;  %v7881_v55 = vld [vmem:[#allocation2 + $0x48] sm:$0xff] }
 0x948   : > { %v7855_v29 = vsel %vm482_vm12, %v2984_v40, %v2986_v41  ;;  %v3048_v47 = vmax.f32 %v7881_v55, 0.0  ;;  %v8859_v33 = vmax.f32 %v7852_v5, 0.0 }
 0x949   : > { %v8858_v17 = vmax.f32 %v7855_v29, 0.0 }
 0x94a   : > { %v5255_v19 = vpack.i.bf16 %v8859_v33, %v3048_v47 }
 0x94b   : > { %v7863_v59 = vpack.i.bf16 %v8858_v17, %v3045_v25 }
 0x94c   : > { %v2994_v37 = vpop.permute.xlu2 %2993  ;;  %5211 = vrot.lane.b32.xlu2 %v7841_v42, %s5486_s10 }
 0x94d   : > { %v3002_v18 = vsel %vm482_vm12, %v2992_v1, %v2994_v37  ;;  %5216 = vrot.lane.b32.xlu0 %v7841_v42, %s5488_s12  ;;  %5226 = vrot.lane.b32.xlu1 %v7863_v59, %s5491_s15 }
 0x94e   : > { %3026 = vst.msk [vmem:[#allocation2 + $0x58] sm:$0xff] %vm496_vm11, %v3002_v18 }
 0x954   : > { %v2982_v38 = vpop.permute.xlu1 %2981  ;;  %5221 = vrot.lane.b32.xlu2 %v7841_v42, %s5489_s13 }
 0x955   : > { %v2998_v48 = vsel %vm482_vm12, %v2980_v10, %v2982_v38  ;;  %5236 = vrot.lane.b32.xlu0 %v7863_v59, %s5493_s17  ;;  %5241 = vrot.lane.b32.xlu1 %v7863_v59, %s5486_s10  ;;  %v3038_v62 = vld [vmem:[#allocation2 + $0x58] sm:$0xff] }
 0x956   : > { %3020 = vst.msk [vmem:[#allocation2 + $0x28] sm:$0xff] %vm496_vm11, %v2998_v48  ;;  %v7931_v2 = vmax.f32 %v3038_v62, 0.0 }
 0x958   : > { %v5330_v39 = vpack.i.bf16 %v7816_v53, %v7931_v2 }
 0x95c   : > { %v2988_v44 = vpop.permute.xlu0 %2987  ;;  %5231 = vrot.lane.b32.xlu2 %v7863_v59, %s5492_s16 }
 0x95d   : > { %v3000_v20 = vsel %vm482_vm12, %v2986_v41, %v2988_v44  ;;  %5251 = vrot.lane.b32.xlu0 %v7863_v59, %s5489_s13  ;;  %5246 = vrot.lane.b32.xlu1 %v7863_v59, %s5488_s12  ;;  %v7900_v58 = vld [vmem:[#allocation2 + $0x28] sm:$0xff] }
 0x95e   : > { %3023 = vst.msk [vmem:[#allocation2 + $0x40] sm:$0xff] %vm496_vm11, %v3000_v20  ;;  %v7908_v34 = vmax.f32 %v7900_v58, 0.0 }
 0x960   : > { %v5300_v26 = vpack.i.bf16 %v7911_v28, %v7908_v34 }
 0x964   : > { %5266 = vrot.lane.b32.xlu2 %v5255_v19, %s5493_s17 }
 0x965   : > { %5256 = vrot.lane.b32.xlu0 %v5255_v19, %s5491_s15  ;;  %5261 = vrot.lane.b32.xlu1 %v5255_v19, %s5492_s16  ;;  %v7915_v24 = vld [vmem:[#allocation2 + $0x40] sm:$0xff] }
 0x966   : > { %v7921_v14 = vmax.f32 %v7915_v24, 0.0 }
 0x968   : > { %v5315_v30 = vpack.i.bf16 %v7921_v14, %v7819_v22  ;;  %v5335_v23 = vpack.i.bf16 %v7921_v14, %v7931_v2 }
 0x96c   : > { %5276 = vrot.lane.b32.xlu2 %v5255_v19, %s5488_s12 }
 0x96d   : > { %5271 = vrot.lane.b32.xlu0 %v5255_v19, %s5486_s10  ;;  %5281 = vrot.lane.b32.xlu1 %v5255_v19, %s5489_s13 }
 0x974   : > { %5301 = vrot.lane.b32.xlu2 %v5300_v26, %s5488_s12 }
 0x975   : > { %5286 = vrot.lane.b32.xlu0 %v5255_v19, %s5490_s14  ;;  %5311 = vrot.lane.b32.xlu1 %v5300_v26, %s5489_s13 }
 0x97c   : > { %5306 = vrot.lane.b32.xlu2 %v5300_v26, %s5492_s16 }
 0x97d   : > { %5291 = vrot.lane.b32.xlu0 %v5300_v26, %s5486_s10  ;;  %5316 = vrot.lane.b32.xlu1 %v5315_v30, %s5486_s10 }
 0x984   : > { %5321 = vrot.lane.b32.xlu2 %v5315_v30, %s5488_s12 }
 0x985   : > { %5296 = vrot.lane.b32.xlu0 %v5300_v26, %s5491_s15  ;;  %5326 = vrot.lane.b32.xlu1 %v5315_v30, %s5489_s13 }
 0x98c   : > { %5336 = vrot.lane.b32.xlu2 %v5335_v23, %s5491_s15 }
 0x98d   : > { %5331 = vrot.lane.b32.xlu0 %v5330_v39, %s5486_s10  ;;  %5346 = vrot.lane.b32.xlu1 %v5330_v39, %s5488_s12  ;;  %s8975_s10 = smov 90  }
 0x994   : > { %5341 = vrot.lane.b32.xlu2 %v7863_v59, %s5490_s14 }
 0x995   : > { %5361 = vrot.lane.b32.xlu0 %v5315_v30, %s5490_s14  ;;  %5351 = vrot.lane.b32.xlu1 %v5335_v23, %s5492_s16 }
 0x996   : > { %v7944_v9 = vpop.permute.xlu2 %5191 }
 0x99c   : > { %5381 = vrot.lane.b32.xlu2 %v5330_v39, %s5490_s14 }
 0x99d   : > { %5371 = vrot.lane.b32.xlu0 %v5330_v39, %s5489_s13  ;;  %5356 = vrot.lane.b32.xlu1 %v7841_v42, %s5490_s14 }
 0x99e   : > { %v7950_v46 = vpop.permute.xlu2 %5196 }
 0x99f   : > { %v5199_v44 = vunpack.i.h.bf16 %v7950_v46  ;;  %v5198_v20 = vunpack.i.l.bf16 %v7950_v46 }
 0x9a4   : > { %5386 = vrot.lane.b32.xlu2 %v5300_v26, %s5490_s14 }
 0x9a5   : > { %5376 = vrot.lane.b32.xlu0 %v5335_v23, %s5493_s17  ;;  %5366 = vrot.lane.b32.xlu1 %v5300_v26, %s5493_s17 }
 0x9a6   : > { %v7955_v60 = vpop.permute.xlu2 %5211 }
 0x9ac   : > { %5401 = vrot.lane.b32.xlu2 %v7841_v42, %s8975_s10 }
 0x9ad   : > { %5391 = vrot.lane.b32.xlu0 %v5255_v19, %s8975_s10  ;;  %5396 = vrot.lane.b32.xlu1 %v7863_v59, %s8975_s10 }
 0x9ae   : > { %v7962_v15 = vpop.permute.xlu2 %5221  ;;  %v7964_v0 = vpop.permute.xlu1 %5186 }
 0x9af   : > { %v7966_v12 = vpop.permute.xlu0 %5181 }
 0x9b0   : > { %v8860_v19 = vunpack.i.h.bf16 %v7966_v12 }
 0x9b4   : > { %5416 = vrot.lane.b32.xlu2 %v5300_v26, %s8975_s10  ;;  %v5183_v26 = vunpack.i.l.bf16 %v7966_v12 }
 0x9b5   : > { %5406 = vrot.lane.b32.xlu0 %v7824_v11, %s8975_s10  ;;  %5411 = vrot.lane.b32.xlu1 %v5335_v23, %s8975_s10  ;;  %s5496_s10 = smov 112  }
 0x9b6   : > { %v7972_v31 = vpop.permute.xlu1 %5206  ;;  %v7974_v7 = vpop.permute.xlu2 %5231 }
 0x9b7   : > { %v7976_v51 = vpop.permute.xlu0 %5201 }
 0x9b8   : > { %v8870_v35 = vunpack.i.h.bf16 %v7976_v51  ;;  %v5203_v17 = vunpack.i.l.bf16 %v7976_v51 }
 0x9bc   : > { %3438 = vperm.xlu2 %4458, %v3428_v45  }
 0x9bd   : > { %3448 = vperm.xlu0 %4579, %v3430_v16   ;;  %3443 = vperm.xlu1 %4457, %v3429_v52   ;;  %v3175_v16 = vsel %vm295_vm6, %v5183_v26, %v8860_v19  ;;  %v8862_v52 = vunpack.i.h.bf16 %v7974_v7  ;;  %v5188_v19 = vunpack.i.l.bf16 %v7964_v0 }
 0x9be   : > { %v7987_v50 = vpop.permute.xlu2 %5266 }
 0x9bf   : > { %v7989_v40 = vpop.permute.xlu1 %5226  ;;  %v7991_v63 = vpop.permute.xlu0 %5216 }
 0x9c0   : > { %v5229_v18 = vunpack.i.h.bf16 %v7989_v40  ;;  %v5228_v38 = vunpack.i.l.bf16 %v7989_v40 }
 0x9c4   : > { %3758 = vrot.lane.b32.xlu2 %v3038_v62, %s5490_s14 }
 0x9c5   : > { %3754 = vrot.lane.b32.xlu0 %v7881_v55, %s5490_s14  ;;  %3756 = vrot.lane.b32.xlu1 %v7852_v5, %s5490_s14  ;;  %v8170_v55 = vld [vmem:[%s8773_s3 + $0x180] sm:$0xff] }
 0x9c6   : > { %v7998_v10 = vpop.permute.xlu2 %5276 }
 0x9c7   : > { %v8000_v32 = vpop.permute.xlu1 %5241  ;;  %v8002_v54 = vpop.permute.xlu0 %5236  ;;  %v5278_v46 = vunpack.i.l.bf16 %v7998_v10 }
 0x9cc   : > { %3750 = vrot.lane.b32.xlu2 %v7855_v29, %s5490_s14 }
 0x9cd   : > { %3433 = vperm.xlu0 %4579, %v3427_v56   ;;  %3748 = vrot.lane.b32.xlu1 %v7849_v21, %s5490_s14  ;;  %v5233_v56 = vunpack.i.l.bf16 %v7974_v7  ;;  %v8175_v21 = vld [vmem:[%s8773_s3 + $0x240] sm:$0xff] }
 0x9ce   : > { %v8011_v57 = vpop.permute.xlu2 %5301 }
 0x9cf   : > { %v8013_v11 = vpop.permute.xlu1 %5246  ;;  %v8015_v36 = vpop.permute.xlu0 %5251 }
 0x9d4   : > { %3744 = vrot.lane.b32.xlu2 %v7806_v43, %s5490_s14 }
 0x9d5   : > { %3752 = vrot.lane.b32.xlu0 %v7915_v24, %s5490_s14  ;;  %3742 = vrot.lane.b32.xlu1 %v7826_v6, %s5490_s14  ;;  %v3179_v24 = vsel %vm295_vm6, %v5228_v38, %v5229_v18  ;;  %v5243_v38 = vunpack.i.l.bf16 %v8000_v32  ;;  %v8976_v6 = vunpack.i.h.bf16 %v7966_v12  ;;  %v8203_v12 = vld [vmem:[%s8773_s3 + $0x198] sm:$0xff] }
 0x9d6   : > { %v8023_v42 = vpop.permute.xlu2 %5306 }
 0x9d7   : > { %v8025_v1 = vpop.permute.xlu1 %5261  ;;  %v8027_v41 = vpop.permute.xlu0 %5256 }
 0x9d8   : > { %v5259_v59 = vunpack.i.h.bf16 %v8027_v41  ;;  %v5258_v37 = vunpack.i.l.bf16 %v8027_v41  ;;  %v8863_v62 = vunpack.i.h.bf16 %v8025_v1  ;;  %v5263_v23 = vunpack.i.l.bf16 %v8025_v1 }
 0x9da   : > { %v3181_v48 = vsel %vm295_vm6, %v5258_v37, %v5259_v59  ;;  %v5244_v37 = vunpack.i.h.bf16 %v8000_v32  ;;  %v3137_v33 = vsel %vm283_vm7, %v5263_v23, %v8863_v62 }
 0x9db   : > { %3463 = vmatpush.msra.mxu0 %v3181_v48  ;;  %v3818_v48 = vld [vmem:[%s8774_s4 + $0xa0] sm:$0xff] }
 0x9dc   : > { %3738 = vrot.lane.b32.xlu2 %v7812_v49, %s5490_s14 }
 0x9dd   : > { %3746 = vrot.lane.b32.xlu0 %v7900_v58, %s5490_s14  ;;  %3736 = vrot.lane.b32.xlu1 %v7809_v3, %s5490_s14  ;;  %v3177_v58 = vsel %vm295_vm6, %v5198_v20, %v5199_v44  ;;  %v5214_v20 = vunpack.i.h.bf16 %v7955_v60 }
 0x9de   : > { %3464 = vmatpush.msra.mxu0 %v3179_v24  ;;  %v8049_v30 = vpop.permute.xlu2 %5321  ;;  %v5213_v24 = vunpack.i.l.bf16 %v7955_v60  ;;  %v5223_v60 = vunpack.i.l.bf16 %v7962_v15 }
 0x9df   : > { %v8053_v39 = vpop.permute.xlu1 %5281  ;;  %v8055_v49 = vpop.permute.xlu0 %5271 }
 0x9e0   : > { %v8861_v3 = vunpack.i.h.bf16 %v8055_v49  ;;  %v5273_v45 = vunpack.i.l.bf16 %v8055_v49  ;;  %3465 = vmatpush.msra.mxu0 %v3177_v58  ;;  %v3819_v58 = vld [vmem:[%s8774_s4 + $0xa8] sm:$0xff]  ;;  %v3353_v23 = vsel %vm343_vm2, %v5213_v24, %v5214_v20  ;;  %v8866_v24 = vunpack.i.h.bf16 %v8002_v54 }
 0x9e2   : > { %3466 = vmatpush.msra.mxu0 %v3175_v16  ;;  %v3357_v26 = vsel %vm343_vm2, %v5273_v45, %v8861_v3  ;;  %v8868_v16 = vunpack.i.h.bf16 %v7964_v0  ;;  %v3135_v45 = vsel %vm283_vm7, %v5233_v56, %v8862_v52  ;;  %v3355_v3 = vsel %vm343_vm2, %v5243_v38, %v5244_v37 }
 0x9e3   : > { %3492 = vmatpush.msra.mxu2 %v3357_v26  ;;  %v3133_v38 = vsel %vm283_vm7, %v5203_v17, %v8870_v35  ;;  %v3935_v17 = vld [vmem:[%s8773_s3 + $0x210] sm:$0xff] }
 0x9e4   : > { %3467 = vmatpush.msra.mxu0 %v3137_v33  ;;  %3822 = vperm.xlu2 %4458, %v3818_v48   ;;  %v8867_v48 = vunpack.i.h.bf16 %v7987_v50  ;;  %v3131_v52 = vsel %vm283_vm7, %v5188_v19, %v8868_v16  ;;  %v5193_v19 = vunpack.i.l.bf16 %v7944_v9 }
 0x9e5   : > { %3740 = vrot.lane.b32.xlu0 %v7903_v13, %s5490_s14  ;;  %3827 = vperm.xlu1 %4457, %v3819_v58   ;;  %v5268_v13 = vunpack.i.l.bf16 %v7987_v50  ;;  %s4195_s14 = sshll.u32 %s4191_s9, 4  ;;  %s4196_s14 = int_to_ptr.hbm [resolvable:$true] %s4195_s14 }
 0x9e6   : > { %3468 = vmatpush.msra.mxu0 %v3135_v45  ;;  %3493 = vmatpush.msra.mxu2 %v3355_v3  ;;  %v5337_v33 = vpop.permute.xlu2 %5336  ;;  %v5238_v45 = vunpack.i.l.bf16 %v8002_v54 }
 0x9e7   : > { %v8100_v26 = vpop.permute.xlu1 %5311  ;;  %v8102_v58 = vunpack.i.l.bf16 %v5337_v33  ;;  %v8104_v56 = vpop.permute.xlu0 %5286  ;;  %v8109_v3 = vunpack.i.h.bf16 %v5337_v33  ;;  %v8865_v33 = vunpack.i.h.bf16 %v7972_v31 }
 0x9e8   : > { %3469 = vmatpush.msra.mxu0 %v3133_v38  ;;  %3494 = vmatpush.msra.mxu2 %v3353_v23  ;;  %v5208_v23 = vunpack.i.l.bf16 %v7972_v31  ;;  %v3093_v38 = vsel %vm271_vm8, %v5268_v13, %v8867_v48  ;;  %v5218_v48 = vunpack.i.l.bf16 %v7991_v63 }
 0x9e9   : > { %v3182_v62 = vsel %vm295_vm6, %v5259_v59, %v8102_v58  ;;  %v3180_v41 = vsel %vm295_vm6, %v5229_v18, %v8109_v3  ;;  %v8864_v59 = vunpack.i.h.bf16 %v7944_v9 }
 0x9ea   : > { %3470 = vmatpush.msra.mxu0 %v3131_v52  ;;  %3550 = vmatpush.msrb.mxu1 %v3182_v62  ;;  %v3091_v62 = vsel %vm271_vm8, %v5238_v45, %v8866_v24  ;;  %v3089_v40 = vsel %vm271_vm8, %v5208_v23, %v8865_v33  ;;  %v8873_v24 = vunpack.i.h.bf16 %v7991_v63 }
 0x9eb   : > { %v3087_v18 = vsel %vm271_vm8, %v5193_v19, %v8864_v59  ;;  %v8977_v59 = vunpack.i.h.bf16 %v8055_v49 }
 0x9ec   : > { %3471 = vmatpush.msra.mxu0 %v3093_v38  ;;  %3980 = vrot.lane.b32.xlu2 %v3935_v17, %s5496_s10  ;;  %v8151_v17 = vld [vmem:[%s8773_s3 + $0x228] sm:$0xff] }
 0x9ed   : > { %3551 = vmatpush.msrb.mxu1 %v3180_v41 }
 0x9ee   : > { %3472 = vmatpush.msra.mxu0 %v3091_v62 }
 0x9ef   : > { %v8138_v52 = vpop.permute.xlu1 %5316  ;;  %v8140_v13 = vpop.permute.xlu0 %5291 }
 0x9f0   : > { %3473 = vmatpush.msra.mxu0 %v3089_v40  ;;  %v5318_v62 = vunpack.i.l.bf16 %v8138_v52  ;;  %v8872_v16 = vunpack.i.l.bf16 %v8140_v13 }
 0x9f2   : > { %3474 = vmatpush.msra.mxu0 %v3087_v18  ;;  %v3354_v32 = vsel %vm343_vm2, %v5214_v20, %v8872_v16  ;;  %v5324_v20 = vunpack.i.h.bf16 %v8049_v30 }
 0x9f4   : > { %3475 = vmatpush.msra.mxu0 %v3048_v47  ;;  %3982 = vrot.lane.b32.xlu2 %v8151_v17, %s5496_s10  ;;  %v5279_v47 = vunpack.i.h.bf16 %v7998_v10  ;;  %v5249_v10 = vunpack.i.h.bf16 %v8013_v11 }
 0x9f6   : > { %3476 = vmatpush.msra.mxu0 %v3045_v25 }
 0x9f7   : > { %v8159_v45 = vpop.permute.xlu1 %5326  ;;  %v5297_v23 = vpop.permute.xlu0 %5296 }
 0x9f8   : > { %v8161_v38 = vunpack.i.h.bf16 %v5297_v23  ;;  %v8163_v41 = vunpack.i.l.bf16 %v5297_v23  ;;  %3477 = vmatpush.msra.mxu0 %v3042_v27  ;;  %v8871_v23 = vunpack.i.h.bf16 %v8138_v52 }
 0x9fa   : > { %3478 = vmatpush.msra.mxu0 %v7816_v53  ;;  %v3178_v25 = vsel %vm295_vm6, %v5199_v44, %v8163_v41  ;;  %v3176_v27 = vsel %vm295_vm6, %v8976_v6, %v8161_v38  ;;  %v8195_v44 = vpop.permute.xlu2 %5341  ;;  %v5248_v6 = vunpack.i.l.bf16 %v8013_v11  ;;  %v3313_v11 = vsel %vm331_vm3, %v5278_v46, %v5279_v47 }
 0x9fb   : > { %3479 = vmatmul.f32.vlgmr.msra.gmra.mxu0 %v8170_v55  ;;  %3552 = vmatpush.msrb.mxu1 %v3178_v25  ;;  %v8209_v25 = vld [vmem:[%s8773_s3 + $0x258] sm:$0xff]  ;;  %v3356_v49 = vsel %vm343_vm2, %v5244_v37, %v8871_v23  ;;  %v3309_v37 = vsel %vm331_vm3, %v5218_v48, %v8873_v24  ;;  %v5254_v48 = vunpack.i.h.bf16 %v8015_v36 }
 0x9fc   : > { %3984 = vrot.lane.b32.xlu2 %v8175_v21, %s5496_s10 }
 0x9fd   : > { %3553 = vmatpush.msrb.mxu1 %v3176_v27 }
 0x9ff   : > { %v8190_v53 = vpop.permute.xlu1 %5346  ;;  %v8192_v19 = vpop.permute.xlu0 %5331 }
 0xa00   : > { %v5334_v40 = vunpack.i.h.bf16 %v8192_v19  ;;  %v8869_v18 = vunpack.i.l.bf16 %v8192_v19 }
 0xa02   : > { %v3351_v27 = vsel %vm343_vm2, %v5334_v40, %v5318_v62  ;;  %v3358_v33 = vsel %vm343_vm2, %v8977_v59, %v8869_v18  ;;  %v8874_v40 = vunpack.i.h.bf16 %v8140_v13  ;;  %v5349_v59 = vunpack.i.h.bf16 %v8190_v53  ;;  %v8265_v24 = vpop.permute.xlu2 %5381 }
 0xa03   : > { %3482 = vmatmul.f32.gmra.mxu0 %v8203_v12  ;;  %3495 = vmatpush.msra.mxu2 %v3351_v27  ;;  %v3311_v27 = vsel %vm331_vm3, %v5248_v6, %v5249_v10  ;;  %v5284_v6 = vunpack.i.h.bf16 %v8053_v39  ;;  %v8978_v18 = vunpack.i.h.bf16 %v8025_v1 }
 0xa04   : > { %3579 = vmatpush.msrb.mxu0 %v3358_v33  ;;  %3986 = vrot.lane.b32.xlu2 %v8209_v25, %s5496_s10  ;;  %s4267_s10 = sshll.u32 %s5577_s30, 3 }
 0xa05   : > { %3496 = vmatpush.msra.mxu2 %v3313_v11  ;;  %v5283_v11 = vunpack.i.l.bf16 %v8053_v39  ;;  %v3352_v39 = vsel %vm343_vm2, %v5318_v62, %v8874_v40  ;;  %v8277_v40 = vunpack.i.l.bf16 %v8023_v42  ;;  %s238_s17 = scalar_lea.vmem %s8772_s2, %s4267_s10  ;;  %s5435_s10 = sshra.s32 %s4196_s14, 4  ;;  %s5436_s10 = int_to_ptr.hbm [resolvable:$true] %s5435_s10 }
 0xa06   : > { %3580 = vmatpush.msrb.mxu0 %v3356_v49  ;;  %v5323_v49 = vunpack.i.l.bf16 %v8049_v30  ;;  %s5437_s12 = scalar_lea.hbm %s5436_s10, 1  ;;  %p5442_p0 = scmp.lt.s32.totalorder %s5436_s10, %s8775_s5 }
 0xa07   : > { %v5352_v35 = vpop.permute.xlu1 %5351  ;;  %v8236_v46 = vpop.permute.xlu0 %5361  ;;  %3497 = vmatpush.msra.mxu2 %v3311_v27  ;;  %v8254_v27 = vld [vmem:[%s8773_s3 + $0x1b0] sm:$0xff]  ;;  %v3269_v1 = vsel %vm319_vm4, %v5283_v11, %v5284_v6  ;;  %v8981_v11 = vunpack.i.h.bf16 %v7962_v15  ;;  %p5438_p11 = scmp.ne.s32.totalorder %s5436_s10, %s5437_s12  ;;  %p5443_p1 = scmp.lt.s32.totalorder %s5441_s22, %s5437_s12 }
 0xa08   : > { %v8249_v23 = vunpack.i.l.bf16 %v5352_v35  ;;  %3581 = vmatpush.msrb.mxu0 %v3354_v32  ;;  %v8258_v16 = vunpack.i.h.bf16 %v5352_v35  ;;  %v5253_v32 = vunpack.i.l.bf16 %v8015_v36  ;;  %v3307_v33 = vsel %vm331_vm3, %v5349_v59, %v5323_v49 }
 0xa09   : > { %3498 = vmatpush.msra.mxu2 %v3309_v37  ;;  %v3933_v37 = vld [vmem:[%s8774_s4 + $0xc0] sm:$0xff]  ;;  %v8979_v36 = vunpack.i.l.bf16 %v8190_v53  ;;  %p5439_p12 = pnand %p5438_p11, %p5565_p5  ;;  %p5444_p2 = por %p5443_p1, %p5442_p0 }
 0xa0a   : > { %3582 = vmatpush.msrb.mxu0 %v3352_v39  ;;  %v3138_v35 = vsel %vm283_vm7, %v8978_v18, %v8249_v23  ;;  %v8285_v18 = vunpack.i.h.bf16 %v8023_v42  ;;  %v8980_v39 = vunpack.i.h.bf16 %v7974_v7  ;;  %v3265_v42 = vsel %vm319_vm4, %v5223_v60, %v8981_v11 }
 0xa0b   : > { %3485 = vmatmul.f32.gmra.mxu0 %v8254_v27  ;;  %3499 = vmatpush.msra.mxu2 %v3307_v33  ;;  %v3314_v59 = vsel %vm331_vm3, %v5279_v47, %v8979_v36  ;;  %v3312_v33 = vsel %vm331_vm3, %v5249_v10, %v5324_v20  ;;  %v3267_v47 = vsel %vm319_vm4, %v5253_v32, %v5254_v48  ;;  %v8982_v10 = vunpack.i.h.bf16 %v7976_v51  ;;  %v8320_v51 = vld [vmem:[%s8773_s3 + $0x1c8] sm:$0xff]  ;;  %p5440_p13 = pneg %p5439_p12 }
 0xa0c   : > { %3554 = vmatpush.msrb.mxu1 %v3138_v35  ;;  %3583 = vmatpush.msrb.mxu0 %v3314_v59  ;;  %v3136_v62 = vsel %vm283_vm7, %v8980_v39, %v8258_v16  ;;  %v8876_v35 = vunpack.i.h.bf16 %v8011_v57  ;;  %v8983_v32 = vunpack.i.l.bf16 %v8011_v57  ;;  %v8984_v59 = vunpack.i.h.bf16 %v7991_v63 }
 0xa0d   : > { %4062 = vperm.xlu2 %4458, %v3933_v37   ;;  %3500 = vmatpush.msra.mxu2 %v3269_v1  ;;  %v5289_v37 = vunpack.i.h.bf16 %v8104_v56  ;;  %v5288_v1 = vunpack.i.l.bf16 %v8104_v56  ;;  %v5328_v39 = vunpack.i.l.bf16 %v8159_v45  ;;  %v8985_v63 = vunpack.i.h.bf16 %v7964_v0  ;;  %p5445_p3 = pnand %p5444_p2, %p5440_p13 }
 0xa0e   : > { %3555 = vmatpush.msrb.mxu1 %v3136_v62  ;;  %3584 = vmatpush.msrb.mxu0 %v3312_v33  ;;  %v3134_v62 = vsel %vm283_vm7, %v8982_v10, %v8277_v40  ;;  %v3310_v60 = vsel %vm331_vm3, %v8984_v59, %v8983_v32  ;;  %v3308_v10 = vsel %vm331_vm3, %v5323_v49, %v8876_v35  ;;  %v5343_v32 = vunpack.i.l.bf16 %v8195_v44 }
 0xa0f   : > { %v8300_v36 = vpop.permute.xlu1 %5356  ;;  %v8302_v7 = vpop.permute.xlu0 %5371  ;;  %3501 = vmatpush.msra.mxu2 %v3267_v47  ;;  %v5329_v47 = vunpack.i.h.bf16 %v8159_v45  ;;  %v3132_v56 = vsel %vm283_vm7, %v8985_v63, %v8285_v18  ;;  %v5313_v0 = vunpack.i.l.bf16 %v8100_v26  ;;  %v9003_v45 = vunpack.i.l.bf16 %v8265_v24 }
 0xa10   : > { %v5374_v33 = vunpack.i.h.bf16 %v8302_v7  ;;  %v8875_v11 = vunpack.i.l.bf16 %v8302_v7  ;;  %3556 = vmatpush.msrb.mxu1 %v3134_v62  ;;  %3585 = vmatpush.msrb.mxu0 %v3310_v60  ;;  %v5344_v62 = vunpack.i.h.bf16 %v8195_v44  ;;  %v8338_v60 = vpop.permute.xlu2 %5386  ;;  %v5359_v49 = vunpack.i.h.bf16 %v8300_v36 }
 0xa11   : > { %3502 = vmatpush.msra.mxu2 %v3265_v42  ;;  %v5358_v63 = vunpack.i.l.bf16 %v8300_v36  ;;  %v3225_v44 = vsel %vm307_vm5, %v5288_v1, %v5289_v37  ;;  %v8986_v36 = vunpack.i.h.bf16 %v7962_v15  ;;  %v8368_v15 = vld [vmem:[%s8773_s3 + $0x188] sm:$0xff]  ;;  %v9001_v30 = vunpack.i.l.bf16 %v8302_v7 }
 0xa12   : > { %3557 = vmatpush.msrb.mxu1 %v3132_v56  ;;  %3586 = vmatpush.msrb.mxu0 %v3308_v10  ;;  %v3263_v59 = vsel %vm319_vm4, %v5374_v33, %v5328_v39  ;;  %v3270_v42 = vsel %vm319_vm4, %v5284_v6, %v8875_v11  ;;  %v3268_v33 = vsel %vm319_vm4, %v5254_v48, %v5329_v47  ;;  %v5363_v6 = vunpack.i.l.bf16 %v8236_v46 }
 0xa13   : > { %3488 = vmatmul.f32.gmra.mxu0 %v8320_v51  ;;  %3503 = vmatpush.msra.mxu2 %v3263_v59  ;;  %v3223_v56 = vsel %vm307_vm5, %v5343_v32, %v5344_v62  ;;  %v8879_v10 = vunpack.i.h.bf16 %v8100_v26  ;;  %v8878_v59 = vunpack.i.l.bf16 %v8265_v24  ;;  %v3266_v1 = vsel %vm319_vm4, %v8986_v36, %v5313_v0 }
 0xa14   : > { %3587 = vmatpush.msrb.mxu0 %v3270_v42  ;;  %v5384_v48 = vunpack.i.h.bf16 %v8265_v24  ;;  %v3221_v32 = vsel %vm307_vm5, %v5358_v63, %v5359_v49  ;;  %v8987_v63 = vunpack.i.h.bf16 %v7987_v50  ;;  %v5388_v50 = vunpack.i.l.bf16 %v8338_v60 }
 0xa15   : > { %3504 = vmatpush.msra.mxu2 %v3225_v44 }
 0xa16   : > { %3588 = vmatpush.msrb.mxu0 %v3268_v33  ;;  %v8877_v33 = vunpack.i.h.bf16 %v8236_v46 }
 0xa17   : > { %v5367_v11 = vpop.permute.xlu1 %5366  ;;  %v5377_v35 = vpop.permute.xlu0 %5376  ;;  %3505 = vmatpush.msra.mxu2 %v3223_v56  ;;  %v3264_v56 = vsel %vm319_vm4, %v5328_v39, %v8879_v10  ;;  %v3226_v39 = vsel %vm307_vm5, %v5289_v37, %v8878_v59  ;;  %v8989_v37 = vunpack.i.h.bf16 %v7972_v31 }
 0xa18   : > { %v8356_v42 = vunpack.i.h.bf16 %v5377_v35  ;;  %v8358_v44 = vunpack.i.l.bf16 %v5377_v35  ;;  %3589 = vmatpush.msrb.mxu0 %v3266_v1  ;;  %v8370_v36 = vunpack.i.l.bf16 %v5367_v11  ;;  %v3219_v35 = vsel %vm307_vm5, %v5384_v48, %v5363_v6 }
 0xa19   : > { %3506 = vmatpush.msra.mxu2 %v3221_v32  ;;  %v8377_v32 = vunpack.i.h.bf16 %v5367_v11  ;;  %v3224_v11 = vsel %vm307_vm5, %v5344_v62, %v8877_v33  ;;  %v8990_v62 = vunpack.i.h.bf16 %v7944_v9  ;;  %v8414_v9 = vld [vmem:[%s8773_s3 + $0x1a0] sm:$0xff] }
 0xa1a   : > { %3590 = vmatpush.msrb.mxu0 %v3264_v56  ;;  %v3094_v1 = vsel %vm271_vm8, %v8987_v63, %v8358_v44  ;;  %v8988_v56 = vunpack.i.h.bf16 %v8002_v54  ;;  %v3090_v63 = vsel %vm271_vm8, %v8989_v37, %v8370_v36 }
 0xa1b   : > { %3507 = vmatpush.msra.mxu2 %v3219_v35  ;;  %3558 = vmatpush.msrb.mxu1 %v3094_v1  ;;  %v8391_v35 = vpop.permute.xlu2 %5401  ;;  %v5389_v1 = vunpack.i.h.bf16 %v8338_v60 }
 0xa1c   : > { %3591 = vmatpush.msrb.mxu0 %v3226_v39  ;;  %3508 = vmatmul.f32.vlgmr.msra.gmra.mxu2 %v8368_v15  ;;  %v3092_v48 = vsel %vm271_vm8, %v8988_v56, %v8356_v42  ;;  %v3222_v56 = vsel %vm307_vm5, %v5359_v49, %v5388_v50  ;;  %v5403_v10 = vunpack.i.l.bf16 %v8391_v35 }
 0xa1d   : > { %3559 = vmatpush.msrb.mxu1 %v3092_v48  ;;  %v3088_v48 = vsel %vm271_vm8, %v8990_v62, %v8377_v32  ;;  %v3220_v37 = vsel %vm307_vm5, %v5363_v6, %v5389_v1 }
 0xa1e   : > { %3592 = vmatpush.msrb.mxu0 %v3224_v11 }
 0xa1f   : > { %v5397_v54 = vpop.permute.xlu1 %5396  ;;  %v5392_v39 = vpop.permute.xlu0 %5391  ;;  %3560 = vmatpush.msrb.mxu1 %v3090_v63  ;;  %v5404_v63 = vunpack.i.h.bf16 %v8391_v35  ;;  %v8992_v35 = vmax.f32 %v7855_v29, 0.0 }
 0xa20   : > { %v5399_v11 = vunpack.i.h.bf16 %v5397_v54  ;;  %v5398_v33 = vunpack.i.l.bf16 %v5397_v54  ;;  %v5394_v59 = vunpack.i.h.bf16 %v5392_v39  ;;  %v5393_v31 = vunpack.i.l.bf16 %v5392_v39  ;;  %3593 = vmatpush.msrb.mxu0 %v3222_v56 }
 0xa21   : > { %3561 = vmatpush.msrb.mxu1 %v3088_v48  ;;  %v8991_v54 = vmax.f32 %v7852_v5, 0.0  ;;  %v3397_v39 = vsel %vm355_vm1, %v5403_v10, %v5404_v63 }
 0xa22   : > { %3594 = vmatpush.msrb.mxu0 %v3220_v37  ;;  %v3401_v49 = vsel %vm355_vm1, %v5393_v31, %v5394_v59  ;;  %v3399_v6 = vsel %vm355_vm1, %v5398_v33, %v5399_v11  ;;  %v8993_v31 = vmax.f32 %v7806_v43, 0.0  ;;  %v8446_v43 = vld [vmem:[%s8773_s3 + $0x1b8] sm:$0xff] }
 0xa23   : > { %3595 = vmatmul.f32.vlgmr.msrb.gmra.mxu0 %v8368_v15  ;;  %3533 = vmatpush.msra.mxu3 %v3401_v49  ;;  %v8432_v37 = vpop.permute.xlu2 %5416 }
 0xa24   : > { %3637 = vmatpush.msra.mxu0 %v8102_v58  ;;  %3562 = vmatpush.msrb.mxu1 %v8991_v54  ;;  %v5418_v54 = vunpack.i.l.bf16 %v8432_v37 }
 0xa25   : > { %3511 = vmatmul.f32.gmra.mxu2 %v8414_v9  ;;  %3534 = vmatpush.msra.mxu3 %v3399_v6 }
 0xa26   : > { %3638 = vmatpush.msra.mxu0 %v8109_v3  ;;  %3563 = vmatpush.msrb.mxu1 %v8992_v35  ;;  %v5419_v35 = vunpack.i.h.bf16 %v8432_v37 }
 0xa27   : > { %v8426_v56 = vpop.permute.xlu1 %5411  ;;  %v5407_v62 = vpop.permute.xlu0 %5406  ;;  %3535 = vmatpush.msra.mxu3 %v3397_v39  ;;  %v8996_v39 = vunpack.i.l.bf16 %v8140_v13 }
 0xa28   : > { %3639 = vmatpush.msra.mxu0 %v8163_v41  ;;  %v5413_v5 = vunpack.i.l.bf16 %v8426_v56  ;;  %v5409_v48 = vunpack.i.h.bf16 %v5407_v62  ;;  %v5408_v33 = vunpack.i.l.bf16 %v5407_v62  ;;  %3564 = vmatpush.msrb.mxu1 %v8993_v31  ;;  %v5414_v49 = vunpack.i.h.bf16 %v8426_v56 }
 0xa2a   : > { %3640 = vmatpush.msra.mxu0 %v8161_v38  ;;  %3565 = vmatpush.msrb.mxu1 %v7819_v22  ;;  %v3395_v29 = vsel %vm355_vm1, %v5408_v33, %v5409_v48  ;;  %v3402_v10 = vsel %vm355_vm1, %v5394_v59, %v5413_v5  ;;  %v8451_v22 = vld [vmem:[%s8773_s3 + $0x190] sm:$0xff]  ;;  %v8994_v59 = vunpack.i.l.bf16 %v8192_v19  ;;  %v3400_v6 = vsel %vm355_vm1, %v5399_v11, %v5414_v49 }
 0xa2b   : > { %3566 = vmatmul.f32.vlgmr.msrb.gmra.mxu1 %v8170_v55  ;;  %3598 = vmatmul.f32.gmra.mxu0 %v8414_v9  ;;  %v8995_v19 = vunpack.i.h.bf16 %v8138_v52  ;;  %v3396_v52 = vsel %vm355_vm1, %v5409_v48, %v5419_v35  ;;  %v8997_v11 = vunpack.i.h.bf16 %v8140_v13  ;;  %v8998_v13 = vunpack.i.l.bf16 %v8190_v53 }
 0xa2c   : > { %3641 = vmatpush.msra.mxu0 %v8249_v23  ;;  %3666 = vmatpush.msra.mxu1 %v8994_v59  ;;  %v9000_v53 = vunpack.i.h.bf16 %v8011_v57 }
 0xa2d   : > { %3536 = vmatpush.msra.mxu3 %v3395_v29  ;;  %3620 = vmatpush.msrb.mxu2 %v3402_v10 }
 0xa2e   : > { %3514 = vmatmul.f32.gmra.mxu2 %v8446_v43  ;;  %4316 = vmatmul.msk.f32.vlgmr.msra.gmra.mxu3 %vm1840_vm14, %v8451_v22 }
 0xa2f   : > { %4349 = vmatpush.msrb.mxu3 %v8102_v58  ;;  %3642 = vmatpush.msra.mxu0 %v8258_v16  ;;  %v3398_v58 = vsel %vm355_vm1, %v5404_v63, %v5418_v54 }
 0xa30   : > { %3667 = vmatpush.msra.mxu1 %v8995_v19  ;;  %3621 = vmatpush.msrb.mxu2 %v3400_v6 }
 0xa31   : > { %4350 = vmatpush.msrb.mxu3 %v8109_v3  ;;  %3643 = vmatpush.msra.mxu0 %v8277_v40  ;;  %v8483_v3 = vld [vmem:[%s8773_s3 + $0x1d0] sm:$0xff] }
 0xa32   : > { %3668 = vmatpush.msra.mxu1 %v8996_v39  ;;  %3622 = vmatpush.msrb.mxu2 %v3398_v58 }
 0xa33   : > { %4351 = vmatpush.msrb.mxu3 %v8163_v41  ;;  %3644 = vmatpush.msra.mxu0 %v8285_v18  ;;  %v3420_v41 = vld [vmem:[%s8773_s3 + $0x1a8] sm:$0xff] }
 0xa34   : > { %3669 = vmatpush.msra.mxu1 %v8997_v11  ;;  %3623 = vmatpush.msrb.mxu2 %v3396_v52 }
 0xa35   : > { %3569 = vmatmul.f32.gmra.mxu1 %v8203_v12  ;;  %3601 = vmatmul.f32.gmra.mxu0 %v8446_v43 }
 0xa36   : > { %4352 = vmatpush.msrb.mxu3 %v8161_v38  ;;  %3645 = vmatpush.msra.mxu0 %v8358_v44  ;;  %v8999_v38 = vunpack.i.l.bf16 %v8011_v57  ;;  %v9002_v57 = vunpack.i.h.bf16 %v8100_v26  ;;  %v9004_v26 = vunpack.i.h.bf16 %v8236_v46 }
 0xa37   : > { %3670 = vmatpush.msra.mxu1 %v8998_v13  ;;  %3517 = vmatmul.f32.gmra.mxu2 %v8483_v3 }
 0xa38   : > { %4317 = vmatmul.msk.f32.gmra.mxu3 %vm1840_vm14, %v3420_v41  ;;  %3646 = vmatpush.msra.mxu0 %v8356_v42 }
 0xa39   : > { %4353 = vmatpush.msrb.mxu3 %v8249_v23  ;;  %3671 = vmatpush.msra.mxu1 %v5324_v20  ;;  %v3423_v23 = vld [vmem:[%s8773_s3 + $0x1c0] sm:$0xff] }
 0xa3a   : > { %3647 = vmatpush.msra.mxu0 %v8370_v36 }
 0xa3b   : > { %4354 = vmatpush.msrb.mxu3 %v8258_v16  ;;  %3672 = vmatpush.msra.mxu1 %v8999_v38  ;;  %v3426_v16 = vld [vmem:[%s8773_s3 + $0x1d8] sm:$0xff] }
 0xa3c   : > { %3648 = vmatpush.msra.mxu0 %v8377_v32 }
 0xa3d   : > { %4355 = vmatpush.msrb.mxu3 %v8277_v40  ;;  %3673 = vmatpush.msra.mxu1 %v9000_v53  ;;  %v8576_v40 = vpop.permute.xlu2 %3438 }
 0xa3e   : > { %3572 = vmatmul.f32.gmra.mxu1 %v8254_v27  ;;  %3604 = vmatmul.f32.gmra.mxu0 %v8483_v3 }
 0xa3f   : > { %4356 = vmatpush.msrb.mxu3 %v8285_v18  ;;  %3649 = vmatpush.msra.mxu0 %v7931_v2  ;;  %v8582_v18 = vpop.permute.xlu0 %3448 }
 0xa40   : > { %3674 = vmatpush.msra.mxu1 %v9001_v30  ;;  %4318 = vmatmul.msk.f32.gmra.mxu3 %vm1840_vm14, %v3423_v23 }
 0xa41   : > { %4320 = vmatmul.msk.f32.vlgmr.msrb.gmra.mxu2 %vm1840_vm14, %v8451_v22  ;;  %4357 = vmatpush.msrb.mxu3 %v8358_v44 }
 0xa42   : > { %3650 = vmatpush.msra.mxu0 %v7921_v14  ;;  %3675 = vmatpush.msra.mxu1 %v5329_v47 }
 0xa43   : > { %4358 = vmatpush.msrb.mxu3 %v8356_v42 }
 0xa44   : > { %3651 = vmatpush.msra.mxu0 %v7908_v34  ;;  %3676 = vmatpush.msra.mxu1 %v5313_v0 }
 0xa45   : > { %4359 = vmatpush.msrb.mxu3 %v8370_v36 }
 0xa46   : > { %3652 = vmatpush.msra.mxu0 %v7911_v28  ;;  %3677 = vmatpush.msra.mxu1 %v9002_v57 }
 0xa47   : > { %3575 = vmatmul.f32.gmra.mxu1 %v8320_v51  ;;  %4360 = vmatpush.msrb.mxu3 %v8377_v32  ;;  %v3755_v44 = vpop.permute.xlu0 %3754 }
 0xa48   : > { %3707 = vmatpush.msrb.mxu0 %v5413_v5  ;;  %3678 = vmatpush.msra.mxu1 %v9003_v45 }
 0xa49   : > { %3653 = vmatmul.f32.vlgmr.msra.gmra.mxu0 %v8170_v55  ;;  %4319 = vmatmul.msk.f32.gmra.mxu3 %vm1840_vm14, %v3426_v16 }
 0xa4a   : > { %3708 = vmatpush.msrb.mxu0 %v5414_v49  ;;  %4321 = vmatmul.msk.f32.gmra.mxu2 %vm1840_vm14, %v3420_v41 }
 0xa4b   : > { %4361 = vmatpush.msrb.mxu3 %v7931_v2  ;;  %3679 = vmatpush.msra.mxu1 %v9004_v26 }
 0xa4c   : > { %3709 = vmatpush.msrb.mxu0 %v5418_v54 }
 0xa4d   : > { %4362 = vmatpush.msrb.mxu3 %v7921_v14  ;;  %3680 = vmatpush.msra.mxu1 %v5388_v50 }
 0xa4e   : > { %3710 = vmatpush.msrb.mxu0 %v5419_v35 }
 0xa4f   : > { %4363 = vmatpush.msrb.mxu3 %v7908_v34  ;;  %3681 = vmatpush.msra.mxu1 %v5389_v1 }
 0xa50   : > { %3682 = vmatmul.f32.vlgmr.msra.gmra.mxu1 %v8368_v15 }
 0xa51   : > { %4324 = vmatmul.msk.f32.vlgmr.msrb.gmra.mxu0 %vm1840_vm14, %v8451_v22  ;;  %4364 = vmatpush.msrb.mxu3 %v7911_v28 }
 0xa52   : > { %4322 = vmatmul.msk.f32.gmra.mxu2 %vm1840_vm14, %v3423_v23  ;;  %3656 = vmatmul.f32.vlgmr.msrb.gmra.mxu3 %v8203_v12  ;;  %v8574_v12 = vpop.permute.xlu1 %3443 }
 0xa58   : > { %3685 = vmatmul.f32.gmra.mxu1 %v8414_v9  ;;  %v8592_v9 = vpop.permute.xlu0 %3433 }
 0xa59   : > { %4325 = vmatmul.msk.f32.gmra.mxu0 %vm1840_vm14, %v3420_v41 }
 0xa5a   : > { %4323 = vmatmul.msk.f32.gmra.mxu2 %vm1840_vm14, %v3426_v16  ;;  %3659 = vmatmul.f32.gmra.mxu3 %v8254_v27  ;;  %v8584_v7 = vpop.permute.xlu1 %3756 }
 0xa60   : > { %3688 = vmatmul.f32.gmra.mxu1 %v8446_v43  ;;  %v8599_v29 = vpop.permute.xlu0 %3752 }
 0xa61   : > { %4326 = vmatmul.msk.f32.gmra.mxu0 %vm1840_vm14, %v3423_v23  ;;  %v3766_v23 = vsel %vm307_vm5, %v3755_v44, %v8584_v7 }
 0xa62   : > { %3662 = vmatmul.f32.gmra.mxu3 %v8320_v51  ;;  %v8586_v51 = vpop.permute.xlu2 %3758  ;;  %v3749_v15 = vpop.permute.xlu1 %3748 }
 0xa68   : > { %3691 = vmatmul.f32.gmra.mxu1 %v8483_v3 }
 0xa69   : > { %4327 = vmatmul.msk.f32.gmra.mxu0 %vm1840_vm14, %v3426_v16 }
 0xa6a   : > { %v8588_v1 = vpop.permute.xlu2 %3750  ;;  %v3743_v56 = vpop.permute.xlu1 %3742 }
 0xa6b   : > { %v3764_v39 = vsel %vm307_vm5, %v3749_v15, %v8588_v1 }
 0xa72   : > { %v8594_v33 = vpop.permute.xlu2 %3744  ;;  %v3737_v6 = vpop.permute.xlu1 %3736 }
 0xa73   : > { %v3762_v30 = vsel %vm307_vm5, %v3743_v56, %v8594_v33 }
 0xa78   : > { %v3480_v34 = vpop.f32.mrf.mxu0 }
 0xa79   : > { %v3481_v43 = vadd.f32 %v3480_v34, %v8592_v9  ;;  %v8615_v34 = vpop.permute.xlu0 %3746 }
 0xa7a   : > { %v3739_v57 = vpop.permute.xlu2 %3738 }
 0xa7b   : > { %v3760_v26 = vsel %vm307_vm5, %v3737_v6, %v3739_v57 }
 0xa80   : > { %v3483_v28 = vpop.f32.mrf.mxu0 }
 0xa81   : > { %v3484_v10 = vadd.f32 %v3483_v28, %v8576_v40 }
 0xa88   : > { %v3486_v14 = vpop.f32.mrf.mxu0 }
 0xa89   : > { %v3487_v31 = vadd.f32 %v3486_v14, %v8574_v12 }
 0xa90   : > { %v3489_v2 = vpop.f32.mrf.mxu0 }
 0xa91   : > { %v3490_v22 = vadd.f32 %v3489_v2, %v8582_v18 }
 0xa9f   : > { %v3509_v24 = vpop.f32.mrf.mxu2 }
 0xaa0   : > { %v8572_v55 = vpop.f32.mrf.mxu0  ;;  %v3510_v19 = vadd.f32 %v3509_v24, %v3481_v43 }
 0xaa8   : > { %v3512_v46 = vpop.f32.mrf.mxu2  ;;  %v8578_v27 = vpop.f32.mrf.mxu1 }
 0xaa9   : > { %v8580_v20 = vpop.f32.mrf.mxu0  ;;  %v3513_v59 = vadd.f32 %v3512_v46, %v3484_v10 }
 0xab1   : > { %v3515_v47 = vpop.f32.mrf.mxu2  ;;  %v3538_v0 = vpop.f32.mrf.mxu3 }
 0xab2   : > { %v3570_v60 = vpop.f32.mrf.mxu1  ;;  %v3602_v42 = vpop.f32.mrf.mxu0  ;;  %v3516_v49 = vadd.f32 %v3515_v47, %v3487_v31  ;;  %v3539_v3 = vadd.f32 %v3538_v0, %v3510_v19  ;;  %v3568_v31 = vadd.f32 %v8578_v27, %v8592_v9 }
 0xab3   : > { %v3741_v27 = vpop.permute.xlu0 %3740 }
 0xab4   : > { %v3780_v28 = vadd.f32 %v3760_v26, %v3539_v3 }
 0xab6   : > { %v3792_v15 = vmax.f32 %v3780_v28, 0.0 }
 0xaba   : > { %v3518_v36 = vpop.f32.mrf.mxu2 }
 0xabb   : > { %v3541_v32 = vpop.f32.mrf.mxu3  ;;  %v3573_v50 = vpop.f32.mrf.mxu1  ;;  %v3519_v35 = vadd.f32 %v3518_v36, %v3490_v22  ;;  %v3571_v36 = vadd.f32 %v3570_v60, %v8576_v40  ;;  %v3804_v60 = vmul.f32 %v3792_v15, %v5650_v61 }
 0xabc   : > { %v8590_v63 = vpop.f32.mrf.mxu0  ;;  %v3542_v58 = vadd.f32 %v3541_v32, %v3513_v59  ;;  %v3574_v46 = vadd.f32 %v3573_v50, %v8574_v12  ;;  %v8630_v59 = vld [vmem:[%s8773_s3 + $0x1e0] sm:$0xff] }
 0xabd   : > { %v3600_v43 = vadd.f32 %v8580_v20, %v3571_v36  ;;  %v3765_v20 = vsel %vm307_vm5, %v8588_v1, %v8599_v29  ;;  %v3763_v1 = vsel %vm307_vm5, %v8594_v33, %v8615_v34 }
 0xabe   : > { %v3783_v16 = vadd.f32 %v3762_v30, %v3542_v58 }
 0xac0   : > { %v3795_v24 = vmax.f32 %v3783_v16, 0.0 }
 0xac2   : > { %v3807_v50 = vmul.f32 %v3795_v24, %v5650_v61 }
 0xac3   : > { %v3544_v62 = vpop.f32.mrf.mxu3 }
 0xac4   : > { %v3576_v5 = vpop.f32.mrf.mxu1  ;;  %v3625_v48 = vpop.f32.mrf.mxu2  ;;  %v3545_v54 = vadd.f32 %v3544_v62, %v3516_v49  ;;  %v3603_v49 = vadd.f32 %v3602_v42, %v3574_v46 }
 0xac5   : > { %v3577_v10 = vadd.f32 %v3576_v5, %v8582_v18 }
 0xac6   : > { %v8597_v37 = vpop.f32.mrf.mxu0  ;;  %v3786_v41 = vadd.f32 %v3764_v39, %v3545_v54  ;;  %v3597_v54 = vadd.f32 %v8572_v55, %v3568_v31 }
 0xac7   : > { %v3606_v42 = vadd.f32 %v8590_v63, %v3577_v10  ;;  %v3767_v63 = vsel %vm307_vm5, %v8584_v7, %v8586_v51  ;;  %v3655_v7 = vadd.f32 %v8597_v37, %v8592_v9 }
 0xac8   : > { %v3798_v14 = vmax.f32 %v3786_v41, 0.0  ;;  %v3626_v5 = vadd.f32 %v3625_v48, %v3597_v54  ;;  %v3761_v48 = vsel %vm307_vm5, %v3739_v57, %v3741_v27 }
 0xaca   : > { %v3810_v56 = vmul.f32 %v3798_v14, %v5650_v61 }
 0xacc   : > { %v3547_v52 = vpop.f32.mrf.mxu3 }
 0xacd   : > { %v3628_v11 = vpop.f32.mrf.mxu2  ;;  %v3548_v13 = vadd.f32 %v3547_v52, %v3519_v35  ;;  %v8606_v38 = vpop.f32.mrf.mxu1 }
 0xace   : > { %v8608_v53 = vpop.f32.mrf.mxu0  ;;  %v3629_v6 = vadd.f32 %v3628_v11, %v3600_v43 }
 0xacf   : > { %v3789_v45 = vadd.f32 %v3766_v23, %v3548_v13  ;;  %v3781_v23 = vadd.f32 %v3761_v48, %v3626_v5 }
 0xad0   : > { %v3784_v11 = vadd.f32 %v3763_v1, %v3629_v6 }
 0xad1   : > { %v3801_v2 = vmax.f32 %v3789_v45, 0.0  ;;  %v3817_v45 = vld [vmem:[%s8773_s3 + $0x1f8] sm:$0xff]  ;;  %v3793_v57 = vmax.f32 %v3781_v23, 0.0 }
 0xad2   : > { %v3796_v26 = vmax.f32 %v3784_v11, 0.0 }
 0xad3   : > { %v3813_v47 = vmul.f32 %v3801_v2, %v5650_v61 }
 0xad4   : > { %v3808_v37 = vmul.f32 %v3796_v26, %v5656_v8 }
 0xad5   : > { %v3631_v0 = vpop.f32.mrf.mxu2  ;;  %v3657_v44 = vpop.f32.mrf.mxu3  ;;  %3848 = vmatpush.msra.mxu2 %v3813_v47 }
 0xad6   : > { %v3686_v32 = vpop.f32.mrf.mxu1  ;;  %v3715_v62 = vpop.f32.mrf.mxu0  ;;  %v3632_v22 = vadd.f32 %v3631_v0, %v3603_v49  ;;  %v3658_v41 = vadd.f32 %v3657_v44, %v8576_v40  ;;  %v3684_v40 = vadd.f32 %v8606_v38, %v3655_v7  ;;  %v3805_v38 = vmul.f32 %v3793_v57, %v5656_v8  ;;  %v3934_v57 = vld [vmem:[%s8774_s4 + $0xc8] sm:$0xff] }
 0xad7   : > { %3849 = vmatpush.msra.mxu2 %v3810_v56 }
 0xad8   : > { %v3787_v58 = vadd.f32 %v3765_v20, %v3632_v22  ;;  %v3687_v28 = vadd.f32 %v3686_v32, %v3658_v41  ;;  %v3713_v15 = vadd.f32 %v8608_v53, %v3684_v40  ;;  %v3823_v22 = vpop.permute.xlu2 %3822 }
 0xad9   : > { %3850 = vmatpush.msra.mxu2 %v3807_v50 }
 0xada   : > { %v3799_v30 = vmax.f32 %v3787_v58, 0.0  ;;  %v3716_v44 = vadd.f32 %v3715_v62, %v3687_v28  ;;  %v3782_v62 = vadd.f32 %v3741_v27, %v3713_v15 }
 0xadb   : > { %3851 = vmatpush.msra.mxu2 %v3804_v60 }
 0xadc   : > { %4328 = vmatmul.msk.f32.vlgmr.msra.gmra.mxu2 %vm1840_vm14, %v8630_v59  ;;  %v3811_v47 = vmul.f32 %v3799_v30, %v5656_v8  ;;  %v3794_v50 = vmax.f32 %v3782_v62, 0.0 }
 0xadd   : > { %v3634_v19 = vpop.f32.mrf.mxu2  ;;  %v3660_v35 = vpop.f32.mrf.mxu3 }
 0xade   : > { %v3635_v39 = vadd.f32 %v3634_v19, %v3606_v42  ;;  %v3661_v52 = vadd.f32 %v3660_v35, %v8574_v12  ;;  %v3689_v55 = vpop.f32.mrf.mxu1  ;;  %v3718_v3 = vpop.f32.mrf.mxu0 }
 0xadf   : > { %v3828_v35 = vpop.permute.xlu1 %3827 }
 0xae0   : > { %v3790_v13 = vadd.f32 %v3767_v63, %v3635_v39  ;;  %v3690_v12 = vadd.f32 %v3689_v55, %v3661_v52 }
 0xae2   : > { %v3802_v16 = vmax.f32 %v3790_v13, 0.0  ;;  %v3719_v2 = vadd.f32 %v3718_v3, %v3690_v12 }
 0xae4   : > { %v3814_v33 = vmul.f32 %v3802_v16, %v5656_v8  ;;  %4329 = vmatmul.msk.f32.gmra.mxu2 %vm1840_vm14, %v3817_v45  ;;  %v3788_v36 = vadd.f32 %v8599_v29, %v3719_v2 }
 0xae5   : > { %v3663_v14 = vpop.f32.mrf.mxu3 }
 0xae6   : > { %v3664_v24 = vadd.f32 %v3663_v14, %v8582_v18  ;;  %3871 = vmatpush.msra.mxu3 %v3814_v33  ;;  %v3692_v46 = vpop.f32.mrf.mxu1  ;;  %v3721_v0 = vpop.f32.mrf.mxu0  ;;  %v3785_v18 = vadd.f32 %v8615_v34, %v3716_v44  ;;  %v3800_v31 = vmax.f32 %v3788_v36, 0.0 }
 0xae8   : > { %v3693_v9 = vadd.f32 %v3692_v46, %v3664_v24  ;;  %3872 = vmatpush.msra.mxu3 %v3811_v47  ;;  %v3797_v49 = vmax.f32 %v3785_v18, 0.0  ;;  %v3812_v29 = vmul.f32 %v3800_v31, %v5654_v4  ;;  %v3981_v46 = vpop.permute.xlu2 %3980  ;;  %v5420_v47 = vld [vmem:[%s8773_s3 + $0x210] sm:$0xff]  ;;  %v4079_v18 = vld [vmem:[%s8774_s4 + $0xd8] sm:$0xff] }
 0xaea   : > { %v3722_v32 = vadd.f32 %v3721_v0, %v3693_v9  ;;  %3873 = vmatpush.msra.mxu3 %v3808_v37  ;;  %v3809_v43 = vmul.f32 %v3797_v49, %v5654_v4  ;;  %v3930_v0 = vld [vmem:[%s238_s17] sm:$0xff] }
 0xaec   : > { %v3791_v56 = vadd.f32 %v8586_v51, %v3722_v32  ;;  %3874 = vmatpush.msra.mxu3 %v3805_v38  ;;  %v3806_v51 = vmul.f32 %v3794_v50, %v5654_v4 }
 0xaed   : > { %4330 = vmatmul.msk.f32.vlgmr.msra.gmra.mxu3 %vm1840_vm14, %v8630_v59 }
 0xaee   : > { %v3803_v10 = vmax.f32 %v3791_v56, 0.0  ;;  %4012 = vmatpush.msrb.mxu3 %v3930_v0 }
 0xaf0   : > { %v3815_v53 = vmul.f32 %v3803_v10, %v5654_v4  ;;  %v3983_v44 = vpop.permute.xlu2 %3982 }
 0xaf2   : > { %3894 = vmatpush.msrb.mxu1 %v3815_v53 }
 0xaf4   : > { %3895 = vmatpush.msrb.mxu1 %v3812_v29 }
 0xaf5   : > { %4331 = vmatmul.msk.f32.gmra.mxu3 %vm1840_vm14, %v3817_v45 }
 0xaf6   : > { %3896 = vmatpush.msrb.mxu1 %v3809_v43 }
 0xaf8   : > { %3897 = vmatpush.msrb.mxu1 %v3806_v51  ;;  %v3985_v9 = vpop.permute.xlu2 %3984 }
 0xaf9   : > { %4332 = vmatmul.msk.f32.vlgmr.msrb.gmra.mxu1 %vm1840_vm14, %v8630_v59 }
 0xafd   : > { %4338 = vmatmul.msk.f32.vlgmr.msrb.gmra.mxu3 %vm3988_vm0, %v3981_v46 }
 0xb00   : > { %v3987_v37 = vpop.permute.xlu2 %3986 }
 0xb01   : > { %4333 = vmatmul.msk.f32.gmra.mxu1 %vm1840_vm14, %v3817_v45 }
 0xb05   : > { %4339 = vmatmul.msk.f32.gmra.mxu3 %vm3988_vm0, %v3983_v44 }
 0xb08   : > { %v4063_v62 = vpop.permute.xlu2 %4062 }
 0xb0d   : > { %4340 = vmatmul.msk.f32.gmra.mxu3 %vm3988_vm0, %v3985_v9 }
 0xb15   : > { %4341 = vmatmul.msk.f32.gmra.mxu3 %vm3988_vm0, %v3987_v37 }
 0xb5f   : > { %v3853_v34 = vpop.f32.mrf.mxu2 }
 0xb60   : > { %v3854_v27 = vadd.f32 %v3853_v34, %v3823_v22 }
 0xb62   : > { %v3905_v42 = vmax.f32 %v3854_v27, 0.0 }
 0xb64   : > { %v3911_v59 = vmul.f32 %v3905_v42, %v5650_v61 }
 0xb67   : > { %v3856_v5 = vpop.f32.mrf.mxu2 }
 0xb68   : > { %v3857_v3 = vadd.f32 %v3856_v5, %v3828_v35 }
 0xb6a   : > { %v3908_v41 = vmax.f32 %v3857_v3, 0.0  ;;  %v4084_v3 = vld [vmem:[%s8773_s3 + $0x2a0] sm:$0xff] }
 0xb6c   : > { %v3914_v45 = vmul.f32 %v3908_v41, %v5650_v61  ;;  %v4080_v61 = vld [vmem:[%s8774_s4 + $0xe0] sm:$0xff] }
 0xb70   : > { %v3876_v60 = vpop.f32.mrf.mxu3 }
 0xb71   : > { %v3877_v54 = vadd.f32 %v3876_v60, %v3823_v22 }
 0xb73   : > { %v3906_v6 = vmax.f32 %v3877_v54, 0.0 }
 0xb75   : > { %v3912_v58 = vmul.f32 %v3906_v6, %v5656_v8 }
 0xb76   : > { %v3899_v20 = vpop.f32.mrf.mxu1 }
 0xb77   : > { %v3900_v19 = vadd.f32 %v3899_v20, %v3823_v22  ;;  %v3917_v1 = vadd.f32 %v3912_v58, %v3911_v59  ;;  %v4083_v59 = vld [vmem:[%s8773_s3 + $0x288] sm:$0xff] }
 0xb78   : > { %v3879_v39 = vpop.f32.mrf.mxu3 }
 0xb79   : > { %v3907_v52 = vmax.f32 %v3900_v19, 0.0  ;;  %v3880_v55 = vadd.f32 %v3879_v39, %v3828_v35 }
 0xb7b   : > { %v3913_v63 = vmul.f32 %v3907_v52, %v5654_v4  ;;  %v3909_v48 = vmax.f32 %v3880_v55, 0.0  ;;  %v4082_v55 = vld [vmem:[%s8773_s3 + $0x270] sm:$0xff] }
 0xb7d   : > { %v3919_v11 = vsel %vm3918_vm15, %v3913_v63, 0.0  ;;  %v3915_v16 = vmul.f32 %v3909_v48, %v5656_v8  ;;  %v3932_v8 = vld [vmem:[%s8774_s4 + $0xb8] sm:$0xff] }
 0xb7e   : > { %v3902_v13 = vpop.f32.mrf.mxu1  ;;  %v3920_v23 = vadd.f32 %v3919_v11, %v3917_v1  ;;  %v4085_v63 = vld [vmem:[%s8773_s3 + $0x2b8] sm:$0xff] }
 0xb7f   : > { %v3903_v30 = vadd.f32 %v3902_v13, %v3828_v35  ;;  %v3923_v26 = vadd.f32 %v3915_v16, %v3914_v45 }
 0xb80   : > { %3921 = vadd.xlane.f32.xlu1 %v3920_v23  ;;  %v4014_v56 = vpop.f32.mrf.mxu3 }
 0xb81   : > { %v3910_v12 = vmax.f32 %v3903_v30, 0.0 }
 0xb83   : > { %v3916_v7 = vmul.f32 %v3910_v12, %v5654_v4  ;;  %v4151_v4 = vld [vmem:[%s8774_s4 + $0xf0] sm:$0x1] }
 0xb85   : > { %v3924_v28 = vsel %vm3918_vm15, %v3916_v7, 0.0 }
 0xb86   : > { %v3925_v33 = vadd.f32 %v3924_v28, %v3923_v26 }
 0xb88   : > { %3926 = vadd.xlane.f32.xlu0 %v3925_v33  ;;  %v4017_v31 = vpop.f32.mrf.mxu3 }
 0xb90   : > { %v4020_v49 = vpop.f32.mrf.mxu3 }
 0xb98   : > { %v4023_v50 = vpop.f32.mrf.mxu3 }
 0xb9c   : > { %4067 = vperm.xlu0 %4579, %v3934_v57  }
 0xba4   : > { %4057 = vperm.xlu0 %4579, %v3932_v8  }
 0xbac   : > { %4098 = vperm.xlu0 %4579, %v4080_v61   ;;  %v4152_v61 = vld [vmem:[%s8773_s3 + $0x2d0] ss:$0 sm:$0xff] }
 0xbb4   : > { %4155 = vperm.xlu0 %4579, %v4151_v4  }
 0xbf3   : > { %v3922_v14 = vpop.xlane.xlu1 %3921 }
 0xbf4   : > { %v3928_v24 = vmul.f32 0.00390625, %v3922_v14 }
 0xbfb   : > { %v3927_v40 = vpop.xlane.xlu0 %3926 }
 0xbfc   : > { %v3929_v2 = vmul.f32 0.00390625, %v3927_v40 }
 0xbfe   : > { %3965 = vmatpush.msrb.mxu2 %v3929_v2 }
 0xc00   : > { %3966 = vmatpush.msrb.mxu2 %v3928_v24 }
 0xc01   : > { %4334 = vmatmul.msk.f32.vlgmr.msrb.gmra.mxu2 %vm711_vm13, %v5420_v47 }
 0xc09   : > { %4335 = vmatmul.msk.f32.gmra.mxu2 %vm711_vm13, %v8151_v17  ;;  %v4081_v17 = vld [vmem:[%s8774_s4 + $0xe8] sm:$0xff] }
 0xc0e   : > { %v4068_v43 = vpop.permute.xlu0 %4067 }
 0xc11   : > { %4336 = vmatmul.msk.f32.gmra.mxu2 %vm711_vm13, %v8175_v21  ;;  %v4078_v21 = vld [vmem:[%s8774_s4 + $0xd0] sm:$0xff] }
 0xc16   : > { %v4058_v19 = vpop.permute.xlu0 %4057 }
 0xc19   : > { %4337 = vmatmul.msk.f32.gmra.mxu2 %vm711_vm13, %v8209_v25  ;;  %v3931_v25 = vld [vmem:[%s8774_s4 + $0xb0] sm:$0xff] }
 0xc1e   : > { %v4099_v13 = vpop.permute.xlu0 %4098 }
 0xc26   : > { %v4156_v4 = vpop.permute.xlu0 %4155 }
 0xc84   : > { %v3968_v15 = vpop.f32.mrf.mxu2 }
 0xc85   : > { %4028 = vperm.xlu2 %4458, %v3968_v15  }
 0xc8c   : > { %v3971_v36 = vpop.f32.mrf.mxu2 }
 0xc8d   : > { %4033 = vperm.xlu1 %4457, %v3971_v36  }
 0xc94   : > { %v3974_v32 = vpop.f32.mrf.mxu2 }
 0xc95   : > { %4103 = vperm.xlu1 %4457, %v4081_v17   ;;  %4038 = vperm.xlu2 %4458, %v3974_v32  }
 0xc9c   : > { %v3977_v38 = vpop.f32.mrf.mxu2 }
 0xc9d   : > { %4088 = vperm.xlu1 %4457, %v4078_v21   ;;  %4043 = vperm.xlu2 %4458, %v3977_v38  }
 0xca5   : > { %4052 = vperm.xlu2 %4458, %v3931_v25  }
 0xcad   : > { %4093 = vperm.xlu2 %4458, %v4079_v18  }
 0xcdf   : > { %v4029_v10 = vpop.permute.xlu2 %4028 }
 0xce0   : > { %v4046_v20 = vadd.f32 %v4029_v10, %v4014_v56 }
 0xcef   : > { %v4039_v53 = vpop.permute.xlu2 %4038 }
 0xcf0   : > { %v4048_v29 = vadd.f32 %v4039_v53, %v4020_v49 }
 0xcf2   : > { %v4072_v22 = vadd.f32 %v4063_v62, %v4048_v29 }
 0xcf4   : > { %v4076_v27 = vmax.f32 %v4072_v22, 0.0 }
 0xcf7   : > { %v4044_v51 = vpop.permute.xlu2 %4043 }
 0xcf8   : > { %v4049_v34 = vadd.f32 %v4044_v51, %v4023_v50 }
 0xcfa   : > { %v4073_v60 = vadd.f32 %v4068_v43, %v4049_v34 }
 0xcfc   : > { %v4077_v54 = vmax.f32 %v4073_v60, 0.0 }
 0xcfe   : > { %4130 = vmatpush.msra.mxu0 %v4077_v54 }
 0xcff   : > { %v4034_v6 = vpop.permute.xlu1 %4033  ;;  %v4053_v42 = vpop.permute.xlu2 %4052 }
 0xd00   : > { %v4047_v5 = vadd.f32 %v4034_v6, %v4017_v31  ;;  %4131 = vmatpush.msra.mxu0 %v4076_v27  ;;  %v4070_v58 = vadd.f32 %v4053_v42, %v4046_v20 }
 0xd02   : > { %v4071_v35 = vadd.f32 %v4058_v19, %v4047_v5  ;;  %v4074_v52 = vmax.f32 %v4070_v58, 0.0 }
 0xd04   : > { %v4075_v39 = vmax.f32 %v4071_v35, 0.0 }
 0xd06   : > { %4132 = vmatpush.msra.mxu0 %v4075_v39 }
 0xd07   : > { %v4104_v41 = vpop.permute.xlu1 %4103  ;;  %v4094_v12 = vpop.permute.xlu2 %4093 }
 0xd08   : > { %4133 = vmatpush.msra.mxu0 %v4074_v52 }
 0xd09   : > { %4342 = vmatmul.msk.f32.vlgmr.msra.gmra.mxu0 %vm1840_vm14, %v4082_v55 }
 0xd0f   : > { %v4089_v26 = vpop.permute.xlu1 %4088 }
 0xd11   : > { %4343 = vmatmul.msk.f32.gmra.mxu0 %vm1840_vm14, %v4083_v59 }
 0xd19   : > { %4344 = vmatmul.msk.f32.gmra.mxu0 %vm1840_vm14, %v4084_v3 }
 0xd21   : > { %4345 = vmatmul.msk.f32.gmra.mxu0 %vm1840_vm14, %v4085_v63 }
 0xd86   : > { %v4135_v1 = vpop.f32.mrf.mxu0 }
 0xd87   : > { %v4136_v28 = vadd.f32 %v4135_v1, %v4089_v26 }
 0xd89   : > { %v4147_v8 = vmax.f32 %v4136_v28, 0.0 }
 0xd8e   : > { %v4138_v48 = vpop.f32.mrf.mxu0 }
 0xd8f   : > { %v4139_v45 = vadd.f32 %v4138_v48, %v4094_v12 }
 0xd91   : > { %v4148_v57 = vmax.f32 %v4139_v45, 0.0 }
 0xd96   : > { %v4141_v11 = vpop.f32.mrf.mxu0 }
 0xd97   : > { %v4142_v30 = vadd.f32 %v4141_v11, %v4099_v13 }
 0xd99   : > { %v4149_v33 = vmax.f32 %v4142_v30, 0.0 }
 0xd9e   : > { %v4144_v23 = vpop.f32.mrf.mxu0 }
 0xd9f   : > { %v4145_v16 = vadd.f32 %v4144_v23, %v4104_v41 }
 0xda1   : > { %v4150_v7 = vmax.f32 %v4145_v16, 0.0 }
 0xda3   : > { %4173 = vmatpush.msra.mxu1 %v4150_v7 }
 0xda5   : > { %4174 = vmatpush.msra.mxu1 %v4149_v33 }
 0xda7   : > { %4175 = vmatpush.msra.mxu1 %v4148_v57 }
 0xda9   : > { %4176 = vmatpush.msra.mxu1 %v4147_v8 }
 0xdaa   : > { %4346 = vmatmul.msk.f32.vlgmr.msra.gmra.mxu1 %vm1840_vm14, %v4152_v61 }
 0xe27   : > { %v4178_v14 = vpop.f32.mrf.mxu1 }
 0xe28   : > { %v4179_v40 = vadd.f32 %v4178_v14, %v4156_v4 }
 0xe2a   : > { %4181 = vst [vmem:[%s229_s11] sm:$0x1] %v4179_v40 }
 0xe2b   : > { %5448 = shalt.err (!%p5445_p3)
}
 0xe2c   : > { %4366 = dma.vmem_to_hbm [thread:$0]  (%p5565_p5), %s4194_s23, 16, %s4196_s14, %s4183_s25  }
 0xe2d PF: > { %p4372_p4 = scmp.ge.s32.totalorder %s5483_s21, 2  ;;  %s4207_s30 = sand.u32 1, %s5471_s18  }
 0xe2e   : > { %s4208_s6 = scalar_lea.sflag [#allocation4], %s4207_s30 }
 0xe2f   : > { %p4369_p7 = pnand %p4372_p4, %p5569_p6 }
 0xe31   : > { %p4370_p8 = pneg %p4369_p7 }
 0xe33   : > { %5466 = dma.done.wait (%p4370_p8), %s4208_s6, 16  }
 0xe34   : > { %5468 = vsyncadd (%p4370_p8), %s4208_s6, 4294967280  ;;  %p15_p9 = scmp.ge.s32.totalorder %s5552_s24, 4   ;;  %s9005_s18 = smov %s5475_s19 }
 0xe35   : > { %s9006_s19 = smov %s5479_s20  ;;  %s9007_s20 = smov %s5563_s27 }
 0xe36   : > { %s9008_s21 = smov %s5552_s24  ;;  %17 = sbr.rel (!%p15_p9) target bundleno = 3 (0x3), region = 78 }
 0xe3b   :  { %4213 = vsyncpa [#allocation4], 1 }
 0xe3c   :  { %4215 = vsyncpa [#allocation4 + $0x1], 1 }

</bundles_post_ra>
